<compile_context>
chip_gen: v7x
topology: tpu7x:2x2x1
jax: 0.10.0
libtpu: 0.0.40
codegen_flags: <defaults>
</compile_context>

<pallas_src>
import jax
import jax.numpy as jnp
from jax.experimental import pallas as pl
from jax.experimental.pallas import tpu as pltpu


def mlp_kernel(x_ref, w1_ref, b1_ref, w2_ref, b2_ref, w3_ref, b3_ref, o_ref):
    # x in f32; dots take bf16 operands with f32 accumulation.
    x = x_ref[...].astype(jnp.bfloat16)                                # (B, 784)

    # fc_1 + ReLU  (bias/ReLU in f32)
    h1 = jnp.dot(x, w1_ref[...], preferred_element_type=jnp.float32)   # (B, 800)
    h1 = jnp.maximum(h1 + b1_ref[...], 0.0)

    # fc_2 + ReLU
    h2 = jnp.dot(h1.astype(jnp.bfloat16), w2_ref[...],
                 preferred_element_type=jnp.float32)                   # (B, 800)
    h2 = jnp.maximum(h2 + b2_ref[...], 0.0)

    # fc_3
    logits = jnp.dot(h2.astype(jnp.bfloat16), w3_ref[...],
                     preferred_element_type=jnp.float32)               # (B, 10)
    logits = logits + b3_ref[...]

    # Dropout(p=0.5): identity in eval/inference mode.
    # TODO(synk): training-mode stochastic dropout (and the n_dropouts MC-dropout
    # branches) would need pltpu.prng_seed / pltpu.prng_random_bits + a seed input.

    # Softmax over dim=0 (batch axis), matching nn.Softmax(dim=0).
    m = jnp.max(logits, axis=0, keepdims=True)                         # (1, 10)
    e = jnp.exp(logits - m)                                            # (B, 10)
    s = jnp.sum(e, axis=0, keepdims=True)                              # (1, 10)
    inv_s = pl.reciprocal(s, approx=True)                              # EUP slot
    o_ref[...] = (e * inv_s).astype(o_ref.dtype)


def prepare_params(w1, b1, w2, b2, w3, b3):
    """One-time parameter prep (hoisted out of the per-call hot path).

    Takes PyTorch-layout (out_features, in_features) f32 weights and (out,)
    biases; returns (in, out) bf16 weights and (1, out) f32 biases ready for
    the kernel's `x @ W + b` layout.
    """
    w1_t = w1.T.astype(jnp.bfloat16)     # (784, 800)
    w2_t = w2.T.astype(jnp.bfloat16)     # (800, 800)
    w3_t = w3.T.astype(jnp.bfloat16)     # (800, 10)
    b1_r = b1.reshape(1, -1)             # (1, 800) f32
    b2_r = b2.reshape(1, -1)             # (1, 800) f32
    b3_r = b3.reshape(1, -1)             # (1, 10)  f32
    return w1_t, b1_r, w2_t, b2_r, w3_t, b3_r


def mlp_forward(x, w1_t, b1_r, w2_t, b2_r, w3_t, b3_r):
    """x: (B, 784) float32.  Params already run through `prepare_params`."""
    B = x.shape[0]

    full = lambda shape: pl.BlockSpec(shape, lambda: (0, 0),
                                      memory_space=pltpu.VMEM)

    return pl.pallas_call(
        mlp_kernel,
        out_shape=jax.ShapeDtypeStruct((B, 10), x.dtype),
        grid=(),
        in_specs=[
            full(x.shape),
            full(w1_t.shape), full(b1_r.shape),
            full(w2_t.shape), full(b2_r.shape),
            full(w3_t.shape), full(b3_r.shape),
        ],
        out_specs=full((B, 10)),
    )(x, w1_t, b1_r, w2_t, b2_r, w3_t, b3_r)


def init_params(key):
    """Deterministic init matching nn.Linear shapes (uniform ~ PyTorch default)."""
    def linear(k, out_f, in_f):
        k1, k2 = jax.random.split(k)
        bound = 1.0 / jnp.sqrt(in_f)
        w = jax.random.uniform(k1, (out_f, in_f), jnp.float32, -bound, bound)
        b = jax.random.uniform(k2, (out_f,), jnp.float32, -bound, bound)
        return w, b

    k1, k2, k3 = jax.random.split(key, 3)
    w1, b1 = linear(k1, 800, 784)
    w2, b2 = linear(k2, 800, 800)
    w3, b3 = linear(k3, 10, 800)
    return w1, b1, w2, b2, w3, b3


if __name__ == "__main__":
    key = jax.random.PRNGKey(0)
    k_x, k_p = jax.random.split(key)

    B = 8
    x = jax.random.normal(k_x, (B, 784), jnp.float32)
    w1, b1, w2, b2, w3, b3 = init_params(k_p)

    # One-time prep (transpose + bf16 cast) outside the hot path.
    params = prepare_params(w1, b1, w2, b2, w3, b3)

    out = mlp_forward(x, *params)
    out = jax.block_until_ready(out)

    # Pure-JAX reference with the SAME bf16 weights / f32 accumulation.
    w1_t, b1_r, w2_t, b2_r, w3_t, b3_r = params
    xb = x.astype(jnp.bfloat16)
    h1 = jnp.maximum(
        jnp.dot(xb, w1_t, preferred_element_type=jnp.float32) + b1_r, 0.0)
    h2 = jnp.maximum(
        jnp.dot(h1.astype(jnp.bfloat16), w2_t,
                preferred_element_type=jnp.float32) + b2_r, 0.0)
    logits = jnp.dot(h2.astype(jnp.bfloat16), w3_t,
                     preferred_element_type=jnp.float32) + b3_r
    ref = jax.nn.softmax(logits, axis=0)  # softmax over dim=0 (batch)

    assert out.shape == (B, 10)
    assert jnp.allclose(out, ref, atol=2e-3, rtol=2e-3), (
        f"max abs err = {jnp.max(jnp.abs(out - ref))}")

    print("KERNEL_OK")
</pallas_src>

<mosaic_0001>
module attributes {stable_mosaic.version = 11 : i64} {
  func.func @mlp_kernel(%arg0: memref<8x784xf32, #tpu.memory_space<vmem>>, %arg1: memref<784x800xbf16, #tpu.memory_space<vmem>>, %arg2: memref<1x800xf32, #tpu.memory_space<vmem>>, %arg3: memref<800x800xbf16, #tpu.memory_space<vmem>>, %arg4: memref<1x800xf32, #tpu.memory_space<vmem>>, %arg5: memref<800x10xbf16, #tpu.memory_space<vmem>>, %arg6: memref<1x10xf32, #tpu.memory_space<vmem>>, %arg7: memref<8x10xf32, #tpu.memory_space<vmem>>) attributes {dimension_semantics = [], scalar_prefetch = 0 : i64, scratch_operands = 0 : i64, tpu.core_type = #tpu.core_type<tc>} {
    %c0 = arith.constant 0 : index
    %c0_0 = arith.constant 0 : index
    %0 = vector.load %arg0[%c0, %c0_0] : memref<8x784xf32, #tpu.memory_space<vmem>>, vector<8x784xf32>
    %1 = arith.truncf %0 : vector<8x784xf32> to vector<8x784xbf16>
    %c0_1 = arith.constant 0 : index
    %c0_2 = arith.constant 0 : index
    %2 = vector.load %arg1[%c0_1, %c0_2] : memref<784x800xbf16, #tpu.memory_space<vmem>>, vector<784x800xbf16>
    %cst = arith.constant dense<0.000000e+00> : vector<8x800xf32>
    %3 = tpu.matmul %1, %2, %cst {dimension_numbers = #tpu.dot_dimension_numbers<[1], [0], [0], [1], [0, 0, 1, 1], [], []>} : vector<8x784xbf16>, vector<784x800xbf16>, vector<8x800xf32> -> vector<8x800xf32>
    %c0_3 = arith.constant 0 : index
    %c0_4 = arith.constant 0 : index
    %4 = vector.load %arg2[%c0_3, %c0_4] : memref<1x800xf32, #tpu.memory_space<vmem>>, vector<1x800xf32>
    %5 = vector.broadcast %4 : vector<1x800xf32> to vector<8x800xf32>
    %6 = arith.addf %3, %5 : vector<8x800xf32>
    %cst_5 = arith.constant 0.000000e+00 : f32
    %7 = vector.broadcast %cst_5 : f32 to vector<8x800xf32>
    %8 = arith.maximumf %6, %7 : vector<8x800xf32>
    %9 = arith.truncf %8 : vector<8x800xf32> to vector<8x800xbf16>
    %c0_6 = arith.constant 0 : index
    %c0_7 = arith.constant 0 : index
    %10 = vector.load %arg3[%c0_6, %c0_7] : memref<800x800xbf16, #tpu.memory_space<vmem>>, vector<800x800xbf16>
    %cst_8 = arith.constant dense<0.000000e+00> : vector<8x800xf32>
    %11 = tpu.matmul %9, %10, %cst_8 {dimension_numbers = #tpu.dot_dimension_numbers<[1], [0], [0], [1], [0, 0, 1, 1], [], []>} : vector<8x800xbf16>, vector<800x800xbf16>, vector<8x800xf32> -> vector<8x800xf32>
    %c0_9 = arith.constant 0 : index
    %c0_10 = arith.constant 0 : index
    %12 = vector.load %arg4[%c0_9, %c0_10] : memref<1x800xf32, #tpu.memory_space<vmem>>, vector<1x800xf32>
    %13 = vector.broadcast %12 : vector<1x800xf32> to vector<8x800xf32>
    %14 = arith.addf %11, %13 : vector<8x800xf32>
    %cst_11 = arith.constant 0.000000e+00 : f32
    %15 = vector.broadcast %cst_11 : f32 to vector<8x800xf32>
    %16 = arith.maximumf %14, %15 : vector<8x800xf32>
    %17 = arith.truncf %16 : vector<8x800xf32> to vector<8x800xbf16>
    %c0_12 = arith.constant 0 : index
    %c0_13 = arith.constant 0 : index
    %18 = vector.load %arg5[%c0_12, %c0_13] : memref<800x10xbf16, #tpu.memory_space<vmem>>, vector<800x10xbf16>
    %cst_14 = arith.constant dense<0.000000e+00> : vector<8x10xf32>
    %19 = tpu.matmul %17, %18, %cst_14 {dimension_numbers = #tpu.dot_dimension_numbers<[1], [0], [0], [1], [0, 0, 1, 1], [], []>} : vector<8x800xbf16>, vector<800x10xbf16>, vector<8x10xf32> -> vector<8x10xf32>
    %c0_15 = arith.constant 0 : index
    %c0_16 = arith.constant 0 : index
    %20 = vector.load %arg6[%c0_15, %c0_16] : memref<1x10xf32, #tpu.memory_space<vmem>>, vector<1x10xf32>
    %21 = vector.broadcast %20 : vector<1x10xf32> to vector<8x10xf32>
    %22 = arith.addf %19, %21 : vector<8x10xf32>
    %cst_17 = arith.constant dense<0xFF800000> : vector<10xf32>
    %23 = vector.multi_reduction <maximumf>, %22, %cst_17 [0] : vector<8x10xf32> to vector<10xf32>
    %24 = vector.shape_cast %23 : vector<10xf32> to vector<1x10xf32>
    %25 = vector.broadcast %24 : vector<1x10xf32> to vector<8x10xf32>
    %26 = arith.subf %22, %25 : vector<8x10xf32>
    %27 = math.exp %26 : vector<8x10xf32>
    %cst_18 = arith.constant dense<0.000000e+00> : vector<10xf32>
    %28 = vector.multi_reduction <add>, %27, %cst_18 [0] : vector<8x10xf32> to vector<10xf32>
    %29 = vector.shape_cast %28 : vector<10xf32> to vector<1x10xf32>
    %30 = tpu.reciprocal %29 {approx = true} : vector<1x10xf32> -> vector<1x10xf32>
    %31 = vector.broadcast %30 : vector<1x10xf32> to vector<8x10xf32>
    %32 = arith.mulf %27, %31 : vector<8x10xf32>
    %c0_19 = arith.constant 0 : index
    %c0_20 = arith.constant 0 : index
    %33 = vector.load %arg7[%c0_19, %c0_20] : memref<8x10xf32, #tpu.memory_space<vmem>>, vector<8x10xf32>
    tpu.vector_store %arg7[%c0_19, %c0_20], %32 {strides = array<i32>} : memref<8x10xf32, #tpu.memory_space<vmem>>, vector<8x10xf32>,
    return
  }
}

</mosaic_0001>

<bundles_post_ra>
// kernel: tpu_custom_call.1
= control target key start
LH: loop header
LB: loop body
LE: loop exit
PB: predicated region body
PF: predicated region fallthrough
CT: control target
= control target key end

     0   :  { %12 = vsyncpa [#allocation3], 0  ;;  %s9253_s0 = inlined_call_operand.hbm [shape: f32[8,784], index: 0, kind: input, shape index: {}]   ;;  %s9254_s1 = inlined_call_operand.hbm [shape: bf16[784,800], index: 1, kind: input, shape index: {}]   ;;  %s9255_s2 = inlined_call_operand.hbm [shape: f32[1,800], index: 2, kind: input, shape index: {}]   ;;  %s9256_s3 = inlined_call_operand.hbm [shape: bf16[800,800], index: 3, kind: input, shape index: {}]   ;;  %s9257_s4 = inlined_call_operand.hbm [shape: f32[1,800], index: 4, kind: input, shape index: {}]   ;;  %s9258_s5 = inlined_call_operand.vmem [shape: bf16[800,10], index: 5, kind: input, shape index: {}]   ;;  %s9259_s6 = inlined_call_operand.hbm [shape: f32[1,10], index: 6, kind: input, shape index: {}]   ;;  %s9260_s7 = inlined_call_operand.hbm [shape: f32[8,10], index: 7, kind: output, shape index: {}]  }
   0x1   :  { %13 = vsyncpa [#allocation6], 0 }
   0x2   :  { %14 = vsyncpa [#allocation9], 0 }
   0x3   :  { %15 = vsyncpa [#allocation12], 0 }
   0x4   :  { %16 = vsyncpa [#allocation4], 0  ;;  %s8777_s24 = smov [#allocation5]   ;;  %s8613_s28 = scalar_lea.hbm %s9254_s1, 43904 }
   0x5   :  { %s32_s25 = sshll.u32 %s8777_s24, 4  ;;  %p8614_p0 = scmp.ne.s32.totalorder %s9254_s1, %s8613_s28  ;;  %s33_s25 = int_to_ptr.vmem [resolvable:$true] %s32_s25 }
   0x6   :  { %p8617_p1 = scmp.lt.u32.totalorder %s8613_s28, %s9254_s1 }
   0x8   :  { %p8619_p2 = pnand %p8617_p1, %p8614_p0 }
   0xa   :  { %8622 = shalt.err (!%p8619_p2)
}
   0xb   :  { %s8623_s10 = scalar_lea.vmem %s33_s25, 43904  ;;  %p8628_p4 = scmp.lt.s32.totalorder %s33_s25, %s33_s25 }
   0xc   :  { %p8624_p3 = scmp.ne.s32.totalorder %s33_s25, %s8623_s10  ;;  %p8629_p5 = scmp.lt.s32.totalorder %s8623_s10, %s8623_s10 }
   0xe   :  { %p8630_p6 = por %p8629_p5, %p8628_p4 }
  0x10   :  { %p8631_p7 = pnand %p8630_p6, %p8624_p3 }
  0x12   :  { %8634 = shalt.err (!%p8631_p7)
}
  0x13   :  { %s8778_s11 = smov 448   ;;  %s8779_s12 = smov 28  }
  0x14   :  { %38 = dma.hbm_to_vmem [thread:$0]  %s9254_s1, 43904, %s33_s25, [#allocation6], %s8778_s11, %s8778_s11, %s8779_s12  }
  0x15   :  { %s8780_s15 = smov [#allocation8]   ;;  %s8781_s17 = smov [#allocation2]  }
  0x16   :  { %s54_s16 = sshll.u32 %s8780_s15, 4  ;;  %s23_s18 = sshll.u32 %s8781_s17, 4  ;;  %s55_s16 = int_to_ptr.vmem [resolvable:$true] %s54_s16  ;;  %s24_s18 = int_to_ptr.vmem [resolvable:$true] %s23_s18 }
  0x17   :  { %s8635_s21 = scalar_lea.hbm %s9256_s3, 44800 }
  0x18   :  { %p8636_p8 = scmp.ne.s32.totalorder %s9256_s3, %s8635_s21  ;;  %p8639_p9 = scmp.lt.u32.totalorder %s8635_s21, %s9256_s3 }
  0x1a   :  { %p8641_p10 = pnand %p8639_p9, %p8636_p8 }
  0x1c   :  { %8644 = shalt.err (!%p8641_p10)
}
  0x1d   :  { %s8645_s1 = scalar_lea.vmem %s55_s16, 44800  ;;  %p8650_p12 = scmp.lt.s32.totalorder %s55_s16, %s55_s16 }
  0x1e   :  { %p8646_p11 = scmp.ne.s32.totalorder %s55_s16, %s8645_s1  ;;  %p8651_p13 = scmp.lt.s32.totalorder %s8645_s1, %s8645_s1 }
  0x20   :  { %p8652_p0 = por %p8651_p13, %p8650_p12 }
  0x22   :  { %p8653_p1 = pnand %p8652_p0, %p8646_p11 }
  0x24   :  { %8656 = shalt.err (!%p8653_p1)
}
  0x25   :  { %60 = dma.hbm_to_vmem [thread:$0]  %s9256_s3, 44800, %s55_s16, [#allocation9], %s8778_s11, %s8778_s11, %s8779_s12  }
  0x26   :  { %s8657_s30 = scalar_lea.hbm %s9253_s0, 896 }
  0x27   :  { %p8658_p2 = scmp.ne.s32.totalorder %s9253_s0, %s8657_s30  ;;  %p8661_p3 = scmp.lt.u32.totalorder %s8657_s30, %s9253_s0 }
  0x29   :  { %p8663_p4 = pnand %p8661_p3, %p8658_p2 }
  0x2b   :  { %8666 = shalt.err (!%p8663_p4)
}
  0x2c   :  { %s8667_s14 = scalar_lea.vmem %s24_s18, 896  ;;  %p8672_p6 = scmp.lt.s32.totalorder %s24_s18, %s24_s18 }
  0x2d   :  { %p8668_p5 = scmp.ne.s32.totalorder %s24_s18, %s8667_s14  ;;  %p8673_p7 = scmp.lt.s32.totalorder %s8667_s14, %s8667_s14 }
  0x2f   :  { %p8674_p8 = por %p8673_p7, %p8672_p6 }
  0x31   :  { %p8675_p9 = pnand %p8674_p8, %p8668_p5 }
  0x33   :  { %8678 = shalt.err (!%p8675_p9)
}
  0x34   :  { %26 = dma.hbm_to_vmem [thread:$0]  %s9253_s0, 896, %s24_s18, [#allocation3]  }
  0x35   :  { %s8782_s12 = smov [#allocation7]   ;;  %s8783_s16 = smov [#allocation10]  }
  0x36   :  { %s45_s15 = sshll.u32 %s8782_s12, 4  ;;  %s67_s17 = sshll.u32 %s8783_s16, 4  ;;  %s46_s15 = int_to_ptr.vmem [resolvable:$true] %s45_s15  ;;  %s68_s17 = int_to_ptr.vmem [resolvable:$true] %s67_s17 }
  0x37   :  { %s8679_s21 = scalar_lea.hbm %s9255_s2, 112 }
  0x38   :  { %p8680_p10 = scmp.ne.s32.totalorder %s9255_s2, %s8679_s21  ;;  %p8683_p11 = scmp.lt.u32.totalorder %s8679_s21, %s9255_s2 }
  0x3a   :  { %p8685_p12 = pnand %p8683_p11, %p8680_p10 }
  0x3c   :  { %8688 = shalt.err (!%p8685_p12)
}
  0x3d   :  { %s8689_s0 = scalar_lea.vmem %s46_s15, 112  ;;  %s8693_s18 = scalar_lea.vmem %s46_s15, 128 }
  0x3e   :  { %p8690_p13 = scmp.ne.s32.totalorder %s46_s15, %s8689_s0  ;;  %p8694_p0 = scmp.lt.s32.totalorder %s46_s15, %s46_s15 }
  0x3f   :  { %p8695_p1 = scmp.lt.s32.totalorder %s8693_s18, %s8689_s0 }
  0x41   :  { %p8696_p2 = por %p8695_p1, %p8694_p0 }
  0x43   :  { %p8697_p3 = pnand %p8696_p2, %p8690_p13 }
  0x45   :  { %8700 = shalt.err (!%p8697_p3)
}
  0x46   :  { %48 = dma.hbm_to_vmem [thread:$0]  %s9255_s2, 112, %s46_s15, [#allocation6]  }
  0x47   :  { %s8701_s29 = scalar_lea.hbm %s9257_s4, 112 }
  0x48   :  { %p8702_p4 = scmp.ne.s32.totalorder %s9257_s4, %s8701_s29  ;;  %p8705_p5 = scmp.lt.u32.totalorder %s8701_s29, %s9257_s4 }
  0x4a   :  { %p8707_p6 = pnand %p8705_p5, %p8702_p4 }
  0x4c   :  { %8710 = shalt.err (!%p8707_p6)
}
  0x4d   :  { %s8711_s13 = scalar_lea.vmem %s68_s17, 112  ;;  %s8715_s14 = scalar_lea.vmem %s68_s17, 128 }
  0x4e   :  { %p8712_p7 = scmp.ne.s32.totalorder %s68_s17, %s8711_s13  ;;  %p8716_p8 = scmp.lt.s32.totalorder %s68_s17, %s68_s17 }
  0x4f   :  { %p8717_p9 = scmp.lt.s32.totalorder %s8715_s14, %s8711_s13 }
  0x51   :  { %p8718_p10 = por %p8717_p9, %p8716_p8 }
  0x53   :  { %p8719_p11 = pnand %p8718_p10, %p8712_p7 }
  0x55   :  { %8722 = shalt.err (!%p8719_p11)
}
  0x56   :  { %70 = dma.hbm_to_vmem [thread:$0]  %s9257_s4, 112, %s68_s17, [#allocation9]  }
  0x57   :  { %s8784_s11 = smov [#allocation11]   ;;  %s8723_s19 = scalar_lea.hbm %s9259_s6, 16 }
  0x58   :  { %s79_s12 = sshll.u32 %s8784_s11, 4  ;;  %p8724_p12 = scmp.ne.s32.totalorder %s9259_s6, %s8723_s19  ;;  %s80_s12 = int_to_ptr.vmem [resolvable:$true] %s79_s12 }
  0x59   :  { %p8727_p13 = scmp.lt.u32.totalorder %s8723_s19, %s9259_s6 }
  0x5b   :  { %p8729_p0 = pnand %p8727_p13, %p8724_p12 }
  0x5d   :  { %8732 = shalt.err (!%p8729_p0)
}
  0x5e   :  { %s8733_s24 = scalar_lea.vmem %s80_s12, 16  ;;  %s8737_s4 = scalar_lea.vmem %s80_s12, 32 }
  0x5f   :  { %p8734_p1 = scmp.ne.s32.totalorder %s80_s12, %s8733_s24  ;;  %p8738_p2 = scmp.lt.s32.totalorder %s80_s12, %s80_s12 }
  0x60   :  { %p8739_p3 = scmp.lt.s32.totalorder %s8737_s4, %s8733_s24 }
  0x62   :  { %p8740_p4 = por %p8739_p3, %p8738_p2 }
  0x64   :  { %p8741_p5 = pnand %p8740_p4, %p8734_p1 }
  0x66   :  { %8744 = shalt.err (!%p8741_p5)
}
  0x67   :  { %82 = dma.hbm_to_vmem [thread:$0]  %s9259_s6, 16, %s80_s12, [#allocation12]  }
  0x68   :  { %8767 = dma.done.wait [#allocation3], 896  }
  0x69   :  { %8768 = vsyncadd [#allocation3], 4294966400 }
  0x6a   :  { %8769 = dma.done.wait [#allocation6], 44016  }
  0x6b   :  { %8770 = vsyncadd [#allocation6], 4294923280 }
  0x6c   :  { %8771 = dma.done.wait [#allocation9], 44912  }
  0x6d   :  { %8772 = vsyncadd [#allocation9], 4294922384 }
  0x6e   :  { %8773 = dma.done.wait [#allocation12], 16  }
  0x6f   :  { %8774 = vsyncadd [#allocation12], 4294967280  ;;  %v8785_v0 = vmov 0   ;;  %v7568_v1 = vld [vmem:[#allocation5 + $0x4] ss:$28 sps:$4 sm:$0xff]   ;;  %v108_v9 = vld [vmem:[#allocation2 + $0x30] sm:$0xff] }
  0x70   :  { %2468 = vmatprep.mubr.bf16.mxu1 %v8785_v0  ;;  %v7570_v2 = vld [vmem:[#allocation5 + $0xa84] ss:$28 sps:$4 sm:$0xff]   ;;  %2313 = vmatprep.subr.bf16.mxu0 %v7568_v1  ;;  %v7574_v5 = vld [vmem:[#allocation5 + $0x3c] ss:$28 sps:$4 sm:$0xff]   ;;  %v7578_v7 = vld [vmem:[#allocation5 + $0xc] ss:$28 sps:$4 sm:$0xff]   ;;  %v8902_v10 = vpack.c.bf16 %v108_v9, %v108_v9 }
  0x71   :  { %v7572_v3 = vld [vmem:[#allocation5] ss:$28 sps:$4 sm:$0xff]   ;;  %2436 = vmatprep.subr.bf16.mxu1 %v7570_v2  ;;  %v7576_v6 = vld [vmem:[#allocation5 + $0x8] ss:$28 sps:$4 sm:$0xff]   ;;  %v7579_v8 = vld [vmem:[#allocation5 + $0x38] ss:$28 sps:$4 sm:$0xff]  }
  0x72   :  { %v7573_v4 = vld [vmem:[#allocation5 + $0xa80] ss:$28 sps:$4 sm:$0xff]   ;;  %2314 = vmatpush1.bf16.msra.mxu0 %v7572_v3  ;;  %vm2309_vm0 = vcmask 130048   ;;  %v7580_v11 = vld [vmem:[#allocation5 + $0x74] ss:$28 sps:$4 sm:$0xff]   ;;  %vm8787_vm1 = vmmov 0  }
  0x73   :  { %2437 = vmatpush1.bf16.msra.mxu1 %v7573_v4  ;;  %2315 = vmatprep.subr.bf16.mxu0 %v7574_v5  ;;  %v7582_v12 = vld [vmem:[#allocation5 + $0x40] ss:$28 sps:$4 sm:$0xff]   ;;  %v7585_v14 = vld [vmem:[#allocation5 + $0x70] ss:$28 sps:$4 sm:$0xff]   ;;  %v7591_v17 = vld [vmem:[#allocation5 + $0xa8] ss:$28 sps:$4 sm:$0xff]  }
  0x74   :  { %2477 = vmatprep.subr.bf16.mxu1 %v7578_v7  ;;  %v7584_v13 = vld [vmem:[#allocation5 + $0x44] ss:$28 sps:$4 sm:$0xff]   ;;  %v7586_v15 = vld [vmem:[#allocation5 + $0xac] ss:$28 sps:$4 sm:$0xff]   ;;  %v7590_v16 = vld [vmem:[#allocation5 + $0x7c] ss:$28 sps:$4 sm:$0xff]  }
  0x75   :  { %v7588_v18 = vld [vmem:[#allocation5 + $0x78] ss:$28 sps:$4 sm:$0xff]   ;;  %v7592_v19 = vld [vmem:[#allocation5 + $0xe4] ss:$28 sps:$4 sm:$0xff]   ;;  %v7594_v21 = vld [vmem:[#allocation5 + $0xb0] ss:$28 sps:$4 sm:$0xff]  }
  0x76   :  { %2316 = vmatpush1.bf16.msra.mxu0 %v7579_v8  ;;  %6838 = vmatmul.mubr.msk.bf16.vlgmr.msra.gmra.mrb[0].mxu1 %vm2309_vm0, %v8902_v10  ;;  %v7596_v20 = vld [vmem:[#allocation5 + $0xb4] ss:$28 sps:$4 sm:$0xff]   ;;  %v7597_v22 = vld [vmem:[#allocation5 + $0xe0] ss:$28 sps:$4 sm:$0xff]   ;;  %v7602_v24 = vld [vmem:[#allocation5 + $0xec] ss:$28 sps:$4 sm:$0xff]  }
  0x77   :  { %2478 = vmatpush1.bf16.msra.mxu1 %v7576_v6  ;;  %2317 = vmatprep.subr.bf16.mxu0 %v7580_v11  ;;  %v7598_v23 = vld [vmem:[#allocation5 + $0x11c] ss:$28 sps:$4 sm:$0xff]   ;;  %v7600_v26 = vld [vmem:[#allocation5 + $0xe8] ss:$28 sps:$4 sm:$0xff]   ;;  %v7604_v27 = vld [vmem:[#allocation5 + $0x154] ss:$28 sps:$4 sm:$0xff]  }
  0x78   :  { %2479 = vmatprep.subr.bf16.mxu1 %v7584_v13  ;;  %v7603_v25 = vld [vmem:[#allocation5 + $0x118] ss:$28 sps:$4 sm:$0xff]   ;;  %v7608_v28 = vld [vmem:[#allocation5 + $0x124] ss:$28 sps:$4 sm:$0xff]   ;;  %v7609_v30 = vld [vmem:[#allocation5 + $0x150] ss:$28 sps:$4 sm:$0xff]  }
  0x79   :  { %v7606_v29 = vld [vmem:[#allocation5 + $0x120] ss:$28 sps:$4 sm:$0xff]   ;;  %v7610_v31 = vld [vmem:[#allocation5 + $0x18c] ss:$28 sps:$4 sm:$0xff]   ;;  %v7612_v34 = vld [vmem:[#allocation5 + $0x158] ss:$28 sps:$4 sm:$0xff]  }
  0x7a   :  { %2318 = vmatpush1.bf16.msra.mxu0 %v7585_v14  ;;  %v7614_v32 = vld [vmem:[#allocation5 + $0x15c] ss:$28 sps:$4 sm:$0xff]   ;;  %v7615_v33 = vld [vmem:[#allocation5 + $0x188] ss:$28 sps:$4 sm:$0xff]   ;;  %v7620_v36 = vld [vmem:[#allocation5 + $0x194] ss:$28 sps:$4 sm:$0xff]  }
  0x7b   :  { %2480 = vmatpush1.bf16.msra.mxu1 %v7582_v12  ;;  %2319 = vmatprep.subr.bf16.mxu0 %v7586_v15  ;;  %v7616_v35 = vld [vmem:[#allocation5 + $0x1c4] ss:$28 sps:$4 sm:$0xff]   ;;  %v7618_v37 = vld [vmem:[#allocation5 + $0x190] ss:$28 sps:$4 sm:$0xff]   ;;  %v7622_v39 = vld [vmem:[#allocation5 + $0x1fc] ss:$28 sps:$4 sm:$0xff]  }
  0x7c   :  { %2481 = vmatprep.subr.bf16.mxu1 %v7590_v16  ;;  %v7621_v38 = vld [vmem:[#allocation5 + $0x1c0] ss:$28 sps:$4 sm:$0xff]   ;;  %v7626_v40 = vld [vmem:[#allocation5 + $0x1cc] ss:$28 sps:$4 sm:$0xff]   ;;  %v7627_v41 = vld [vmem:[#allocation5 + $0x1f8] ss:$28 sps:$4 sm:$0xff]  }
  0x7d   :  { %v7624_v42 = vld [vmem:[#allocation5 + $0x1c8] ss:$28 sps:$4 sm:$0xff]   ;;  %v7628_v43 = vld [vmem:[#allocation5 + $0x234] ss:$28 sps:$4 sm:$0xff]   ;;  %v7630_v45 = vld [vmem:[#allocation5 + $0x200] ss:$28 sps:$4 sm:$0xff]  }
  0x7e   :  { %2320 = vmatpush1.bf16.msra.mxu0 %v7591_v17  ;;  %v7632_v44 = vld [vmem:[#allocation5 + $0x204] ss:$28 sps:$4 sm:$0xff]   ;;  %v7633_v46 = vld [vmem:[#allocation5 + $0x230] ss:$28 sps:$4 sm:$0xff]   ;;  %v7638_v48 = vld [vmem:[#allocation5 + $0x23c] ss:$28 sps:$4 sm:$0xff]  }
  0x7f   :  { %2482 = vmatpush1.bf16.msra.mxu1 %v7588_v18  ;;  %2321 = vmatprep.subr.bf16.mxu0 %v7592_v19  ;;  %v7634_v47 = vld [vmem:[#allocation5 + $0x26c] ss:$28 sps:$4 sm:$0xff]   ;;  %v103_v49 = vld [vmem:[#allocation2 + $0x8] sm:$0xff]  ;;  %v7640_v53 = vld [vmem:[#allocation5 + $0x2a4] ss:$28 sps:$4 sm:$0xff]   ;;  %vm5216_vm2 = vcmask 261120  }
  0x80   :  { %2483 = vmatprep.subr.bf16.mxu1 %v7596_v20  ;;  %v7639_v50 = vld [vmem:[#allocation5 + $0x268] ss:$28 sps:$4 sm:$0xff]   ;;  %v8906_v51 = vpack.c.bf16 %v103_v49, %v103_v49  ;;  %v7636_v52 = vld [vmem:[#allocation5 + $0x238] ss:$28 sps:$4 sm:$0xff]   ;;  %v7642_v55 = vld [vmem:[#allocation5 + $0x270] ss:$28 sps:$4 sm:$0xff]  }
  0x81   :  { %v7644_v54 = vld [vmem:[#allocation5 + $0x274] ss:$28 sps:$4 sm:$0xff]   ;;  %v7645_v56 = vld [vmem:[#allocation5 + $0x2a0] ss:$28 sps:$4 sm:$0xff]   ;;  %v7650_v58 = vld [vmem:[#allocation5 + $0x2ac] ss:$28 sps:$4 sm:$0xff]  }
  0x82   :  { %2322 = vmatpush1.bf16.msra.mxu0 %v7597_v22  ;;  %2345 = vmatprep.mubr.bf16.mxu0 %v8906_v51  ;;  %v7646_v57 = vld [vmem:[#allocation5 + $0x2dc] ss:$28 sps:$4 sm:$0xff]   ;;  %v7648_v59 = vld [vmem:[#allocation5 + $0x2a8] ss:$28 sps:$4 sm:$0xff]   ;;  %v7652_v61 = vld [vmem:[#allocation5 + $0x314] ss:$28 sps:$4 sm:$0xff]  }
  0x83   :  { %2484 = vmatpush1.bf16.msra.mxu1 %v7594_v21  ;;  %2323 = vmatprep.subr.bf16.mxu0 %v7598_v23  ;;  %v7651_v60 = vld [vmem:[#allocation5 + $0x2d8] ss:$28 sps:$4 sm:$0xff]   ;;  %v7656_v62 = vld [vmem:[#allocation5 + $0x2e4] ss:$28 sps:$4 sm:$0xff]   ;;  %v7657_v1 = vld [vmem:[#allocation5 + $0x310] ss:$28 sps:$4 sm:$0xff]  }
  0x84   :  { %2485 = vmatprep.subr.bf16.mxu1 %v7602_v24  ;;  %2509 = vmatprep.mubr.bf16.mxu1 %v8906_v51  ;;  %v7654_v63 = vld [vmem:[#allocation5 + $0x2e0] ss:$28 sps:$4 sm:$0xff]   ;;  %v7658_v2 = vld [vmem:[#allocation5 + $0x34c] ss:$28 sps:$4 sm:$0xff]   ;;  %v7660_v4 = vld [vmem:[#allocation5 + $0x318] ss:$28 sps:$4 sm:$0xff]  }
  0x85   :  { %v7662_v3 = vld [vmem:[#allocation5 + $0x31c] ss:$28 sps:$4 sm:$0xff]   ;;  %v7663_v5 = vld [vmem:[#allocation5 + $0x348] ss:$28 sps:$4 sm:$0xff]   ;;  %v7669_v8 = vld [vmem:[#allocation5 + $0x354] ss:$28 sps:$4 sm:$0xff]  }
  0x86   :  { %2324 = vmatpush1.bf16.msra.mxu0 %v7603_v25  ;;  %v102_v6 = vld [vmem:[#allocation2] sm:$0xff]  ;;  %v7666_v7 = vld [vmem:[#allocation5 + $0x384] ss:$28 sps:$4 sm:$0xff]   ;;  %v7672_v13 = vld [vmem:[#allocation5 + $0x3bc] ss:$28 sps:$4 sm:$0xff]   ;;  %vm6456_vm3 = vcmask 80896  }
  0x87   :  { %2486 = vmatpush1.bf16.msra.mxu1 %v7600_v26  ;;  %2325 = vmatprep.subr.bf16.mxu0 %v7604_v27  ;;  %v8910_v9 = vpack.c.bf16 %v102_v6, %v102_v6  ;;  %v7664_v11 = vld [vmem:[#allocation5 + $0x380] ss:$28 sps:$4 sm:$0xff]   ;;  %v7667_v12 = vld [vmem:[#allocation5 + $0x350] ss:$28 sps:$4 sm:$0xff]   ;;  %v7670_v15 = vld [vmem:[#allocation5 + $0x3b8] ss:$28 sps:$4 sm:$0xff]  }
  0x88   :  { %2487 = vmatprep.subr.bf16.mxu1 %v7608_v28  ;;  %v7675_v14 = vld [vmem:[#allocation5 + $0x38c] ss:$28 sps:$4 sm:$0xff]   ;;  %v7678_v17 = vld [vmem:[#allocation5 + $0x3f4] ss:$28 sps:$4 sm:$0xff]   ;;  %v7681_v18 = vld [vmem:[#allocation5 + $0x3c4] ss:$28 sps:$4 sm:$0xff]  }
  0x89   :  { %v7673_v16 = vld [vmem:[#allocation5 + $0x388] ss:$28 sps:$4 sm:$0xff]   ;;  %v7676_v19 = vld [vmem:[#allocation5 + $0x3f0] ss:$28 sps:$4 sm:$0xff]   ;;  %v7679_v20 = vld [vmem:[#allocation5 + $0x3c0] ss:$28 sps:$4 sm:$0xff]  }
  0x8a   :  { %2326 = vmatpush1.bf16.msra.mxu0 %v7609_v30  ;;  %v7684_v21 = vld [vmem:[#allocation5 + $0x42c] ss:$28 sps:$4 sm:$0xff]   ;;  %v7687_v22 = vld [vmem:[#allocation5 + $0x3fc] ss:$28 sps:$4 sm:$0xff]   ;;  %v7690_v25 = vld [vmem:[#allocation5 + $0x464] ss:$28 sps:$4 sm:$0xff]  }
  0x8b   :  { %2488 = vmatpush1.bf16.msra.mxu1 %v7606_v29  ;;  %2327 = vmatprep.subr.bf16.mxu0 %v7610_v31  ;;  %v7682_v23 = vld [vmem:[#allocation5 + $0x428] ss:$28 sps:$4 sm:$0xff]   ;;  %v7685_v24 = vld [vmem:[#allocation5 + $0x3f8] ss:$28 sps:$4 sm:$0xff]   ;;  %v7688_v27 = vld [vmem:[#allocation5 + $0x460] ss:$28 sps:$4 sm:$0xff]  }
  0x8c   :  { %2489 = vmatprep.subr.bf16.mxu1 %v7614_v32  ;;  %v7693_v26 = vld [vmem:[#allocation5 + $0x434] ss:$28 sps:$4 sm:$0xff]   ;;  %v7696_v29 = vld [vmem:[#allocation5 + $0x49c] ss:$28 sps:$4 sm:$0xff]   ;;  %v7699_v30 = vld [vmem:[#allocation5 + $0x46c] ss:$28 sps:$4 sm:$0xff]  }
  0x8d   :  { %v7691_v28 = vld [vmem:[#allocation5 + $0x430] ss:$28 sps:$4 sm:$0xff]   ;;  %v7694_v31 = vld [vmem:[#allocation5 + $0x498] ss:$28 sps:$4 sm:$0xff]   ;;  %v7697_v32 = vld [vmem:[#allocation5 + $0x468] ss:$28 sps:$4 sm:$0xff]  }
  0x8e   :  { %2328 = vmatpush1.bf16.msra.mxu0 %v7615_v33  ;;  %v7702_v33 = vld [vmem:[#allocation5 + $0x4d4] ss:$28 sps:$4 sm:$0xff]   ;;  %v7753_v6 = vld [vmem:[#allocation5 + $0x664] ss:$28 sps:$4 sm:$0xff]  }
  0x8f   :  { %2490 = vmatpush1.bf16.msra.mxu1 %v7612_v34  ;;  %2329 = vmatprep.subr.bf16.mxu0 %v7616_v35  ;;  %v7705_v34 = vld [vmem:[#allocation5 + $0x4a4] ss:$28 sps:$4 sm:$0xff]   ;;  %v7718_v49 = vld [vmem:[#allocation5 + $0x578] ss:$28 sps:$4 sm:$0xff]  }
  0x90   :  { %2491 = vmatprep.subr.bf16.mxu1 %v7620_v36  ;;  %v105_v35 = vld [vmem:[#allocation2 + $0x18] sm:$0xff] }
  0x91   :  { %v8914_v36 = vpack.c.bf16 %v105_v35, %v105_v35  ;;  %v7786_v35 = vld [vmem:[#allocation5 + $0x7e4] ss:$28 sps:$4 sm:$0xff]  }
  0x92   :  { %2330 = vmatpush1.bf16.msra.mxu0 %v7621_v38  ;;  %v7703_v38 = vld [vmem:[#allocation5 + $0x4a0] ss:$28 sps:$4 sm:$0xff]  }
  0x93   :  { %2492 = vmatpush1.bf16.msra.mxu1 %v7618_v37  ;;  %2331 = vmatprep.subr.bf16.mxu0 %v7622_v39  ;;  %v7700_v37 = vld [vmem:[#allocation5 + $0x4d0] ss:$28 sps:$4 sm:$0xff]  }
  0x94   :  { %2493 = vmatprep.subr.bf16.mxu1 %v7626_v40  ;;  %v7708_v39 = vld [vmem:[#allocation5 + $0x50c] ss:$28 sps:$4 sm:$0xff]   ;;  %v7711_v40 = vld [vmem:[#allocation5 + $0x4dc] ss:$28 sps:$4 sm:$0xff]  }
  0x96   :  { %2332 = vmatpush1.bf16.msra.mxu0 %v7627_v41  ;;  %v7706_v41 = vld [vmem:[#allocation5 + $0x508] ss:$28 sps:$4 sm:$0xff]  }
  0x97   :  { %2494 = vmatpush1.bf16.msra.mxu1 %v7624_v42  ;;  %2333 = vmatprep.subr.bf16.mxu0 %v7628_v43  ;;  %v7709_v42 = vld [vmem:[#allocation5 + $0x4d8] ss:$28 sps:$4 sm:$0xff]   ;;  %v7714_v43 = vld [vmem:[#allocation5 + $0x544] ss:$28 sps:$4 sm:$0xff]  }
  0x98   :  { %2495 = vmatprep.subr.bf16.mxu1 %v7632_v44  ;;  %v7717_v44 = vld [vmem:[#allocation5 + $0x514] ss:$28 sps:$4 sm:$0xff]  }
  0x9a   :  { %2334 = vmatpush1.bf16.msra.mxu0 %v7633_v46  ;;  %v7715_v46 = vld [vmem:[#allocation5 + $0x510] ss:$28 sps:$4 sm:$0xff]  }
  0x9b   :  { %2496 = vmatpush1.bf16.msra.mxu1 %v7630_v45  ;;  %2335 = vmatprep.subr.bf16.mxu0 %v7634_v47  ;;  %v7712_v45 = vld [vmem:[#allocation5 + $0x540] ss:$28 sps:$4 sm:$0xff]  }
  0x9c   :  { %2497 = vmatprep.subr.bf16.mxu1 %v7638_v48  ;;  %v7720_v47 = vld [vmem:[#allocation5 + $0x57c] ss:$28 sps:$4 sm:$0xff]   ;;  %v7723_v48 = vld [vmem:[#allocation5 + $0x54c] ss:$28 sps:$4 sm:$0xff]  }
  0x9e   :  { %2336 = vmatpush1.bf16.msra.mxu0 %v7639_v50  ;;  %v7721_v50 = vld [vmem:[#allocation5 + $0x548] ss:$28 sps:$4 sm:$0xff]  }
  0x9f   :  { %2498 = vmatpush1.bf16.msra.mxu1 %v7636_v52  ;;  %2337 = vmatprep.subr.bf16.mxu0 %v7640_v53  ;;  %v7726_v52 = vld [vmem:[#allocation5 + $0x5b4] ss:$28 sps:$4 sm:$0xff]   ;;  %v7729_v53 = vld [vmem:[#allocation5 + $0x584] ss:$28 sps:$4 sm:$0xff]  }
  0xa0   :  { %2499 = vmatprep.subr.bf16.mxu1 %v7644_v54  ;;  %v7724_v54 = vld [vmem:[#allocation5 + $0x5b0] ss:$28 sps:$4 sm:$0xff]  }
  0xa2   :  { %2338 = vmatpush1.bf16.msra.mxu0 %v7645_v56  ;;  %v7732_v56 = vld [vmem:[#allocation5 + $0x5ec] ss:$28 sps:$4 sm:$0xff]  }
  0xa3   :  { %2500 = vmatpush1.bf16.msra.mxu1 %v7642_v55  ;;  %2339 = vmatprep.subr.bf16.mxu0 %v7646_v57  ;;  %v7727_v55 = vld [vmem:[#allocation5 + $0x580] ss:$28 sps:$4 sm:$0xff]  }
  0xa4   :  { %2501 = vmatprep.subr.bf16.mxu1 %v7650_v58  ;;  %v7735_v57 = vld [vmem:[#allocation5 + $0x5bc] ss:$28 sps:$4 sm:$0xff]   ;;  %v7730_v58 = vld [vmem:[#allocation5 + $0x5e8] ss:$28 sps:$4 sm:$0xff]  }
  0xa6   :  { %2340 = vmatpush1.bf16.msra.mxu0 %v7651_v60  ;;  %v7738_v60 = vld [vmem:[#allocation5 + $0x624] ss:$28 sps:$4 sm:$0xff]  }
  0xa7   :  { %2502 = vmatpush1.bf16.msra.mxu1 %v7648_v59  ;;  %2341 = vmatprep.subr.bf16.mxu0 %v7652_v61  ;;  %v7733_v59 = vld [vmem:[#allocation5 + $0x5b8] ss:$28 sps:$4 sm:$0xff]  }
  0xa8   :  { %2503 = vmatprep.subr.bf16.mxu1 %v7656_v62  ;;  %v7741_v61 = vld [vmem:[#allocation5 + $0x5f4] ss:$28 sps:$4 sm:$0xff]   ;;  %v7736_v62 = vld [vmem:[#allocation5 + $0x620] ss:$28 sps:$4 sm:$0xff]  }
  0xaa   :  { %2342 = vmatpush1.bf16.msra.mxu0 %v7657_v1  ;;  %v7744_v1 = vld [vmem:[#allocation5 + $0x65c] ss:$28 sps:$4 sm:$0xff]  }
  0xab   :  { %2504 = vmatpush1.bf16.msra.mxu1 %v7654_v63  ;;  %2343 = vmatprep.subr.bf16.mxu0 %v7658_v2  ;;  %v7739_v63 = vld [vmem:[#allocation5 + $0x5f0] ss:$28 sps:$4 sm:$0xff]  }
  0xac   :  { %2505 = vmatprep.subr.bf16.mxu1 %v7662_v3  ;;  %v7747_v2 = vld [vmem:[#allocation5 + $0x62c] ss:$28 sps:$4 sm:$0xff]   ;;  %v7742_v3 = vld [vmem:[#allocation5 + $0x658] ss:$28 sps:$4 sm:$0xff]  }
  0xae   :  { %2344 = vmatpush1.bf16.msra.mxu0 %v7663_v5  ;;  %v7750_v5 = vld [vmem:[#allocation5 + $0x694] ss:$28 sps:$4 sm:$0xff]  }
  0xaf   :  { %2506 = vmatpush1.bf16.msra.mxu1 %v7660_v4  ;;  %2354 = vmatprep.subr.bf16.mxu0 %v7666_v7  ;;  %v7745_v4 = vld [vmem:[#allocation5 + $0x628] ss:$28 sps:$4 sm:$0xff]   ;;  %v7748_v7 = vld [vmem:[#allocation5 + $0x690] ss:$28 sps:$4 sm:$0xff]  }
  0xb0   :  { %2507 = vmatprep.subr.bf16.mxu1 %v7669_v8  ;;  %v7751_v8 = vld [vmem:[#allocation5 + $0x660] ss:$28 sps:$4 sm:$0xff]  }
  0xb1   :  { %2346 = vmatmul.mubr.bf16.vlgmr.msra.gmra.mrb[0].mxu0 %v8910_v9 }
  0xb2   :  { %2355 = vmatpush1.bf16.msra.mxu0 %v7664_v11  ;;  %2386 = vmatprep.mubr.bf16.mxu0 %v8914_v36  ;;  %v7756_v11 = vld [vmem:[#allocation5 + $0x6cc] ss:$28 sps:$4 sm:$0xff]  }
  0xb3   :  { %2508 = vmatpush1.bf16.msra.mxu1 %v7667_v12  ;;  %2356 = vmatprep.subr.bf16.mxu0 %v7672_v13  ;;  %v7759_v12 = vld [vmem:[#allocation5 + $0x69c] ss:$28 sps:$4 sm:$0xff]   ;;  %v7754_v13 = vld [vmem:[#allocation5 + $0x6c8] ss:$28 sps:$4 sm:$0xff]  }
  0xb4   :  { %2518 = vmatprep.subr.bf16.mxu1 %v7675_v14  ;;  %v104_v14 = vld [vmem:[#allocation2 + $0x10] sm:$0xff] }
  0xb6   :  { %2357 = vmatpush1.bf16.msra.mxu0 %v7670_v15  ;;  %2510 = vmatmul.mubr.bf16.vlgmr.msra.gmra.mrb[4].mxu1 %v8910_v9  ;;  %v7757_v15 = vld [vmem:[#allocation5 + $0x698] ss:$28 sps:$4 sm:$0xff]  }
  0xb7   :  { %2519 = vmatpush1.bf16.msra.mxu1 %v7673_v16  ;;  %2358 = vmatprep.subr.bf16.mxu0 %v7678_v17  ;;  %v7762_v16 = vld [vmem:[#allocation5 + $0x704] ss:$28 sps:$4 sm:$0xff]   ;;  %v7765_v17 = vld [vmem:[#allocation5 + $0x6d4] ss:$28 sps:$4 sm:$0xff]  }
  0xb8   :  { %2520 = vmatprep.subr.bf16.mxu1 %v7681_v18  ;;  %2550 = vmatprep.mubr.bf16.mxu1 %v8914_v36  ;;  %v8918_v18 = vpack.c.bf16 %v104_v14, %v104_v14  ;;  %v7838_v14 = vld [vmem:[#allocation5 + $0x9d8] ss:$28 sps:$4 sm:$0xff]  }
  0xba   :  { %2359 = vmatpush1.bf16.msra.mxu0 %v7676_v19  ;;  %v7760_v19 = vld [vmem:[#allocation5 + $0x700] ss:$28 sps:$4 sm:$0xff]  }
  0xbb   :  { %2521 = vmatpush1.bf16.msra.mxu1 %v7679_v20  ;;  %2360 = vmatprep.subr.bf16.mxu0 %v7684_v21  ;;  %v7763_v20 = vld [vmem:[#allocation5 + $0x6d0] ss:$28 sps:$4 sm:$0xff]   ;;  %v7768_v21 = vld [vmem:[#allocation5 + $0x73c] ss:$28 sps:$4 sm:$0xff]  }
  0xbc   :  { %2522 = vmatprep.subr.bf16.mxu1 %v7687_v22  ;;  %v107_v22 = vld [vmem:[#allocation2 + $0x28] sm:$0xff] }
  0xbe   :  { %2361 = vmatpush1.bf16.msra.mxu0 %v7682_v23  ;;  %v7771_v23 = vld [vmem:[#allocation5 + $0x70c] ss:$28 sps:$4 sm:$0xff]  }
  0xbf   :  { %2523 = vmatpush1.bf16.msra.mxu1 %v7685_v24  ;;  %2362 = vmatprep.subr.bf16.mxu0 %v7690_v25  ;;  %v8920_v24 = vpack.c.bf16 %v107_v22, %v107_v22  ;;  %v7766_v25 = vld [vmem:[#allocation5 + $0x738] ss:$28 sps:$4 sm:$0xff]  }
  0xc0   :  { %2524 = vmatprep.subr.bf16.mxu1 %v7693_v26  ;;  %v7769_v26 = vld [vmem:[#allocation5 + $0x708] ss:$28 sps:$4 sm:$0xff]   ;;  %v7855_v22 = vld [vmem:[#allocation5 + $0xa1c] ss:$28 sps:$4 sm:$0xff]  }
  0xc2   :  { %2363 = vmatpush1.bf16.msra.mxu0 %v7688_v27  ;;  %v7774_v27 = vld [vmem:[#allocation5 + $0x774] ss:$28 sps:$4 sm:$0xff]  }
  0xc3   :  { %2525 = vmatpush1.bf16.msra.mxu1 %v7691_v28  ;;  %2364 = vmatprep.subr.bf16.mxu0 %v7696_v29  ;;  %v7777_v28 = vld [vmem:[#allocation5 + $0x744] ss:$28 sps:$4 sm:$0xff]   ;;  %v7772_v29 = vld [vmem:[#allocation5 + $0x770] ss:$28 sps:$4 sm:$0xff]  }
  0xc4   :  { %2526 = vmatprep.subr.bf16.mxu1 %v7699_v30  ;;  %v7775_v30 = vld [vmem:[#allocation5 + $0x740] ss:$28 sps:$4 sm:$0xff]  }
  0xc6   :  { %2365 = vmatpush1.bf16.msra.mxu0 %v7694_v31  ;;  %v7780_v31 = vld [vmem:[#allocation5 + $0x7ac] ss:$28 sps:$4 sm:$0xff]  }
  0xc7   :  { %2527 = vmatpush1.bf16.msra.mxu1 %v7697_v32  ;;  %2366 = vmatprep.subr.bf16.mxu0 %v7702_v33  ;;  %v7783_v32 = vld [vmem:[#allocation5 + $0x77c] ss:$28 sps:$4 sm:$0xff]   ;;  %v7778_v33 = vld [vmem:[#allocation5 + $0x7a8] ss:$28 sps:$4 sm:$0xff]  }
  0xc8   :  { %2528 = vmatprep.subr.bf16.mxu1 %v7705_v34  ;;  %v7781_v34 = vld [vmem:[#allocation5 + $0x778] ss:$28 sps:$4 sm:$0xff]  }
  0xca   :  { %2367 = vmatpush1.bf16.msra.mxu0 %v7700_v37  ;;  %v7789_v37 = vld [vmem:[#allocation5 + $0x7b4] ss:$28 sps:$4 sm:$0xff]  }
  0xcb   :  { %2529 = vmatpush1.bf16.msra.mxu1 %v7703_v38  ;;  %2368 = vmatprep.subr.bf16.mxu0 %v7708_v39  ;;  %v7784_v38 = vld [vmem:[#allocation5 + $0x7e0] ss:$28 sps:$4 sm:$0xff]   ;;  %v7787_v39 = vld [vmem:[#allocation5 + $0x7b0] ss:$28 sps:$4 sm:$0xff]  }
  0xcc   :  { %2530 = vmatprep.subr.bf16.mxu1 %v7711_v40  ;;  %v7792_v40 = vld [vmem:[#allocation5 + $0x81c] ss:$28 sps:$4 sm:$0xff]  }
  0xce   :  { %2369 = vmatpush1.bf16.msra.mxu0 %v7706_v41  ;;  %v7795_v41 = vld [vmem:[#allocation5 + $0x7ec] ss:$28 sps:$4 sm:$0xff]  }
  0xcf   :  { %2531 = vmatpush1.bf16.msra.mxu1 %v7709_v42  ;;  %2370 = vmatprep.subr.bf16.mxu0 %v7714_v43  ;;  %v7790_v42 = vld [vmem:[#allocation5 + $0x818] ss:$28 sps:$4 sm:$0xff]   ;;  %v7793_v43 = vld [vmem:[#allocation5 + $0x7e8] ss:$28 sps:$4 sm:$0xff]  }
  0xd0   :  { %2532 = vmatprep.subr.bf16.mxu1 %v7717_v44  ;;  %v7798_v44 = vld [vmem:[#allocation5 + $0x854] ss:$28 sps:$4 sm:$0xff]  }
  0xd2   :  { %2371 = vmatpush1.bf16.msra.mxu0 %v7712_v45  ;;  %v7801_v45 = vld [vmem:[#allocation5 + $0x824] ss:$28 sps:$4 sm:$0xff]  }
  0xd3   :  { %2533 = vmatpush1.bf16.msra.mxu1 %v7715_v46  ;;  %2372 = vmatprep.subr.bf16.mxu0 %v7720_v47  ;;  %v7796_v46 = vld [vmem:[#allocation5 + $0x850] ss:$28 sps:$4 sm:$0xff]   ;;  %v7799_v47 = vld [vmem:[#allocation5 + $0x820] ss:$28 sps:$4 sm:$0xff]  }
  0xd4   :  { %2534 = vmatprep.subr.bf16.mxu1 %v7723_v48  ;;  %v7804_v48 = vld [vmem:[#allocation5 + $0x88c] ss:$28 sps:$4 sm:$0xff]  }
  0xd6   :  { %2373 = vmatpush1.bf16.msra.mxu0 %v7718_v49  ;;  %v7807_v49 = vld [vmem:[#allocation5 + $0x85c] ss:$28 sps:$4 sm:$0xff]  }
  0xd7   :  { %2535 = vmatpush1.bf16.msra.mxu1 %v7721_v50  ;;  %2374 = vmatprep.subr.bf16.mxu0 %v7726_v52  ;;  %v7802_v50 = vld [vmem:[#allocation5 + $0x888] ss:$28 sps:$4 sm:$0xff]   ;;  %v7805_v52 = vld [vmem:[#allocation5 + $0x858] ss:$28 sps:$4 sm:$0xff]  }
  0xd8   :  { %2536 = vmatprep.subr.bf16.mxu1 %v7729_v53  ;;  %v7810_v53 = vld [vmem:[#allocation5 + $0x8c4] ss:$28 sps:$4 sm:$0xff]  }
  0xda   :  { %2375 = vmatpush1.bf16.msra.mxu0 %v7724_v54  ;;  %v7813_v54 = vld [vmem:[#allocation5 + $0x894] ss:$28 sps:$4 sm:$0xff]  }
  0xdb   :  { %2537 = vmatpush1.bf16.msra.mxu1 %v7727_v55  ;;  %2376 = vmatprep.subr.bf16.mxu0 %v7732_v56  ;;  %v7808_v55 = vld [vmem:[#allocation5 + $0x8c0] ss:$28 sps:$4 sm:$0xff]   ;;  %v7811_v56 = vld [vmem:[#allocation5 + $0x890] ss:$28 sps:$4 sm:$0xff]  }
  0xdc   :  { %2538 = vmatprep.subr.bf16.mxu1 %v7735_v57  ;;  %v7816_v57 = vld [vmem:[#allocation5 + $0x8fc] ss:$28 sps:$4 sm:$0xff]  }
  0xde   :  { %2377 = vmatpush1.bf16.msra.mxu0 %v7730_v58  ;;  %v7819_v58 = vld [vmem:[#allocation5 + $0x8cc] ss:$28 sps:$4 sm:$0xff]  }
  0xdf   :  { %2539 = vmatpush1.bf16.msra.mxu1 %v7733_v59  ;;  %2378 = vmatprep.subr.bf16.mxu0 %v7738_v60  ;;  %v7814_v59 = vld [vmem:[#allocation5 + $0x8f8] ss:$28 sps:$4 sm:$0xff]   ;;  %v7817_v60 = vld [vmem:[#allocation5 + $0x8c8] ss:$28 sps:$4 sm:$0xff]  }
  0xe0   :  { %2540 = vmatprep.subr.bf16.mxu1 %v7741_v61  ;;  %v7822_v61 = vld [vmem:[#allocation5 + $0x934] ss:$28 sps:$4 sm:$0xff]  }
  0xe2   :  { %2379 = vmatpush1.bf16.msra.mxu0 %v7736_v62  ;;  %v7825_v62 = vld [vmem:[#allocation5 + $0x904] ss:$28 sps:$4 sm:$0xff]  }
  0xe3   :  { %2541 = vmatpush1.bf16.msra.mxu1 %v7739_v63  ;;  %2380 = vmatprep.subr.bf16.mxu0 %v7744_v1  ;;  %v7820_v63 = vld [vmem:[#allocation5 + $0x930] ss:$28 sps:$4 sm:$0xff]   ;;  %v7823_v1 = vld [vmem:[#allocation5 + $0x900] ss:$28 sps:$4 sm:$0xff]  }
  0xe4   :  { %2542 = vmatprep.subr.bf16.mxu1 %v7747_v2  ;;  %v7828_v2 = vld [vmem:[#allocation5 + $0x96c] ss:$28 sps:$4 sm:$0xff]  }
  0xe6   :  { %2381 = vmatpush1.bf16.msra.mxu0 %v7742_v3  ;;  %v7831_v3 = vld [vmem:[#allocation5 + $0x93c] ss:$28 sps:$4 sm:$0xff]  }
  0xe7   :  { %2543 = vmatpush1.bf16.msra.mxu1 %v7745_v4  ;;  %2382 = vmatprep.subr.bf16.mxu0 %v7750_v5  ;;  %v7826_v4 = vld [vmem:[#allocation5 + $0x968] ss:$28 sps:$4 sm:$0xff]   ;;  %v7829_v5 = vld [vmem:[#allocation5 + $0x938] ss:$28 sps:$4 sm:$0xff]  }
  0xe8   :  { %2544 = vmatprep.subr.bf16.mxu1 %v7753_v6  ;;  %v7834_v6 = vld [vmem:[#allocation5 + $0x9a4] ss:$28 sps:$4 sm:$0xff]  }
  0xea   :  { %2383 = vmatpush1.bf16.msra.mxu0 %v7748_v7  ;;  %v7837_v7 = vld [vmem:[#allocation5 + $0x974] ss:$28 sps:$4 sm:$0xff]  }
  0xeb   :  { %2545 = vmatpush1.bf16.msra.mxu1 %v7751_v8  ;;  %2384 = vmatprep.subr.bf16.mxu0 %v7756_v11  ;;  %v7832_v8 = vld [vmem:[#allocation5 + $0x9a0] ss:$28 sps:$4 sm:$0xff]   ;;  %v7835_v11 = vld [vmem:[#allocation5 + $0x970] ss:$28 sps:$4 sm:$0xff]  }
  0xec   :  { %2546 = vmatprep.subr.bf16.mxu1 %v7759_v12  ;;  %v7840_v12 = vld [vmem:[#allocation5 + $0x9dc] ss:$28 sps:$4 sm:$0xff]  }
  0xee   :  { %2385 = vmatpush1.bf16.msra.mxu0 %v7754_v13  ;;  %v7843_v13 = vld [vmem:[#allocation5 + $0x9ac] ss:$28 sps:$4 sm:$0xff]  }
  0xef   :  { %2547 = vmatpush1.bf16.msra.mxu1 %v7757_v15  ;;  %2395 = vmatprep.subr.bf16.mxu0 %v7762_v16  ;;  %v7841_v15 = vld [vmem:[#allocation5 + $0x9a8] ss:$28 sps:$4 sm:$0xff]   ;;  %v7846_v16 = vld [vmem:[#allocation5 + $0xa14] ss:$28 sps:$4 sm:$0xff]  }
  0xf0   :  { %2548 = vmatprep.subr.bf16.mxu1 %v7765_v17  ;;  %v7849_v17 = vld [vmem:[#allocation5 + $0x9e4] ss:$28 sps:$4 sm:$0xff]  }
  0xf1   :  { %2387 = vmatmul.mubr.bf16.vlgmr.msra.gmra.mrb[0].mxu0 %v8918_v18 }
  0xf2   :  { %2396 = vmatpush1.bf16.msra.mxu0 %v7760_v19  ;;  %2427 = vmatprep.mubr.bf16.mxu0 %v8920_v24  ;;  %v7844_v19 = vld [vmem:[#allocation5 + $0xa10] ss:$28 sps:$4 sm:$0xff]  }
  0xf3   :  { %2549 = vmatpush1.bf16.msra.mxu1 %v7763_v20  ;;  %2397 = vmatprep.subr.bf16.mxu0 %v7768_v21  ;;  %v7847_v20 = vld [vmem:[#allocation5 + $0x9e0] ss:$28 sps:$4 sm:$0xff]   ;;  %v7852_v21 = vld [vmem:[#allocation5 + $0xa4c] ss:$28 sps:$4 sm:$0xff]  }
  0xf4   :  { %2559 = vmatprep.subr.bf16.mxu1 %v7771_v23  ;;  %v7850_v23 = vld [vmem:[#allocation5 + $0xa48] ss:$28 sps:$4 sm:$0xff]  }
  0xf6   :  { %2398 = vmatpush1.bf16.msra.mxu0 %v7766_v25  ;;  %2551 = vmatmul.mubr.bf16.vlgmr.msra.gmra.mrb[4].mxu1 %v8918_v18  ;;  %v7853_v25 = vld [vmem:[#allocation5 + $0xa18] ss:$28 sps:$4 sm:$0xff]  }
  0xf7   :  { %2560 = vmatpush1.bf16.msra.mxu1 %v7769_v26  ;;  %2399 = vmatprep.subr.bf16.mxu0 %v7774_v27  ;;  %v106_v26 = vld [vmem:[#allocation2 + $0x20] sm:$0xff]  ;;  %v7861_v27 = vld [vmem:[#allocation5 + $0x14] ss:$28 sps:$4 sm:$0xff]  }
  0xf8   :  { %2561 = vmatprep.subr.bf16.mxu1 %v7777_v28  ;;  %2591 = vmatprep.mubr.bf16.mxu1 %v8920_v24  ;;  %v7858_v28 = vld [vmem:[#allocation5 + $0xa54] ss:$28 sps:$4 sm:$0xff]  }
  0xfa   :  { %2400 = vmatpush1.bf16.msra.mxu0 %v7772_v29  ;;  %v8926_v29 = vpack.c.bf16 %v106_v26, %v106_v26  ;;  %v7915_v26 = vld [vmem:[#allocation5 + $0x320] ss:$28 sps:$4 sm:$0xff]  }
  0xfb   :  { %2562 = vmatpush1.bf16.msra.mxu1 %v7775_v30  ;;  %2401 = vmatprep.subr.bf16.mxu0 %v7780_v31  ;;  %v7856_v30 = vld [vmem:[#allocation5 + $0xa50] ss:$28 sps:$4 sm:$0xff]  }
  0xfc   :  { %2563 = vmatprep.subr.bf16.mxu1 %v7783_v32  ;;  %v7859_v31 = vld [vmem:[#allocation5 + $0x10] ss:$28 sps:$4 sm:$0xff]  }
  0xfd   :  { %v7864_v32 = vld [vmem:[#allocation5 + $0x4c] ss:$28 sps:$4 sm:$0xff]  }
  0xfe   :  { %2402 = vmatpush1.bf16.msra.mxu0 %v7778_v33  ;;  %v7870_v33 = vld [vmem:[#allocation5 + $0xa8c] ss:$28 sps:$4 sm:$0xff]  }
  0xff   :  { %2564 = vmatpush1.bf16.msra.mxu1 %v7781_v34  ;;  %2403 = vmatprep.subr.bf16.mxu0 %v7786_v35  ;;  %v7862_v34 = vld [vmem:[#allocation5 + $0x48] ss:$28 sps:$4 sm:$0xff]  }
 0x100   :  { %2565 = vmatprep.subr.bf16.mxu1 %v7789_v37  ;;  %v7867_v35 = vld [vmem:[#allocation5 + $0x84] ss:$28 sps:$4 sm:$0xff]  }
 0x101   :  { %v7868_v37 = vld [vmem:[#allocation5 + $0xa88] ss:$28 sps:$4 sm:$0xff]  }
 0x102   :  { %2404 = vmatpush1.bf16.msra.mxu0 %v7784_v38  ;;  %v7894_v38 = vld [vmem:[#allocation5 + $0xa94] ss:$28 sps:$4 sm:$0xff]  }
 0x103   :  { %2566 = vmatpush1.bf16.msra.mxu1 %v7787_v39  ;;  %2405 = vmatprep.subr.bf16.mxu0 %v7792_v40  ;;  %v7865_v39 = vld [vmem:[#allocation5 + $0x80] ss:$28 sps:$4 sm:$0xff]  }
 0x104   :  { %2567 = vmatprep.subr.bf16.mxu1 %v7795_v41  ;;  %v7873_v40 = vld [vmem:[#allocation5 + $0xbc] ss:$28 sps:$4 sm:$0xff]  }
 0x105   :  { %v7871_v41 = vld [vmem:[#allocation5 + $0xb8] ss:$28 sps:$4 sm:$0xff]  }
 0x106   :  { %2406 = vmatpush1.bf16.msra.mxu0 %v7790_v42  ;;  %v7876_v42 = vld [vmem:[#allocation5 + $0xf4] ss:$28 sps:$4 sm:$0xff]  }
 0x107   :  { %2568 = vmatpush1.bf16.msra.mxu1 %v7793_v43  ;;  %2407 = vmatprep.subr.bf16.mxu0 %v7798_v44  ;;  %v7874_v43 = vld [vmem:[#allocation5 + $0xf0] ss:$28 sps:$4 sm:$0xff]  }
 0x108   :  { %2569 = vmatprep.subr.bf16.mxu1 %v7801_v45  ;;  %v7879_v44 = vld [vmem:[#allocation5 + $0x12c] ss:$28 sps:$4 sm:$0xff]  }
 0x109   :  { %v7892_v45 = vld [vmem:[#allocation5 + $0xa90] ss:$28 sps:$4 sm:$0xff]  }
 0x10a   :  { %2408 = vmatpush1.bf16.msra.mxu0 %v7796_v46  ;;  %v7898_v46 = vld [vmem:[#allocation5 + $0x1d8] ss:$28 sps:$4 sm:$0xff]  }
 0x10b   :  { %2570 = vmatpush1.bf16.msra.mxu1 %v7799_v47  ;;  %2409 = vmatprep.subr.bf16.mxu0 %v7804_v48  ;;  %v7877_v47 = vld [vmem:[#allocation5 + $0x128] ss:$28 sps:$4 sm:$0xff]  }
 0x10c   :  { %2571 = vmatprep.subr.bf16.mxu1 %v7807_v49  ;;  %v7882_v48 = vld [vmem:[#allocation5 + $0x164] ss:$28 sps:$4 sm:$0xff]  }
 0x10d   :  { %v7880_v49 = vld [vmem:[#allocation5 + $0x160] ss:$28 sps:$4 sm:$0xff]  }
 0x10e   :  { %2410 = vmatpush1.bf16.msra.mxu0 %v7802_v50  ;;  %v7885_v50 = vld [vmem:[#allocation5 + $0x19c] ss:$28 sps:$4 sm:$0xff]  }
 0x10f   :  { %2572 = vmatpush1.bf16.msra.mxu1 %v7805_v52  ;;  %2411 = vmatprep.subr.bf16.mxu0 %v7810_v53  ;;  %v7899_v52 = vld [vmem:[#allocation5 + $0x18] ss:$28 sps:$4 sm:$0xff]  }
 0x110   :  { %2573 = vmatprep.subr.bf16.mxu1 %v7813_v54  ;;  %v7883_v53 = vld [vmem:[#allocation5 + $0x198] ss:$28 sps:$4 sm:$0xff]   ;;  %v7903_v54 = vld [vmem:[#allocation5 + $0x210] ss:$28 sps:$4 sm:$0xff]  }
 0x112   :  { %2412 = vmatpush1.bf16.msra.mxu0 %v7808_v55 }
 0x113   :  { %2574 = vmatpush1.bf16.msra.mxu1 %v7811_v56  ;;  %2413 = vmatprep.subr.bf16.mxu0 %v7816_v57  ;;  %v7888_v56 = vld [vmem:[#allocation5 + $0x1d4] ss:$28 sps:$4 sm:$0xff]  }
 0x114   :  { %2575 = vmatprep.subr.bf16.mxu1 %v7819_v58  ;;  %v7904_v58 = vld [vmem:[#allocation5 + $0x50] ss:$28 sps:$4 sm:$0xff]  }
 0x116   :  { %2414 = vmatpush1.bf16.msra.mxu0 %v7814_v59 }
 0x117   :  { %2576 = vmatpush1.bf16.msra.mxu1 %v7817_v60  ;;  %2415 = vmatprep.subr.bf16.mxu0 %v7822_v61  ;;  %v7908_v60 = vld [vmem:[#allocation5 + $0x248] ss:$28 sps:$4 sm:$0xff]  }
 0x118   :  { %2577 = vmatprep.subr.bf16.mxu1 %v7825_v62  ;;  %v7886_v62 = vld [vmem:[#allocation5 + $0x1d0] ss:$28 sps:$4 sm:$0xff]  }
 0x11a   :  { %2416 = vmatpush1.bf16.msra.mxu0 %v7820_v63  ;;  %v7891_v63 = vld [vmem:[#allocation5 + $0x20c] ss:$28 sps:$4 sm:$0xff]  }
 0x11b   :  { %2578 = vmatpush1.bf16.msra.mxu1 %v7823_v1  ;;  %2417 = vmatprep.subr.bf16.mxu0 %v7828_v2  ;;  %v7909_v1 = vld [vmem:[#allocation5 + $0x88] ss:$28 sps:$4 sm:$0xff]   ;;  %v7913_v2 = vld [vmem:[#allocation5 + $0x280] ss:$28 sps:$4 sm:$0xff]  }
 0x11c   :  { %2579 = vmatprep.subr.bf16.mxu1 %v7831_v3  ;;  %v7889_v3 = vld [vmem:[#allocation5 + $0x208] ss:$28 sps:$4 sm:$0xff]  }
 0x11e   :  { %2418 = vmatpush1.bf16.msra.mxu0 %v7826_v4  ;;  %v7897_v4 = vld [vmem:[#allocation5 + $0x244] ss:$28 sps:$4 sm:$0xff]  }
 0x11f   :  { %2580 = vmatpush1.bf16.msra.mxu1 %v7829_v5  ;;  %2419 = vmatprep.subr.bf16.mxu0 %v7834_v6  ;;  %v7914_v5 = vld [vmem:[#allocation5 + $0xc0] ss:$28 sps:$4 sm:$0xff]   ;;  %v7918_v6 = vld [vmem:[#allocation5 + $0x2b8] ss:$28 sps:$4 sm:$0xff]  }
 0x120   :  { %2581 = vmatprep.subr.bf16.mxu1 %v7837_v7  ;;  %v7895_v7 = vld [vmem:[#allocation5 + $0x240] ss:$28 sps:$4 sm:$0xff]  }
 0x122   :  { %2420 = vmatpush1.bf16.msra.mxu0 %v7832_v8  ;;  %v7919_v8 = vld [vmem:[#allocation5 + $0xf8] ss:$28 sps:$4 sm:$0xff]  }
 0x123   :  { %2582 = vmatpush1.bf16.msra.mxu1 %v7835_v11  ;;  %2421 = vmatprep.subr.bf16.mxu0 %v7840_v12  ;;  %v7923_v11 = vld [vmem:[#allocation5 + $0x2f0] ss:$28 sps:$4 sm:$0xff]   ;;  %v7900_v12 = vld [vmem:[#allocation5 + $0x278] ss:$28 sps:$4 sm:$0xff]  }
 0x124   :  { %2583 = vmatprep.subr.bf16.mxu1 %v7843_v13  ;;  %v7907_v13 = vld [vmem:[#allocation5 + $0x2b4] ss:$28 sps:$4 sm:$0xff]  }
 0x126   :  { %2422 = vmatpush1.bf16.msra.mxu0 %v7838_v14  ;;  %v7924_v14 = vld [vmem:[#allocation5 + $0x130] ss:$28 sps:$4 sm:$0xff]  }
 0x127   :  { %2584 = vmatpush1.bf16.msra.mxu1 %v7841_v15  ;;  %2423 = vmatprep.subr.bf16.mxu0 %v7846_v16  ;;  %v7928_v15 = vld [vmem:[#allocation5 + $0x328] ss:$28 sps:$4 sm:$0xff]   ;;  %v7905_v16 = vld [vmem:[#allocation5 + $0x2b0] ss:$28 sps:$4 sm:$0xff]  }
 0x128   :  { %2585 = vmatprep.subr.bf16.mxu1 %v7849_v17  ;;  %v7912_v17 = vld [vmem:[#allocation5 + $0x2ec] ss:$28 sps:$4 sm:$0xff]  }
 0x12a   :  { %2424 = vmatpush1.bf16.msra.mxu0 %v7844_v19  ;;  %v7929_v19 = vld [vmem:[#allocation5 + $0x168] ss:$28 sps:$4 sm:$0xff]  }
 0x12b   :  { %2586 = vmatpush1.bf16.msra.mxu1 %v7847_v20  ;;  %2425 = vmatprep.subr.bf16.mxu0 %v7852_v21  ;;  %v7933_v20 = vld [vmem:[#allocation5 + $0x360] ss:$28 sps:$4 sm:$0xff]   ;;  %v7910_v21 = vld [vmem:[#allocation5 + $0x2e8] ss:$28 sps:$4 sm:$0xff]  }
 0x12c   :  { %2587 = vmatprep.subr.bf16.mxu1 %v7855_v22  ;;  %v7917_v22 = vld [vmem:[#allocation5 + $0x324] ss:$28 sps:$4 sm:$0xff]  }
 0x12e   :  { %2426 = vmatpush1.bf16.msra.mxu0 %v7850_v23  ;;  %v7934_v23 = vld [vmem:[#allocation5 + $0x1a0] ss:$28 sps:$4 sm:$0xff]  }
 0x12f   :  { %2588 = vmatpush1.bf16.msra.mxu1 %v7853_v25  ;;  %2641 = vmatprep.subr.bf16.mxu0 %v7861_v27  ;;  %v7938_v25 = vld [vmem:[#allocation5 + $0x558] ss:$28 sps:$4 sm:$0xff]  }
 0x130   :  { %2589 = vmatprep.subr.bf16.mxu1 %v7858_v28  ;;  %v7922_v27 = vld [vmem:[#allocation5 + $0x35c] ss:$28 sps:$4 sm:$0xff]  }
 0x131   :  { %2428 = vmatmul.mubr.bf16.vlgmr.msra.gmra.mrb[0].mxu0 %v8926_v29  ;;  %v7939_v28 = vld [vmem:[#allocation5 + $0x398] ss:$28 sps:$4 sm:$0xff]  }
 0x132   :  { %2642 = vmatpush1.bf16.msra.mxu0 %v7859_v31  ;;  %2673 = vmatprep.mubr.bf16.mxu0 %v8906_v51  ;;  %v7920_v31 = vld [vmem:[#allocation5 + $0x358] ss:$28 sps:$4 sm:$0xff]  }
 0x133   :  { %2590 = vmatpush1.bf16.msra.mxu1 %v7856_v30  ;;  %2643 = vmatprep.subr.bf16.mxu0 %v7864_v32  ;;  %v7943_v30 = vld [vmem:[#allocation5 + $0x590] ss:$28 sps:$4 sm:$0xff]  }
 0x134   :  { %2600 = vmatprep.subr.bf16.mxu1 %v7870_v33  ;;  %v7927_v32 = vld [vmem:[#allocation5 + $0x394] ss:$28 sps:$4 sm:$0xff]  }
 0x135   :  { %v7944_v33 = vld [vmem:[#allocation5 + $0x3d0] ss:$28 sps:$4 sm:$0xff]  }
 0x136   :  { %2592 = vmatmul.mubr.bf16.vlgmr.msra.gmra.mrb[4].mxu1 %v8926_v29  ;;  %2644 = vmatpush1.bf16.msra.mxu0 %v7862_v34  ;;  %v7948_v34 = vld [vmem:[#allocation5 + $0x5c8] ss:$28 sps:$4 sm:$0xff]  }
 0x137   :  { %2645 = vmatprep.subr.bf16.mxu0 %v7867_v35  ;;  %2601 = vmatpush1.bf16.msra.mxu1 %v7868_v37  ;;  %v7925_v35 = vld [vmem:[#allocation5 + $0x390] ss:$28 sps:$4 sm:$0xff]  }
 0x138   :  { %2632 = vmatprep.mubr.bf16.mxu1 %v8785_v0  ;;  %2764 = vmatprep.subr.bf16.mxu1 %v7894_v38  ;;  %v7932_v37 = vld [vmem:[#allocation5 + $0x3cc] ss:$28 sps:$4 sm:$0xff]  }
 0x139   :  { %v7949_v38 = vld [vmem:[#allocation5 + $0x408] ss:$28 sps:$4 sm:$0xff]  }
 0x13a   :  { %2646 = vmatpush1.bf16.msra.mxu0 %v7865_v39  ;;  %v7953_v39 = vld [vmem:[#allocation5 + $0x600] ss:$28 sps:$4 sm:$0xff]  }
 0x13b   :  { %2647 = vmatprep.subr.bf16.mxu0 %v7873_v40  ;;  %v7930_v40 = vld [vmem:[#allocation5 + $0x3c8] ss:$28 sps:$4 sm:$0xff]  }
 0x13e   :  { %2648 = vmatpush1.bf16.msra.mxu0 %v7871_v41  ;;  %v7937_v41 = vld [vmem:[#allocation5 + $0x404] ss:$28 sps:$4 sm:$0xff]  }
 0x13f   :  { %2649 = vmatprep.subr.bf16.mxu0 %v7876_v42  ;;  %v7954_v42 = vld [vmem:[#allocation5 + $0x440] ss:$28 sps:$4 sm:$0xff]  }
 0x142   :  { %6839 = vmatmul.mubr.msk.bf16.vlgmr.msra.gmra.mrb[4].mxu1 %vm2309_vm0, %v8902_v10  ;;  %2650 = vmatpush1.bf16.msra.mxu0 %v7874_v43  ;;  %v7958_v43 = vld [vmem:[#allocation5 + $0x638] ss:$28 sps:$4 sm:$0xff]  }
 0x143   :  { %2651 = vmatprep.subr.bf16.mxu0 %v7879_v44  ;;  %2765 = vmatpush1.bf16.msra.mxu1 %v7892_v45  ;;  %v7935_v44 = vld [vmem:[#allocation5 + $0x400] ss:$28 sps:$4 sm:$0xff]  }
 0x144   :  { %2796 = vmatprep.mubr.bf16.mxu1 %v8785_v0  ;;  %7248 = vmatprep.subr.bf16.mxu1 %v7898_v46  ;;  %v7942_v45 = vld [vmem:[#allocation5 + $0x43c] ss:$28 sps:$4 sm:$0xff]  }
 0x145   :  { %v7959_v46 = vld [vmem:[#allocation5 + $0x478] ss:$28 sps:$4 sm:$0xff]  }
 0x146   :  { %2652 = vmatpush1.bf16.msra.mxu0 %v7877_v47  ;;  %v7963_v47 = vld [vmem:[#allocation5 + $0x670] ss:$28 sps:$4 sm:$0xff]  }
 0x147   :  { %2653 = vmatprep.subr.bf16.mxu0 %v7882_v48  ;;  %v7947_v48 = vld [vmem:[#allocation5 + $0x474] ss:$28 sps:$4 sm:$0xff]  }
 0x149   :  { %v8935_v55 = vpop.f32.mrb[0].mxu1 }
 0x14a   :  { %2654 = vmatpush1.bf16.msra.mxu0 %v7880_v49  ;;  %6840 = vmatmul.mubr.msk.bf16.vlgmr.msra.gmra.mrb[8].mxu1 %vm2309_vm0, %v8902_v10  ;;  %v8939_v57 = vpop.f32.mrb[1].mxu1  ;;  %v7968_v49 = vld [vmem:[#allocation5 + $0x6a8] ss:$28 sps:$4 sm:$0xff]  }
 0x14b   :  { %2655 = vmatprep.subr.bf16.mxu0 %v7885_v50  ;;  %7249 = vmatpush3.bf16.msra.mxu1 %v7899_v52  ;;  %v2474_v59 = vpop.f32.mrb[2].mxu1  ;;  %v7945_v50 = vld [vmem:[#allocation5 + $0x470] ss:$28 sps:$4 sm:$0xff]  }
 0x14c   :  { %7250 = vmatprep.subr.bf16.mxu1 %v7903_v54  ;;  %2837 = vmatprep.mubr.bf16.mxu1 %v8906_v51  ;;  %v2475_v61 = vpop.f32.mrb[3].mxu1  ;;  %v7902_v51 = vld [vmem:[#allocation5 + $0x27c] ss:$28 sps:$4 sm:$0xff]   ;;  %v7952_v52 = vld [vmem:[#allocation5 + $0x4ac] ss:$28 sps:$4 sm:$0xff]  }
 0x14d   :  { %v7973_v54 = vld [vmem:[#allocation5 + $0x6e0] ss:$28 sps:$4 sm:$0xff]  }
 0x14e   :  { %2656 = vmatpush1.bf16.msra.mxu0 %v7883_v53  ;;  %v7969_v53 = vld [vmem:[#allocation5 + $0x4e8] ss:$28 sps:$4 sm:$0xff]   ;;  %v7974_v59 = vld [vmem:[#allocation5 + $0x520] ss:$28 sps:$4 sm:$0xff]  }
 0x14f   :  { %2657 = vmatprep.subr.bf16.mxu0 %v7888_v56  ;;  %7251 = vmatpush3.bf16.msra.mxu1 %v7904_v58  ;;  %v7950_v56 = vld [vmem:[#allocation5 + $0x4a8] ss:$28 sps:$4 sm:$0xff]   ;;  %v7955_v61 = vld [vmem:[#allocation5 + $0x4e0] ss:$28 sps:$4 sm:$0xff]  }
 0x150   :  { %7252 = vmatprep.subr.bf16.mxu1 %v7908_v60  ;;  %v7957_v58 = vld [vmem:[#allocation5 + $0x4e4] ss:$28 sps:$4 sm:$0xff]   ;;  %v7978_v60 = vld [vmem:[#allocation5 + $0x8d8] ss:$28 sps:$4 sm:$0xff]  }
 0x152   :  { %2658 = vmatpush1.bf16.msra.mxu0 %v7886_v62  ;;  %v7962_v62 = vld [vmem:[#allocation5 + $0x51c] ss:$28 sps:$4 sm:$0xff]  }
 0x153   :  { %2659 = vmatprep.subr.bf16.mxu0 %v7891_v63  ;;  %7253 = vmatpush3.bf16.msra.mxu1 %v7909_v1  ;;  %v7979_v63 = vld [vmem:[#allocation5 + $0x718] ss:$28 sps:$4 sm:$0xff]   ;;  %v7983_v1 = vld [vmem:[#allocation5 + $0x910] ss:$28 sps:$4 sm:$0xff]  }
 0x154   :  { %7254 = vmatprep.subr.bf16.mxu1 %v7913_v2  ;;  %v7960_v2 = vld [vmem:[#allocation5 + $0x518] ss:$28 sps:$4 sm:$0xff]  }
 0x156   :  { %2660 = vmatpush1.bf16.msra.mxu0 %v7889_v3  ;;  %v7967_v3 = vld [vmem:[#allocation5 + $0x554] ss:$28 sps:$4 sm:$0xff]  }
 0x157   :  { %2661 = vmatprep.subr.bf16.mxu0 %v7897_v4  ;;  %7255 = vmatpush3.bf16.msra.mxu1 %v7914_v5  ;;  %v7984_v4 = vld [vmem:[#allocation5 + $0x750] ss:$28 sps:$4 sm:$0xff]  }
 0x158   :  { %7256 = vmatprep.subr.bf16.mxu1 %v7918_v6  ;;  %v7965_v5 = vld [vmem:[#allocation5 + $0x550] ss:$28 sps:$4 sm:$0xff]   ;;  %v7988_v6 = vld [vmem:[#allocation5 + $0x948] ss:$28 sps:$4 sm:$0xff]  }
 0x15a   :  { %2662 = vmatpush1.bf16.msra.mxu0 %v7895_v7  ;;  %v7972_v7 = vld [vmem:[#allocation5 + $0x58c] ss:$28 sps:$4 sm:$0xff]  }
 0x15b   :  { %2663 = vmatprep.subr.bf16.mxu0 %v7902_v51  ;;  %7257 = vmatpush3.bf16.msra.mxu1 %v7919_v8  ;;  %v7989_v51 = vld [vmem:[#allocation5 + $0x788] ss:$28 sps:$4 sm:$0xff]  }
 0x15c   :  { %7258 = vmatprep.subr.bf16.mxu1 %v7923_v11  ;;  %v7970_v8 = vld [vmem:[#allocation5 + $0x588] ss:$28 sps:$4 sm:$0xff]   ;;  %v7993_v11 = vld [vmem:[#allocation5 + $0x980] ss:$28 sps:$4 sm:$0xff]  }
 0x15e   :  { %2664 = vmatpush1.bf16.msra.mxu0 %v7900_v12  ;;  %v7977_v12 = vld [vmem:[#allocation5 + $0x5c4] ss:$28 sps:$4 sm:$0xff]  }
 0x15f   :  { %2665 = vmatprep.subr.bf16.mxu0 %v7907_v13  ;;  %7259 = vmatpush3.bf16.msra.mxu1 %v7924_v14  ;;  %v7994_v13 = vld [vmem:[#allocation5 + $0x7c0] ss:$28 sps:$4 sm:$0xff]   ;;  %v7998_v14 = vld [vmem:[#allocation5 + $0x9b8] ss:$28 sps:$4 sm:$0xff]  }
 0x160   :  { %7260 = vmatprep.subr.bf16.mxu1 %v7928_v15  ;;  %v7975_v15 = vld [vmem:[#allocation5 + $0x5c0] ss:$28 sps:$4 sm:$0xff]  }
 0x162   :  { %2666 = vmatpush1.bf16.msra.mxu0 %v7905_v16  ;;  %v7982_v16 = vld [vmem:[#allocation5 + $0x5fc] ss:$28 sps:$4 sm:$0xff]  }
 0x163   :  { %2667 = vmatprep.subr.bf16.mxu0 %v7912_v17  ;;  %7261 = vmatpush3.bf16.msra.mxu1 %v7929_v19  ;;  %v7999_v17 = vld [vmem:[#allocation5 + $0x7f8] ss:$28 sps:$4 sm:$0xff]   ;;  %v8003_v19 = vld [vmem:[#allocation5 + $0x9f0] ss:$28 sps:$4 sm:$0xff]  }
 0x164   :  { %7262 = vmatprep.subr.bf16.mxu1 %v7933_v20  ;;  %v7980_v20 = vld [vmem:[#allocation5 + $0x5f8] ss:$28 sps:$4 sm:$0xff]  }
 0x166   :  { %2668 = vmatpush1.bf16.msra.mxu0 %v7910_v21  ;;  %v7987_v21 = vld [vmem:[#allocation5 + $0x634] ss:$28 sps:$4 sm:$0xff]  }
 0x167   :  { %2669 = vmatprep.subr.bf16.mxu0 %v7917_v22  ;;  %7263 = vmatpush3.bf16.msra.mxu1 %v7934_v23  ;;  %v8004_v22 = vld [vmem:[#allocation5 + $0x830] ss:$28 sps:$4 sm:$0xff]   ;;  %v8008_v23 = vld [vmem:[#allocation5 + $0xa28] ss:$28 sps:$4 sm:$0xff]  }
 0x168   :  { %7270 = vmatprep.subr.bf16.mxu1 %v7938_v25  ;;  %v7985_v25 = vld [vmem:[#allocation5 + $0x630] ss:$28 sps:$4 sm:$0xff]  }
 0x16a   :  { %2670 = vmatpush1.bf16.msra.mxu0 %v7915_v26  ;;  %2838 = vmatmul.mubr.bf16.vlgmr.msra.gmra.mrb[12].mxu1 %v8910_v9  ;;  %v7992_v26 = vld [vmem:[#allocation5 + $0x66c] ss:$28 sps:$4 sm:$0xff]  }
 0x16b   :  { %2671 = vmatprep.subr.bf16.mxu0 %v7922_v27  ;;  %7271 = vmatpush3.bf16.msra.mxu1 %v7939_v28  ;;  %v8009_v27 = vld [vmem:[#allocation5 + $0x868] ss:$28 sps:$4 sm:$0xff]  }
 0x16c   :  { %7272 = vmatprep.subr.bf16.mxu1 %v7943_v30  ;;  %2877 = vmatprep.mubr.bf16.mxu1 %v8914_v36  ;;  %v7990_v28 = vld [vmem:[#allocation5 + $0x668] ss:$28 sps:$4 sm:$0xff]   ;;  %v8013_v30 = vld [vmem:[#allocation5 + $0xa60] ss:$28 sps:$4 sm:$0xff]  }
 0x16e   :  { %2672 = vmatpush1.bf16.msra.mxu0 %v7920_v31  ;;  %v7997_v31 = vld [vmem:[#allocation5 + $0x6a4] ss:$28 sps:$4 sm:$0xff]  }
 0x16f   :  { %2682 = vmatprep.subr.bf16.mxu0 %v7927_v32  ;;  %7273 = vmatpush3.bf16.msra.mxu1 %v7944_v33  ;;  %v8014_v32 = vld [vmem:[#allocation5 + $0x8a0] ss:$28 sps:$4 sm:$0xff]  }
 0x170   :  { %7274 = vmatprep.subr.bf16.mxu1 %v7948_v34  ;;  %v7995_v33 = vld [vmem:[#allocation5 + $0x6a0] ss:$28 sps:$4 sm:$0xff]  }
 0x171   :  { %2674 = vmatmul.mubr.bf16.vlgmr.msra.gmra.mrb[4].mxu0 %v8910_v9  ;;  %v7940_v9 = vld [vmem:[#allocation5 + $0x438] ss:$28 sps:$4 sm:$0xff]  }
 0x172   :  { %2683 = vmatpush1.bf16.msra.mxu0 %v7925_v35  ;;  %2714 = vmatprep.mubr.bf16.mxu0 %v8914_v36  ;;  %v7964_v36 = vld [vmem:[#allocation5 + $0x4b0] ss:$28 sps:$4 sm:$0xff]   ;;  %v8002_v34 = vld [vmem:[#allocation5 + $0x6dc] ss:$28 sps:$4 sm:$0xff]  }
 0x173   :  { %2684 = vmatprep.subr.bf16.mxu0 %v7932_v37  ;;  %7275 = vmatpush3.bf16.msra.mxu1 %v7949_v38  ;;  %v8021_v35 = vld [vmem:[#allocation5 + $0xa98] ss:$28 sps:$4 sm:$0xff]   ;;  %v8786_v38 = vmov 0.0  }
 0x174   :  { %7276 = vmatprep.subr.bf16.mxu1 %v7953_v39  ;;  %v8000_v37 = vld [vmem:[#allocation5 + $0x6d8] ss:$28 sps:$4 sm:$0xff]   ;;  %v8036_v39 = vld [vmem:[#allocation8 + $0x4] ss:$28 sps:$4 sm:$0xff]  }
 0x176   :  { %2685 = vmatpush1.bf16.msra.mxu0 %v7930_v40  ;;  %v8007_v40 = vld [vmem:[#allocation5 + $0x714] ss:$28 sps:$4 sm:$0xff]  }
 0x177   :  { %2686 = vmatprep.subr.bf16.mxu0 %v7937_v41  ;;  %7277 = vmatpush3.bf16.msra.mxu1 %v7954_v42  ;;  %v8005_v41 = vld [vmem:[#allocation5 + $0x710] ss:$28 sps:$4 sm:$0xff]  }
 0x178   :  { %7278 = vmatprep.subr.bf16.mxu1 %v7958_v43  ;;  %v8012_v42 = vld [vmem:[#allocation5 + $0x74c] ss:$28 sps:$4 sm:$0xff]   ;;  %v8034_v43 = vld [vmem:[#allocation8] ss:$28 sps:$4 sm:$0xff]  }
 0x17a   :  { %2687 = vmatpush1.bf16.msra.mxu0 %v7935_v44  ;;  %v8042_v44 = vld [vmem:[#allocation8 + $0x3c] ss:$28 sps:$4 sm:$0xff]  }
 0x17b   :  { %2688 = vmatprep.subr.bf16.mxu0 %v7942_v45  ;;  %7279 = vmatpush3.bf16.msra.mxu1 %v7959_v46  ;;  %v8010_v45 = vld [vmem:[#allocation5 + $0x748] ss:$28 sps:$4 sm:$0xff]  }
 0x17c   :  { %7280 = vmatprep.subr.bf16.mxu1 %v7963_v47  ;;  %v8017_v46 = vld [vmem:[#allocation5 + $0x784] ss:$28 sps:$4 sm:$0xff]   ;;  %v8040_v47 = vld [vmem:[#allocation8 + $0x38] ss:$28 sps:$4 sm:$0xff]  }
 0x17e   :  { %2689 = vmatpush1.bf16.msra.mxu0 %v7940_v9  ;;  %v8015_v9 = vld [vmem:[#allocation5 + $0x780] ss:$28 sps:$4 sm:$0xff]  }
 0x17f   :  { %2690 = vmatprep.subr.bf16.mxu0 %v7947_v48  ;;  %7281 = vmatpush3.bf16.msra.mxu1 %v7964_v36  ;;  %v8048_v48 = vld [vmem:[#allocation8 + $0x74] ss:$28 sps:$4 sm:$0xff]   ;;  %v8020_v36 = vld [vmem:[#allocation5 + $0x7bc] ss:$28 sps:$4 sm:$0xff]  }
 0x180   :  { %7282 = vmatprep.subr.bf16.mxu1 %v7968_v49  ;;  %v8046_v49 = vld [vmem:[#allocation8 + $0x70] ss:$28 sps:$4 sm:$0xff]  }
 0x182   :  { %2691 = vmatpush1.bf16.msra.mxu0 %v7945_v50  ;;  %v8054_v50 = vld [vmem:[#allocation8 + $0xac] ss:$28 sps:$4 sm:$0xff]  }
 0x183   :  { %2692 = vmatprep.subr.bf16.mxu0 %v7952_v52  ;;  %7283 = vmatpush3.bf16.msra.mxu1 %v7969_v53  ;;  %v8024_v52 = vld [vmem:[#allocation5 + $0x7f4] ss:$28 sps:$4 sm:$0xff]   ;;  %v8052_v53 = vld [vmem:[#allocation8 + $0xa8] ss:$28 sps:$4 sm:$0xff]  }
 0x184   :  { %7284 = vmatprep.subr.bf16.mxu1 %v7973_v54  ;;  %v8060_v54 = vld [vmem:[#allocation8 + $0xe4] ss:$28 sps:$4 sm:$0xff]  }
 0x186   :  { %2693 = vmatpush1.bf16.msra.mxu0 %v7950_v56  ;;  %v8027_v56 = vld [vmem:[#allocation5 + $0x82c] ss:$28 sps:$4 sm:$0xff]  }
 0x187   :  { %2694 = vmatprep.subr.bf16.mxu0 %v7957_v58  ;;  %7285 = vmatpush3.bf16.msra.mxu1 %v7974_v59  ;;  %v8058_v58 = vld [vmem:[#allocation8 + $0xe0] ss:$28 sps:$4 sm:$0xff]  }
 0x188   :  { %7292 = vmatprep.subr.bf16.mxu1 %v7978_v60  ;;  %v8066_v59 = vld [vmem:[#allocation8 + $0x11c] ss:$28 sps:$4 sm:$0xff]   ;;  %v8030_v60 = vld [vmem:[#allocation5 + $0x864] ss:$28 sps:$4 sm:$0xff]  }
 0x18a   :  { %2695 = vmatpush1.bf16.msra.mxu0 %v7955_v61  ;;  %2878 = vmatmul.mubr.bf16.vlgmr.msra.gmra.mrb[16].mxu1 %v8918_v18  ;;  %v8064_v61 = vld [vmem:[#allocation8 + $0x118] ss:$28 sps:$4 sm:$0xff]  }
 0x18b   :  { %2696 = vmatprep.subr.bf16.mxu0 %v7962_v62  ;;  %7293 = vmatpush3.bf16.msra.mxu1 %v7979_v63  ;;  %v8028_v62 = vld [vmem:[#allocation5 + $0x860] ss:$28 sps:$4 sm:$0xff]   ;;  %v8072_v63 = vld [vmem:[#allocation8 + $0x154] ss:$28 sps:$4 sm:$0xff]  }
 0x18c   :  { %7294 = vmatprep.subr.bf16.mxu1 %v7983_v1  ;;  %2917 = vmatprep.mubr.bf16.mxu1 %v8920_v24  ;;  %v8033_v1 = vld [vmem:[#allocation5 + $0x89c] ss:$28 sps:$4 sm:$0xff]  }
 0x18e   :  { %2697 = vmatpush1.bf16.msra.mxu0 %v7960_v2  ;;  %v8070_v2 = vld [vmem:[#allocation8 + $0x150] ss:$28 sps:$4 sm:$0xff]  }
 0x18f   :  { %2698 = vmatprep.subr.bf16.mxu0 %v7967_v3  ;;  %7295 = vmatpush3.bf16.msra.mxu1 %v7984_v4  ;;  %v8031_v3 = vld [vmem:[#allocation5 + $0x898] ss:$28 sps:$4 sm:$0xff]   ;;  %v8078_v4 = vld [vmem:[#allocation8 + $0x18c] ss:$28 sps:$4 sm:$0xff]  }
 0x190   :  { %7296 = vmatprep.subr.bf16.mxu1 %v7988_v6  ;;  %v8076_v6 = vld [vmem:[#allocation8 + $0x188] ss:$28 sps:$4 sm:$0xff]  }
 0x192   :  { %2699 = vmatpush1.bf16.msra.mxu0 %v7965_v5  ;;  %v8039_v5 = vld [vmem:[#allocation5 + $0x8d4] ss:$28 sps:$4 sm:$0xff]  }
 0x193   :  { %2700 = vmatprep.subr.bf16.mxu0 %v7972_v7  ;;  %7297 = vmatpush3.bf16.msra.mxu1 %v7989_v51  ;;  %v8037_v7 = vld [vmem:[#allocation5 + $0x8d0] ss:$28 sps:$4 sm:$0xff]   ;;  %v8084_v51 = vld [vmem:[#allocation8 + $0x1c4] ss:$28 sps:$4 sm:$0xff]  }
 0x194   :  { %7298 = vmatprep.subr.bf16.mxu1 %v7993_v11  ;;  %v8082_v11 = vld [vmem:[#allocation8 + $0x1c0] ss:$28 sps:$4 sm:$0xff]  }
 0x196   :  { %2701 = vmatpush1.bf16.msra.mxu0 %v7970_v8  ;;  %v8045_v8 = vld [vmem:[#allocation5 + $0x90c] ss:$28 sps:$4 sm:$0xff]  }
 0x197   :  { %2702 = vmatprep.subr.bf16.mxu0 %v7977_v12  ;;  %7299 = vmatpush3.bf16.msra.mxu1 %v7994_v13  ;;  %v8090_v12 = vld [vmem:[#allocation8 + $0x1fc] ss:$28 sps:$4 sm:$0xff]   ;;  %v8043_v13 = vld [vmem:[#allocation5 + $0x908] ss:$28 sps:$4 sm:$0xff]  }
 0x198   :  { %7300 = vmatprep.subr.bf16.mxu1 %v7998_v14  ;;  %v8051_v14 = vld [vmem:[#allocation5 + $0x944] ss:$28 sps:$4 sm:$0xff]  }
 0x19a   :  { %2703 = vmatpush1.bf16.msra.mxu0 %v7975_v15  ;;  %v8088_v15 = vld [vmem:[#allocation8 + $0x1f8] ss:$28 sps:$4 sm:$0xff]  }
 0x19b   :  { %2704 = vmatprep.subr.bf16.mxu0 %v7982_v16  ;;  %7301 = vmatpush3.bf16.msra.mxu1 %v7999_v17  ;;  %v8096_v16 = vld [vmem:[#allocation8 + $0x234] ss:$28 sps:$4 sm:$0xff]   ;;  %v8049_v17 = vld [vmem:[#allocation5 + $0x940] ss:$28 sps:$4 sm:$0xff]  }
 0x19c   :  { %7302 = vmatprep.subr.bf16.mxu1 %v8003_v19  ;;  %v8057_v19 = vld [vmem:[#allocation5 + $0x97c] ss:$28 sps:$4 sm:$0xff]  }
 0x19e   :  { %2705 = vmatpush1.bf16.msra.mxu0 %v7980_v20  ;;  %v8094_v20 = vld [vmem:[#allocation8 + $0x230] ss:$28 sps:$4 sm:$0xff]  }
 0x19f   :  { %2706 = vmatprep.subr.bf16.mxu0 %v7987_v21  ;;  %7303 = vmatpush3.bf16.msra.mxu1 %v8004_v22  ;;  %v8102_v21 = vld [vmem:[#allocation8 + $0x26c] ss:$28 sps:$4 sm:$0xff]   ;;  %v8055_v22 = vld [vmem:[#allocation5 + $0x978] ss:$28 sps:$4 sm:$0xff]  }
 0x1a0   :  { %7304 = vmatprep.subr.bf16.mxu1 %v8008_v23  ;;  %v8063_v23 = vld [vmem:[#allocation5 + $0x9b4] ss:$28 sps:$4 sm:$0xff]  }
 0x1a2   :  { %2707 = vmatpush1.bf16.msra.mxu0 %v7985_v25  ;;  %v8100_v25 = vld [vmem:[#allocation8 + $0x268] ss:$28 sps:$4 sm:$0xff]  }
 0x1a3   :  { %2708 = vmatprep.subr.bf16.mxu0 %v7992_v26  ;;  %7305 = vmatpush3.bf16.msra.mxu1 %v8009_v27  ;;  %v8108_v26 = vld [vmem:[#allocation8 + $0x2a4] ss:$28 sps:$4 sm:$0xff]   ;;  %v8061_v27 = vld [vmem:[#allocation5 + $0x9b0] ss:$28 sps:$4 sm:$0xff]  }
 0x1a4   :  { %7306 = vmatprep.subr.bf16.mxu1 %v8013_v30  ;;  %v8106_v30 = vld [vmem:[#allocation8 + $0x2a0] ss:$28 sps:$4 sm:$0xff]  }
 0x1a6   :  { %2709 = vmatpush1.bf16.msra.mxu0 %v7990_v28  ;;  %v8069_v28 = vld [vmem:[#allocation5 + $0x9ec] ss:$28 sps:$4 sm:$0xff]  }
 0x1a7   :  { %2710 = vmatprep.subr.bf16.mxu0 %v7997_v31  ;;  %7307 = vmatpush3.bf16.msra.mxu1 %v8014_v32  ;;  %v8114_v31 = vld [vmem:[#allocation8 + $0x2dc] ss:$28 sps:$4 sm:$0xff]   ;;  %v8067_v32 = vld [vmem:[#allocation5 + $0x9e8] ss:$28 sps:$4 sm:$0xff]  }
 0x1a8   :  { %7454 = vmatprep.subr.bf16.mxu1 %v8786_v38 }
 0x1aa   :  { %2711 = vmatpush1.bf16.msra.mxu0 %v7995_v33  ;;  %2918 = vmatmul.mubr.bf16.vlgmr.msra.gmra.mrb[20].mxu1 %v8926_v29  ;;  %v8075_v33 = vld [vmem:[#allocation5 + $0xa24] ss:$28 sps:$4 sm:$0xff]  }
 0x1ab   :  { %2712 = vmatprep.subr.bf16.mxu0 %v8002_v34  ;;  %7455 = vmatpush3.bf16.msra.mxu1 %v8021_v35  ;;  %v8112_v34 = vld [vmem:[#allocation8 + $0x2d8] ss:$28 sps:$4 sm:$0xff]  }
 0x1ac   :  { %7456 = vmatprep.mubr.msk.bf16.mxu1 %vm8787_vm1, %v8786_v38  ;;  %5220 = vmatprep.subr.bf16.mxu1 %v8036_v39  ;;  %v8120_v35 = vld [vmem:[#allocation8 + $0x314] ss:$28 sps:$4 sm:$0xff]   ;;  %v8081_v39 = vld [vmem:[#allocation5 + $0xa5c] ss:$28 sps:$4 sm:$0xff]  }
 0x1ae   :  { %2713 = vmatpush1.bf16.msra.mxu0 %v8000_v37  ;;  %v8073_v37 = vld [vmem:[#allocation5 + $0xa20] ss:$28 sps:$4 sm:$0xff]  }
 0x1af   :  { %2723 = vmatprep.subr.bf16.mxu0 %v8007_v40  ;;  %v8118_v40 = vld [vmem:[#allocation8 + $0x310] ss:$28 sps:$4 sm:$0xff]  }
 0x1b1   :  { %2715 = vmatmul.mubr.bf16.vlgmr.msra.gmra.mrb[4].mxu0 %v8918_v18  ;;  %v8018_v18 = vld [vmem:[#allocation5 + $0x7b8] ss:$28 sps:$4 sm:$0xff]  }
 0x1b2   :  { %2724 = vmatpush1.bf16.msra.mxu0 %v8005_v41  ;;  %7457 = vmatmul.mubr.msk.bf16.vlgmr.msra.gmra.mrb[24].mxu1 %vm2309_vm0, %v8902_v10  ;;  %v8022_v10 = vld [vmem:[#allocation5 + $0x7f0] ss:$28 sps:$4 sm:$0xff]  }
 0x1b3   :  { %2725 = vmatprep.subr.bf16.mxu0 %v8012_v42  ;;  %5221 = vmatpush1.bf16.msra.mxu1 %v8034_v43  ;;  %v8126_v41 = vld [vmem:[#allocation8 + $0x34c] ss:$28 sps:$4 sm:$0xff]   ;;  %v8079_v42 = vld [vmem:[#allocation5 + $0xa58] ss:$28 sps:$4 sm:$0xff]  }
 0x1b4   :  { %5222 = vmatprep.subr.bf16.mxu1 %v8042_v44  ;;  %2755 = vmatprep.mubr.bf16.mxu0 %v8920_v24  ;;  %v8025_v24 = vld [vmem:[#allocation5 + $0x828] ss:$28 sps:$4 sm:$0xff]  }
 0x1b5   :  { %v8087_v43 = vld [vmem:[#allocation8 + $0xc] ss:$28 sps:$4 sm:$0xff]  }
 0x1b6   :  { %2726 = vmatpush1.bf16.msra.mxu0 %v8010_v45  ;;  %v8124_v44 = vld [vmem:[#allocation8 + $0x348] ss:$28 sps:$4 sm:$0xff]  }
 0x1b7   :  { %2727 = vmatprep.subr.bf16.mxu0 %v8017_v46  ;;  %5223 = vmatpush1.bf16.msra.mxu1 %v8040_v47  ;;  %v8132_v45 = vld [vmem:[#allocation8 + $0x384] ss:$28 sps:$4 sm:$0xff]  }
 0x1b8   :  { %5224 = vmatprep.subr.bf16.mxu1 %v8048_v48  ;;  %v8085_v46 = vld [vmem:[#allocation8 + $0x8] ss:$28 sps:$4 sm:$0xff]   ;;  %v8099_v48 = vld [vmem:[#allocation8 + $0x7c] ss:$28 sps:$4 sm:$0xff]  }
 0x1b9   :  { %v8093_v47 = vld [vmem:[#allocation8 + $0x44] ss:$28 sps:$4 sm:$0xff]  }
 0x1ba   :  { %2728 = vmatpush1.bf16.msra.mxu0 %v8015_v9  ;;  %v8091_v9 = vld [vmem:[#allocation8 + $0x40] ss:$28 sps:$4 sm:$0xff]  }
 0x1bb   :  { %2729 = vmatprep.subr.bf16.mxu0 %v8020_v36  ;;  %5225 = vmatpush1.bf16.msra.mxu1 %v8046_v49  ;;  %v8097_v36 = vld [vmem:[#allocation8 + $0x78] ss:$28 sps:$4 sm:$0xff]   ;;  %v510_v49 = vlaneseq }
 0x1bc   :  { %5226 = vmatprep.subr.bf16.mxu1 %v8054_v50  ;;  %v8103_v50 = vld [vmem:[#allocation8 + $0xb0] ss:$28 sps:$4 sm:$0xff]  }
 0x1be   :  { %2730 = vmatpush1.bf16.msra.mxu0 %v8018_v18  ;;  %v8105_v18 = vld [vmem:[#allocation8 + $0xb4] ss:$28 sps:$4 sm:$0xff]  }
 0x1bf   :  { %2731 = vmatprep.subr.bf16.mxu0 %v8024_v52  ;;  %5227 = vmatpush1.bf16.msra.mxu1 %v8052_v53  ;;  %v8957_v52 = vshrl.u32 %v510_v49, 7  ;;  %v8111_v53 = vld [vmem:[#allocation8 + $0xec] ss:$28 sps:$4 sm:$0xff]   ;;  %v8168_v49 = vld [vmem:[#allocation8 + $0x4d4] ss:$28 sps:$4 sm:$0xff]  }
 0x1c0   :  { %5228 = vmatprep.subr.bf16.mxu1 %v8060_v54  ;;  %v8959_v54 = vld [vmem:[#allocation7] sm:$0x7f] }
 0x1c2   :  { %2732 = vmatpush1.bf16.msra.mxu0 %v8022_v10  ;;  %v8109_v10 = vld [vmem:[#allocation8 + $0xe8] ss:$28 sps:$4 sm:$0xff]  }
 0x1c3   :  { %2733 = vmatprep.subr.bf16.mxu0 %v8027_v56  ;;  %5229 = vmatpush1.bf16.msra.mxu1 %v8058_v58  ;;  %v516_v56 = vsub.s32 1, %v8957_v52  ;;  %v8117_v58 = vld [vmem:[#allocation8 + $0x124] ss:$28 sps:$4 sm:$0xff]  }
 0x1c4   :  { %5230 = vmatprep.subr.bf16.mxu1 %v8066_v59 }
 0x1c6   :  { %2734 = vmatpush1.bf16.msra.mxu0 %v8025_v24  ;;  %v8115_v24 = vld [vmem:[#allocation8 + $0x120] ss:$28 sps:$4 sm:$0xff]  }
 0x1c7   :  { %2735 = vmatprep.subr.bf16.mxu0 %v8030_v60  ;;  %5231 = vmatpush1.bf16.msra.mxu1 %v8064_v61  ;;  %v8123_v60 = vld [vmem:[#allocation8 + $0x15c] ss:$28 sps:$4 sm:$0xff]   ;;  %v517_v61 = vrot.slane %v8959_v54, %v516_v56 }
 0x1c8   :  { %5232 = vmatprep.subr.bf16.mxu1 %v8072_v63  ;;  %v8121_v63 = vld [vmem:[#allocation8 + $0x158] ss:$28 sps:$4 sm:$0xff]  }
 0x1ca   :  { %2736 = vmatpush1.bf16.msra.mxu0 %v8028_v62 }
 0x1cb   :  { %2737 = vmatprep.subr.bf16.mxu0 %v8033_v1  ;;  %5233 = vmatpush1.bf16.msra.mxu1 %v8070_v2 }
 0x1cc   :  { %5234 = vmatprep.subr.bf16.mxu1 %v8078_v4 }
 0x1ce   :  { %2738 = vmatpush1.bf16.msra.mxu0 %v8031_v3  ;;  %v8129_v3 = vld [vmem:[#allocation8 + $0x194] ss:$28 sps:$4 sm:$0xff]  }
 0x1cf   :  { %2739 = vmatprep.subr.bf16.mxu0 %v8039_v5  ;;  %5235 = vmatpush1.bf16.msra.mxu1 %v8076_v6 }
 0x1d0   :  { %5236 = vmatprep.subr.bf16.mxu1 %v8084_v51 }
 0x1d2   :  { %2740 = vmatpush1.bf16.msra.mxu0 %v8037_v7 }
 0x1d3   :  { %2741 = vmatprep.subr.bf16.mxu0 %v8045_v8  ;;  %5237 = vmatpush1.bf16.msra.mxu1 %v8082_v11 }
 0x1d4   :  { %5238 = vmatprep.subr.bf16.mxu1 %v8090_v12  ;;  %v8127_v12 = vld [vmem:[#allocation8 + $0x190] ss:$28 sps:$4 sm:$0xff]  }
 0x1d6   :  { %2742 = vmatpush1.bf16.msra.mxu0 %v8043_v13 }
 0x1d7   :  { %2743 = vmatprep.subr.bf16.mxu0 %v8051_v14  ;;  %5239 = vmatpush1.bf16.msra.mxu1 %v8088_v15  ;;  %v8130_v14 = vld [vmem:[#allocation8 + $0x380] ss:$28 sps:$4 sm:$0xff]   ;;  %v8135_v15 = vld [vmem:[#allocation8 + $0x1cc] ss:$28 sps:$4 sm:$0xff]  }
 0x1d8   :  { %5240 = vmatprep.subr.bf16.mxu1 %v8096_v16 }
 0x1da   :  { %2744 = vmatpush1.bf16.msra.mxu0 %v8049_v17  ;;  %v8138_v17 = vld [vmem:[#allocation8 + $0x3bc] ss:$28 sps:$4 sm:$0xff]  }
 0x1db   :  { %2745 = vmatprep.subr.bf16.mxu0 %v8057_v19  ;;  %5241 = vmatpush1.bf16.msra.mxu1 %v8094_v20  ;;  %v8141_v19 = vld [vmem:[#allocation8 + $0x204] ss:$28 sps:$4 sm:$0xff]   ;;  %v8136_v20 = vld [vmem:[#allocation8 + $0x3b8] ss:$28 sps:$4 sm:$0xff]  }
 0x1dc   :  { %5242 = vmatprep.subr.bf16.mxu1 %v8102_v21  ;;  %v8144_v21 = vld [vmem:[#allocation8 + $0x3f4] ss:$28 sps:$4 sm:$0xff]  }
 0x1de   :  { %2746 = vmatpush1.bf16.msra.mxu0 %v8055_v22  ;;  %v8139_v22 = vld [vmem:[#allocation8 + $0x200] ss:$28 sps:$4 sm:$0xff]  }
 0x1df   :  { %2747 = vmatprep.subr.bf16.mxu0 %v8063_v23  ;;  %5243 = vmatpush1.bf16.msra.mxu1 %v8100_v25  ;;  %v8147_v25 = vld [vmem:[#allocation8 + $0x23c] ss:$28 sps:$4 sm:$0xff]  }
 0x1e0   :  { %5244 = vmatprep.subr.bf16.mxu1 %v8108_v26  ;;  %v8142_v26 = vld [vmem:[#allocation8 + $0x3f0] ss:$28 sps:$4 sm:$0xff]  }
 0x1e2   :  { %2748 = vmatpush1.bf16.msra.mxu0 %v8061_v27  ;;  %v8150_v27 = vld [vmem:[#allocation8 + $0x42c] ss:$28 sps:$4 sm:$0xff]  }
 0x1e3   :  { %2749 = vmatprep.subr.bf16.mxu0 %v8069_v28  ;;  %5245 = vmatpush1.bf16.msra.mxu1 %v8106_v30 }
 0x1e4   :  { %5246 = vmatprep.subr.bf16.mxu1 %v8114_v31  ;;  %v8145_v31 = vld [vmem:[#allocation8 + $0x238] ss:$28 sps:$4 sm:$0xff]  }
 0x1e6   :  { %2750 = vmatpush1.bf16.msra.mxu0 %v8067_v32  ;;  %v8148_v32 = vld [vmem:[#allocation8 + $0x428] ss:$28 sps:$4 sm:$0xff]  }
 0x1e7   :  { %2751 = vmatprep.subr.bf16.mxu0 %v8075_v33  ;;  %5247 = vmatpush1.bf16.msra.mxu1 %v8112_v34 }
 0x1e8   :  { %5248 = vmatprep.subr.bf16.mxu1 %v8120_v35  ;;  %v8153_v35 = vld [vmem:[#allocation8 + $0x274] ss:$28 sps:$4 sm:$0xff]  }
 0x1ea   :  { %2752 = vmatpush1.bf16.msra.mxu0 %v8073_v37  ;;  %v8156_v37 = vld [vmem:[#allocation8 + $0x464] ss:$28 sps:$4 sm:$0xff]  }
 0x1eb   :  { %2753 = vmatprep.subr.bf16.mxu0 %v8081_v39  ;;  %5249 = vmatpush1.bf16.msra.mxu1 %v8118_v40 }
 0x1ec   :  { %5250 = vmatprep.subr.bf16.mxu1 %v8126_v41  ;;  %v8151_v41 = vld [vmem:[#allocation8 + $0x270] ss:$28 sps:$4 sm:$0xff]  }
 0x1ee   :  { %2754 = vmatpush1.bf16.msra.mxu0 %v8079_v42  ;;  %v8154_v42 = vld [vmem:[#allocation8 + $0x460] ss:$28 sps:$4 sm:$0xff]  }
 0x1ef   :  { %5384 = vmatprep.subr.bf16.mxu0 %v8087_v43  ;;  %5251 = vmatpush1.bf16.msra.mxu1 %v8124_v44  ;;  %v8159_v43 = vld [vmem:[#allocation8 + $0x2ac] ss:$28 sps:$4 sm:$0xff]  }
 0x1f0   :  { %5261 = vmatprep.subr.bf16.mxu1 %v8132_v45  ;;  %v8162_v45 = vld [vmem:[#allocation8 + $0x49c] ss:$28 sps:$4 sm:$0xff]  }
 0x1f1   :  { %2756 = vmatmul.mubr.bf16.vlgmr.msra.gmra.mrb[4].mxu0 %v8926_v29  ;;  %v512_v29 = vsub.s32 0, %v8957_v52 }
 0x1f2   :  { %5385 = vmatpush1.bf16.msra.mxu0 %v8085_v46 }
 0x1f3   :  { %5386 = vmatprep.subr.bf16.mxu0 %v8093_v47  ;;  %v513_v59 = vrot.slane %v8959_v54, %v512_v29  ;;  %v8157_v47 = vld [vmem:[#allocation8 + $0x2a8] ss:$28 sps:$4 sm:$0xff]  }
 0x1f6   :  { %5387 = vmatpush1.bf16.msra.mxu0 %v8091_v9  ;;  %v8160_v9 = vld [vmem:[#allocation8 + $0x498] ss:$28 sps:$4 sm:$0xff]  }
 0x1f7   :  { %5388 = vmatprep.subr.bf16.mxu0 %v8099_v48 }
 0x1fa   :  { %5389 = vmatpush1.bf16.msra.mxu0 %v8097_v36  ;;  %v8165_v36 = vld [vmem:[#allocation8 + $0x2e4] ss:$28 sps:$4 sm:$0xff]  }
 0x1fb   :  { %5390 = vmatprep.subr.bf16.mxu0 %v8105_v18 }
 0x1fe   :  { %5391 = vmatpush1.bf16.msra.mxu0 %v8103_v50 }
 0x1ff   :  { %5392 = vmatprep.subr.bf16.mxu0 %v8111_v53  ;;  %v8163_v53 = vld [vmem:[#allocation8 + $0x2e0] ss:$28 sps:$4 sm:$0xff]  }
 0x202   :  { %5393 = vmatpush1.bf16.msra.mxu0 %v8109_v10  ;;  %v8166_v10 = vld [vmem:[#allocation8 + $0x4d0] ss:$28 sps:$4 sm:$0xff]  }
 0x203   :  { %5394 = vmatprep.subr.bf16.mxu0 %v8117_v58  ;;  %v8171_v58 = vld [vmem:[#allocation8 + $0x31c] ss:$28 sps:$4 sm:$0xff]  }
 0x204   :  { %v2429_v62 = vpop.f32.mrb[0].mxu0 }
 0x205   :  { %v7476_v1 = vadd.f32 %v2429_v62, %v513_v59  ;;  %v2431_v2 = vpop.f32.mrb[1].mxu0  ;;  %v8169_v59 = vld [vmem:[#allocation8 + $0x318] ss:$28 sps:$4 sm:$0xff]   ;;  %v8180_v62 = vld [vmem:[#allocation8 + $0x544] ss:$28 sps:$4 sm:$0xff]  }
 0x206   :  { %v7478_v4 = vadd.f32 %v2431_v2, %v517_v61  ;;  %v2433_v5 = vpop.f32.mrb[2].mxu0  ;;  %5395 = vmatpush1.bf16.msra.mxu0 %v8115_v24  ;;  %v8174_v24 = vld [vmem:[#allocation8 + $0x50c] ss:$28 sps:$4 sm:$0xff]   ;;  %v8178_v2 = vld [vmem:[#allocation8 + $0x540] ss:$28 sps:$4 sm:$0xff]  }
 0x207   :  { %v7477_v6 = vadd.f32 %v7476_v1, %v8935_v55  ;;  %v2434_v7 = vpop.f32.mrb[3].mxu0  ;;  %5396 = vmatprep.subr.bf16.mxu0 %v8123_v60  ;;  %v8133_v55 = vld [vmem:[#allocation8 + $0x1c8] ss:$28 sps:$4 sm:$0xff]   ;;  %v8177_v60 = vld [vmem:[#allocation8 + $0x354] ss:$28 sps:$4 sm:$0xff]  }
 0x208   :  { %v7479_v51 = vadd.f32 %v7478_v4, %v8939_v57  ;;  %v524_v57 = vsub.s32 3, %v8957_v52  ;;  %v8172_v61 = vld [vmem:[#allocation8 + $0x508] ss:$28 sps:$4 sm:$0xff]   ;;  %v8186_v4 = vld [vmem:[#allocation8 + $0x57c] ss:$28 sps:$4 sm:$0xff]  }
 0x209   :  { %v2965_v8 = vmax.f32 %v7477_v6, 0.0  ;;  %v8183_v1 = vld [vmem:[#allocation8 + $0x38c] ss:$28 sps:$4 sm:$0xff]   ;;  %v8189_v6 = vld [vmem:[#allocation8 + $0x3c4] ss:$28 sps:$4 sm:$0xff]  }
 0x20a   :  { %v2966_v11 = vmax.f32 %v7479_v51, 0.0  ;;  %5397 = vmatpush1.bf16.msra.mxu0 %v8121_v63  ;;  %v525_v23 = vrot.slane %v8959_v54, %v524_v57  ;;  %v8175_v63 = vld [vmem:[#allocation8 + $0x350] ss:$28 sps:$4 sm:$0xff]   ;;  %v8181_v5 = vld [vmem:[#allocation8 + $0x388] ss:$28 sps:$4 sm:$0xff]  }
 0x20b   :  { %5398 = vmatprep.subr.bf16.mxu0 %v8129_v3  ;;  %v8973_v16 = vpack.c.bf16 %v2965_v8, %v2965_v8  ;;  %v520_v3 = vsub.s32 2, %v8957_v52  ;;  %v8184_v7 = vld [vmem:[#allocation8 + $0x578] ss:$28 sps:$4 sm:$0xff]   ;;  %v8187_v8 = vld [vmem:[#allocation8 + $0x3c0] ss:$28 sps:$4 sm:$0xff]  }
 0x20c   :  { %v8971_v13 = vpack.c.bf16 %v2966_v11, %v2966_v11  ;;  %v8192_v51 = vld [vmem:[#allocation8 + $0x5b4] ss:$28 sps:$4 sm:$0xff]   ;;  %v8195_v11 = vld [vmem:[#allocation8 + $0x3fc] ss:$28 sps:$4 sm:$0xff]  }
 0x20e   :  { %5252 = vmatprep.mubr.bf16.mxu1 %v8971_v13  ;;  %5399 = vmatpush1.bf16.msra.mxu0 %v8127_v12  ;;  %v8190_v12 = vld [vmem:[#allocation8 + $0x5b0] ss:$28 sps:$4 sm:$0xff]  }
 0x20f   :  { %5416 = vmatprep.mubr.bf16.mxu0 %v8971_v13  ;;  %5253 = vmatmul.mubr.bf16.vlgmr.msra.gmra.mrb[28].mxu1 %v8973_v16 }
 0x210   :  { %5262 = vmatpush1.bf16.msra.mxu1 %v8130_v14  ;;  %5400 = vmatprep.subr.bf16.mxu0 %v8135_v15  ;;  %v8198_v14 = vld [vmem:[#allocation8 + $0x5ec] ss:$28 sps:$4 sm:$0xff]   ;;  %v8193_v15 = vld [vmem:[#allocation8 + $0x3f8] ss:$28 sps:$4 sm:$0xff]  }
 0x211   :  { %5263 = vmatprep.subr.bf16.mxu1 %v8138_v17  ;;  %v8201_v17 = vld [vmem:[#allocation8 + $0x434] ss:$28 sps:$4 sm:$0xff]  }
 0x212   :  { %5401 = vmatpush1.bf16.msra.mxu0 %v8133_v55  ;;  %v8196_v55 = vld [vmem:[#allocation8 + $0x5e8] ss:$28 sps:$4 sm:$0xff]  }
 0x213   :  { %5402 = vmatprep.subr.bf16.mxu0 %v8141_v19  ;;  %v8204_v19 = vld [vmem:[#allocation8 + $0x624] ss:$28 sps:$4 sm:$0xff]  }
 0x214   :  { %5264 = vmatpush1.bf16.msra.mxu1 %v8136_v20  ;;  %v8199_v20 = vld [vmem:[#allocation8 + $0x430] ss:$28 sps:$4 sm:$0xff]  }
 0x215   :  { %v8982_v28 = vpop.f32.mrb[4].mxu1  ;;  %5265 = vmatprep.subr.bf16.mxu1 %v8144_v21  ;;  %v8207_v21 = vld [vmem:[#allocation8 + $0x46c] ss:$28 sps:$4 sm:$0xff]  }
 0x216   :  { %v2636_v30 = vpop.f32.mrb[5].mxu1  ;;  %5403 = vmatpush1.bf16.msra.mxu0 %v8139_v22  ;;  %v8202_v22 = vld [vmem:[#allocation8 + $0x620] ss:$28 sps:$4 sm:$0xff]  }
 0x217   :  { %v7481_v33 = vadd.f32 %v2636_v30, %v525_v23  ;;  %v2638_v34 = vpop.f32.mrb[6].mxu1  ;;  %5404 = vmatprep.subr.bf16.mxu0 %v8147_v25  ;;  %v8210_v23 = vld [vmem:[#allocation8 + $0x65c] ss:$28 sps:$4 sm:$0xff]   ;;  %v8205_v25 = vld [vmem:[#allocation8 + $0x468] ss:$28 sps:$4 sm:$0xff]  }
 0x218   :  { %v2639_v39 = vpop.f32.mrb[7].mxu1  ;;  %5266 = vmatpush1.bf16.msra.mxu1 %v8142_v26  ;;  %v8213_v26 = vld [vmem:[#allocation8 + $0x4a4] ss:$28 sps:$4 sm:$0xff]   ;;  %v8208_v30 = vld [vmem:[#allocation8 + $0x658] ss:$28 sps:$4 sm:$0xff]  }
 0x219   :  { %v2968_v40 = vmax.f32 %v7481_v33, 0.0  ;;  %5267 = vmatprep.subr.bf16.mxu1 %v8150_v27  ;;  %v8216_v33 = vld [vmem:[#allocation8 + $0x694] ss:$28 sps:$4 sm:$0xff]  }
 0x21a   :  { %5405 = vmatpush1.bf16.msra.mxu0 %v8145_v31 }
 0x21b   :  { %v8984_v44 = vpack.c.bf16 %v2968_v40, %v2968_v40  ;;  %5406 = vmatprep.subr.bf16.mxu0 %v8153_v35  ;;  %v8219_v40 = vld [vmem:[#allocation8 + $0x4dc] ss:$28 sps:$4 sm:$0xff]  }
 0x21c   :  { %5268 = vmatpush1.bf16.msra.mxu1 %v8148_v32  ;;  %v521_v32 = vrot.slane %v8959_v54, %v520_v3 }
 0x21d   :  { %5293 = vmatprep.mubr.bf16.mxu1 %v8984_v44  ;;  %5269 = vmatprep.subr.bf16.mxu1 %v8156_v37  ;;  %v8987_v46 = vpop.f32.mrb[8].mxu1  ;;  %v8211_v37 = vld [vmem:[#allocation8 + $0x4a0] ss:$28 sps:$4 sm:$0xff]  }
 0x21e   :  { %5407 = vmatpush1.bf16.msra.mxu0 %v8151_v41  ;;  %v8989_v48 = vpop.f32.mrb[9].mxu1  ;;  %v8214_v41 = vld [vmem:[#allocation8 + $0x690] ss:$28 sps:$4 sm:$0xff]  }
 0x21f   :  { %5408 = vmatprep.subr.bf16.mxu0 %v8159_v43  ;;  %v2802_v18 = vpop.f32.mrb[10].mxu1  ;;  %v8222_v43 = vld [vmem:[#allocation8 + $0x6cc] ss:$28 sps:$4 sm:$0xff]  }
 0x220   :  { %5270 = vmatpush1.bf16.msra.mxu1 %v8154_v42  ;;  %v2803_v50 = vpop.f32.mrb[11].mxu1  ;;  %v7480_v42 = vadd.f32 %v8982_v28, %v521_v32  ;;  %v8223_v18 = vld [vmem:[#allocation8 + $0x510] ss:$28 sps:$4 sm:$0xff]  }
 0x221   :  { %5271 = vmatprep.subr.bf16.mxu1 %v8162_v45  ;;  %v8217_v45 = vld [vmem:[#allocation8 + $0x4d8] ss:$28 sps:$4 sm:$0xff]   ;;  %v8228_v50 = vld [vmem:[#allocation8 + $0x54c] ss:$28 sps:$4 sm:$0xff]  }
 0x222   :  { %5409 = vmatpush1.bf16.msra.mxu0 %v8157_v47  ;;  %v8220_v47 = vld [vmem:[#allocation8 + $0x6c8] ss:$28 sps:$4 sm:$0xff]  }
 0x223   :  { %5410 = vmatprep.subr.bf16.mxu0 %v8165_v36  ;;  %v2967_v36 = vmax.f32 %v7480_v42, 0.0  ;;  %v8294_v32 = vld [vmem:[#allocation8 + $0x88c] ss:$28 sps:$4 sm:$0xff]   ;;  %v8306_v42 = vld [vmem:[#allocation8 + $0x8fc] ss:$28 sps:$4 sm:$0xff]  }
 0x224   :  { %5272 = vmatpush1.bf16.msra.mxu1 %v8160_v9  ;;  %v8225_v9 = vld [vmem:[#allocation8 + $0x514] ss:$28 sps:$4 sm:$0xff]  }
 0x225   :  { %5273 = vmatprep.subr.bf16.mxu1 %v8168_v49  ;;  %v8252_v49 = vld [vmem:[#allocation8 + $0x704] ss:$28 sps:$4 sm:$0xff]   ;;  %v9000_v28 = vpack.c.bf16 %v2967_v36, %v2967_v36 }
 0x226   :  { %5411 = vmatpush1.bf16.msra.mxu0 %v8163_v53  ;;  %v8250_v53 = vld [vmem:[#allocation8 + $0x700] ss:$28 sps:$4 sm:$0xff]  }
 0x227   :  { %5412 = vmatprep.subr.bf16.mxu0 %v8171_v58  ;;  %v8226_v58 = vld [vmem:[#allocation8 + $0x548] ss:$28 sps:$4 sm:$0xff]   ;;  %v8259_v36 = vld [vmem:[#allocation8 + $0x740] ss:$28 sps:$4 sm:$0xff]  }
 0x228   :  { %5274 = vmatpush1.bf16.msra.mxu1 %v8166_v10  ;;  %v8258_v10 = vld [vmem:[#allocation8 + $0x73c] ss:$28 sps:$4 sm:$0xff]  }
 0x229   :  { %5275 = vmatprep.subr.bf16.mxu1 %v8174_v24  ;;  %v8231_v24 = vld [vmem:[#allocation8 + $0x584] ss:$28 sps:$4 sm:$0xff]  }
 0x22a   :  { %5413 = vmatpush1.bf16.msra.mxu0 %v8169_v59  ;;  %v8256_v59 = vld [vmem:[#allocation8 + $0x738] ss:$28 sps:$4 sm:$0xff]  }
 0x22b   :  { %5414 = vmatprep.subr.bf16.mxu0 %v8177_v60  ;;  %v8264_v60 = vld [vmem:[#allocation8 + $0x774] ss:$28 sps:$4 sm:$0xff]  }
 0x22c   :  { %5276 = vmatpush1.bf16.msra.mxu1 %v8172_v61  ;;  %v8229_v61 = vld [vmem:[#allocation8 + $0x580] ss:$28 sps:$4 sm:$0xff]  }
 0x22d   :  { %5277 = vmatprep.subr.bf16.mxu1 %v8180_v62  ;;  %v8234_v62 = vld [vmem:[#allocation8 + $0x5bc] ss:$28 sps:$4 sm:$0xff]  }
 0x22e   :  { %5415 = vmatpush1.bf16.msra.mxu0 %v8175_v63  ;;  %v8262_v63 = vld [vmem:[#allocation8 + $0x770] ss:$28 sps:$4 sm:$0xff]  }
 0x22f   :  { %5425 = vmatprep.subr.bf16.mxu0 %v8183_v1  ;;  %v536_v1 = vsub.s32 6, %v8957_v52 }
 0x230   :  { %5278 = vmatpush1.bf16.msra.mxu1 %v8178_v2  ;;  %v8270_v2 = vld [vmem:[#allocation8 + $0x7ac] ss:$28 sps:$4 sm:$0xff]  }
 0x231   :  { %5417 = vmatmul.mubr.bf16.vlgmr.msra.gmra.mrb[8].mxu0 %v8973_v16  ;;  %5279 = vmatprep.subr.bf16.mxu1 %v8186_v4  ;;  %v8232_v4 = vld [vmem:[#allocation8 + $0x5b8] ss:$28 sps:$4 sm:$0xff]  }
 0x232   :  { %5426 = vmatpush1.bf16.msra.mxu0 %v8181_v5  ;;  %5457 = vmatprep.mubr.bf16.mxu0 %v8984_v44  ;;  %v8237_v5 = vld [vmem:[#allocation8 + $0x5f4] ss:$28 sps:$4 sm:$0xff]  }
 0x233   :  { %5427 = vmatprep.subr.bf16.mxu0 %v8189_v6  ;;  %v8268_v6 = vld [vmem:[#allocation8 + $0x7a8] ss:$28 sps:$4 sm:$0xff]  }
 0x234   :  { %5280 = vmatpush1.bf16.msra.mxu1 %v8184_v7  ;;  %v537_v7 = vrot.slane %v8959_v54, %v536_v1 }
 0x235   :  { %5281 = vmatprep.subr.bf16.mxu1 %v8192_v51  ;;  %v8276_v51 = vld [vmem:[#allocation8 + $0x7e4] ss:$28 sps:$4 sm:$0xff]  }
 0x236   :  { %5428 = vmatpush1.bf16.msra.mxu0 %v8187_v8  ;;  %v8235_v8 = vld [vmem:[#allocation8 + $0x5f0] ss:$28 sps:$4 sm:$0xff]  }
 0x237   :  { %5429 = vmatprep.subr.bf16.mxu0 %v8195_v11  ;;  %v8240_v11 = vld [vmem:[#allocation8 + $0x62c] ss:$28 sps:$4 sm:$0xff]  }
 0x238   :  { %5282 = vmatpush1.bf16.msra.mxu1 %v8190_v12  ;;  %v8274_v12 = vld [vmem:[#allocation8 + $0x7e0] ss:$28 sps:$4 sm:$0xff]  }
 0x239   :  { %5283 = vmatprep.subr.bf16.mxu1 %v8198_v14 }
 0x23a   :  { %5430 = vmatpush1.bf16.msra.mxu0 %v8193_v15 }
 0x23b   :  { %5431 = vmatprep.subr.bf16.mxu0 %v8201_v17  ;;  %v8282_v17 = vld [vmem:[#allocation8 + $0x81c] ss:$28 sps:$4 sm:$0xff]  }
 0x23c   :  { %5284 = vmatpush1.bf16.msra.mxu1 %v8196_v55  ;;  %v8238_v55 = vld [vmem:[#allocation8 + $0x628] ss:$28 sps:$4 sm:$0xff]  }
 0x23d   :  { %5285 = vmatprep.subr.bf16.mxu1 %v8204_v19  ;;  %v7264_v27 = vpop.f32.mrb[12].mxu1 }
 0x23e   :  { %5432 = vmatpush1.bf16.msra.mxu0 %v8199_v20  ;;  %v7265_v31 = vpop.f32.mrb[13].mxu1  ;;  %v8243_v20 = vld [vmem:[#allocation8 + $0x664] ss:$28 sps:$4 sm:$0xff]  }
 0x23f   :  { %5433 = vmatprep.subr.bf16.mxu0 %v8207_v21  ;;  %v8997_v34 = vadd.f32 %v7265_v31, %v7264_v27  ;;  %v7267_v35 = vpop.f32.mrb[14].mxu1  ;;  %v8241_v27 = vld [vmem:[#allocation8 + $0x660] ss:$28 sps:$4 sm:$0xff]   ;;  %v8286_v31 = vld [vmem:[#allocation8 + $0x850] ss:$28 sps:$4 sm:$0xff]  }
 0x240   :  { %5286 = vmatpush1.bf16.msra.mxu1 %v8202_v22  ;;  %v7268_v39 = vpop.f32.mrb[15].mxu1  ;;  %v8292_v35 = vld [vmem:[#allocation8 + $0x888] ss:$28 sps:$4 sm:$0xff]  }
 0x241   :  { %5287 = vmatprep.subr.bf16.mxu1 %v8210_v23  ;;  %v2840_v14 = vadd.f32 %v8997_v34, %v537_v7  ;;  %v8280_v23 = vld [vmem:[#allocation8 + $0x818] ss:$28 sps:$4 sm:$0xff]   ;;  %v8247_v39 = vld [vmem:[#allocation8 + $0x6d0] ss:$28 sps:$4 sm:$0xff]   ;;  %v8285_v7 = vld [vmem:[#allocation8 + $0x824] ss:$28 sps:$4 sm:$0xff]  }
 0x242   :  { %5434 = vmatpush1.bf16.msra.mxu0 %v8205_v25  ;;  %v8249_v34 = vld [vmem:[#allocation8 + $0x6d4] ss:$28 sps:$4 sm:$0xff]  }
 0x243   :  { %5435 = vmatprep.subr.bf16.mxu0 %v8213_v26  ;;  %v8288_v26 = vld [vmem:[#allocation8 + $0x854] ss:$28 sps:$4 sm:$0xff]  }
 0x244   :  { %5288 = vmatpush1.bf16.msra.mxu1 %v8208_v30  ;;  %v8246_v30 = vld [vmem:[#allocation8 + $0x69c] ss:$28 sps:$4 sm:$0xff]  }
 0x245   :  { %5289 = vmatprep.subr.bf16.mxu1 %v8216_v33  ;;  %v8244_v33 = vld [vmem:[#allocation8 + $0x698] ss:$28 sps:$4 sm:$0xff]  }
 0x246   :  { %5436 = vmatpush1.bf16.msra.mxu0 %v8211_v37  ;;  %v8300_v37 = vld [vmem:[#allocation8 + $0x8c4] ss:$28 sps:$4 sm:$0xff]  }
 0x247   :  { %5437 = vmatprep.subr.bf16.mxu0 %v8219_v40  ;;  %v8255_v40 = vld [vmem:[#allocation8 + $0x70c] ss:$28 sps:$4 sm:$0xff]  }
 0x248   :  { %5290 = vmatpush1.bf16.msra.mxu1 %v8214_v41  ;;  %v8298_v41 = vld [vmem:[#allocation8 + $0x8c0] ss:$28 sps:$4 sm:$0xff]  }
 0x249   :  { %5291 = vmatprep.subr.bf16.mxu1 %v8222_v43  ;;  %v8253_v43 = vld [vmem:[#allocation8 + $0x708] ss:$28 sps:$4 sm:$0xff]  }
 0x24a   :  { %5438 = vmatpush1.bf16.msra.mxu0 %v8217_v45  ;;  %v8261_v45 = vld [vmem:[#allocation8 + $0x744] ss:$28 sps:$4 sm:$0xff]  }
 0x24b   :  { %5439 = vmatprep.subr.bf16.mxu0 %v8225_v9  ;;  %v8312_v9 = vld [vmem:[#allocation8 + $0x934] ss:$28 sps:$4 sm:$0xff]  }
 0x24c   :  { %5292 = vmatpush1.bf16.msra.mxu1 %v8220_v47  ;;  %v8304_v47 = vld [vmem:[#allocation8 + $0x8f8] ss:$28 sps:$4 sm:$0xff]  }
 0x24d   :  { %5302 = vmatprep.subr.bf16.mxu1 %v8252_v49  ;;  %v8267_v49 = vld [vmem:[#allocation8 + $0x77c] ss:$28 sps:$4 sm:$0xff]  }
 0x24e   :  { %5440 = vmatpush1.bf16.msra.mxu0 %v8223_v18  ;;  %v8310_v18 = vld [vmem:[#allocation8 + $0x930] ss:$28 sps:$4 sm:$0xff]  }
 0x24f   :  { %5294 = vmatmul.mubr.bf16.vlgmr.msra.gmra.mrb[28].mxu1 %v9000_v28  ;;  %5441 = vmatprep.subr.bf16.mxu0 %v8228_v50  ;;  %v8318_v50 = vld [vmem:[#allocation8 + $0x96c] ss:$28 sps:$4 sm:$0xff]  }
 0x250   :  { %5303 = vmatpush1.bf16.msra.mxu1 %v8250_v53  ;;  %v8265_v53 = vld [vmem:[#allocation8 + $0x778] ss:$28 sps:$4 sm:$0xff]  }
 0x251   :  { %5304 = vmatprep.subr.bf16.mxu1 %v8258_v10  ;;  %v8273_v10 = vld [vmem:[#allocation8 + $0x7b4] ss:$28 sps:$4 sm:$0xff]  }
 0x252   :  { %5442 = vmatpush1.bf16.msra.mxu0 %v8226_v58  ;;  %v8316_v58 = vld [vmem:[#allocation8 + $0x968] ss:$28 sps:$4 sm:$0xff]  }
 0x253   :  { %5443 = vmatprep.subr.bf16.mxu0 %v8231_v24  ;;  %v8324_v24 = vld [vmem:[#allocation8 + $0x9a4] ss:$28 sps:$4 sm:$0xff]  }
 0x254   :  { %5305 = vmatpush1.bf16.msra.mxu1 %v8256_v59  ;;  %v8271_v59 = vld [vmem:[#allocation8 + $0x7b0] ss:$28 sps:$4 sm:$0xff]  }
 0x255   :  { %5306 = vmatprep.subr.bf16.mxu1 %v8264_v60  ;;  %v8279_v60 = vld [vmem:[#allocation8 + $0x7ec] ss:$28 sps:$4 sm:$0xff]  }
 0x256   :  { %5444 = vmatpush1.bf16.msra.mxu0 %v8229_v61  ;;  %v8322_v61 = vld [vmem:[#allocation8 + $0x9a0] ss:$28 sps:$4 sm:$0xff]  }
 0x257   :  { %5445 = vmatprep.subr.bf16.mxu0 %v8234_v62 }
 0x258   :  { %5307 = vmatpush1.bf16.msra.mxu1 %v8262_v63  ;;  %v8330_v63 = vld [vmem:[#allocation8 + $0x9dc] ss:$28 sps:$4 sm:$0xff]  }
 0x259   :  { %5308 = vmatprep.subr.bf16.mxu1 %v8270_v2 }
 0x25a   :  { %5446 = vmatpush1.bf16.msra.mxu0 %v8232_v4  ;;  %v8277_v4 = vld [vmem:[#allocation8 + $0x7e8] ss:$28 sps:$4 sm:$0xff]  }
 0x25b   :  { %5447 = vmatprep.subr.bf16.mxu0 %v8237_v5 }
 0x25c   :  { %5309 = vmatpush1.bf16.msra.mxu1 %v8268_v6 }
 0x25d   :  { %v7286_v15 = vpop.f32.mrb[16].mxu1  ;;  %5310 = vmatprep.subr.bf16.mxu1 %v8276_v51 }
 0x25e   :  { %5448 = vmatpush1.bf16.msra.mxu0 %v8235_v8  ;;  %v7287_v19 = vpop.f32.mrb[17].mxu1  ;;  %v8328_v8 = vld [vmem:[#allocation8 + $0x9d8] ss:$28 sps:$4 sm:$0xff]  }
 0x25f   :  { %5449 = vmatprep.subr.bf16.mxu0 %v8240_v11  ;;  %v7288_v21 = vadd.f32 %v7287_v19, %v7286_v15  ;;  %v7289_v54 = vpop.f32.mrb[18].mxu1  ;;  %v8291_v15 = vld [vmem:[#allocation8 + $0x85c] ss:$28 sps:$4 sm:$0xff]   ;;  %v8342_v19 = vld [vmem:[#allocation8 + $0xa4c] ss:$28 sps:$4 sm:$0xff]  }
 0x260   :  { %v7290_v22 = vpop.f32.mrb[19].mxu1  ;;  %5311 = vmatpush1.bf16.msra.mxu1 %v8274_v12  ;;  %v8336_v12 = vld [vmem:[#allocation8 + $0xa14] ss:$28 sps:$4 sm:$0xff]  }
 0x261   :  { %v9008_v25 = vadd.f32 %v7288_v21, %v2840_v14  ;;  %5312 = vmatprep.subr.bf16.mxu1 %v8282_v17  ;;  %v8283_v14 = vld [vmem:[#allocation8 + $0x820] ss:$28 sps:$4 sm:$0xff]   ;;  %v8334_v17 = vld [vmem:[#allocation8 + $0xa10] ss:$28 sps:$4 sm:$0xff]   ;;  %v8289_v21 = vld [vmem:[#allocation8 + $0x858] ss:$28 sps:$4 sm:$0xff]  }
 0x262   :  { %5450 = vmatpush1.bf16.msra.mxu0 %v8238_v55  ;;  %v8297_v22 = vld [vmem:[#allocation8 + $0x894] ss:$28 sps:$4 sm:$0xff]  }
 0x263   :  { %5451 = vmatprep.subr.bf16.mxu0 %v8243_v20 }
 0x264   :  { %5313 = vmatpush1.bf16.msra.mxu1 %v8280_v23 }
 0x265   :  { %5314 = vmatprep.subr.bf16.mxu1 %v8288_v26 }
 0x266   :  { %5452 = vmatpush1.bf16.msra.mxu0 %v8241_v27  ;;  %v8348_v27 = vld [vmem:[#allocation8 + $0xa84] ss:$28 sps:$4 sm:$0xff]  }
 0x267   :  { %5453 = vmatprep.subr.bf16.mxu0 %v8246_v30  ;;  %v8295_v30 = vld [vmem:[#allocation8 + $0x890] ss:$28 sps:$4 sm:$0xff]  }
 0x268   :  { %5315 = vmatpush1.bf16.msra.mxu1 %v8286_v31  ;;  %v8303_v31 = vld [vmem:[#allocation8 + $0x8cc] ss:$28 sps:$4 sm:$0xff]  }
 0x269   :  { %5316 = vmatprep.subr.bf16.mxu1 %v8294_v32  ;;  %v8301_v32 = vld [vmem:[#allocation8 + $0x8c8] ss:$28 sps:$4 sm:$0xff]  }
 0x26a   :  { %5454 = vmatpush1.bf16.msra.mxu0 %v8244_v33  ;;  %v8309_v33 = vld [vmem:[#allocation8 + $0x904] ss:$28 sps:$4 sm:$0xff]  }
 0x26b   :  { %5455 = vmatprep.subr.bf16.mxu0 %v8249_v34  ;;  %v8307_v34 = vld [vmem:[#allocation8 + $0x900] ss:$28 sps:$4 sm:$0xff]  }
 0x26c   :  { %5317 = vmatpush1.bf16.msra.mxu1 %v8292_v35  ;;  %v8315_v35 = vld [vmem:[#allocation8 + $0x93c] ss:$28 sps:$4 sm:$0xff]  }
 0x26d   :  { %5318 = vmatprep.subr.bf16.mxu1 %v8300_v37  ;;  %v8313_v37 = vld [vmem:[#allocation8 + $0x938] ss:$28 sps:$4 sm:$0xff]  }
 0x26e   :  { %5456 = vmatpush1.bf16.msra.mxu0 %v8247_v39  ;;  %v8321_v39 = vld [vmem:[#allocation8 + $0x974] ss:$28 sps:$4 sm:$0xff]  }
 0x26f   :  { %5466 = vmatprep.subr.bf16.mxu0 %v8255_v40  ;;  %v8319_v40 = vld [vmem:[#allocation8 + $0x970] ss:$28 sps:$4 sm:$0xff]  }
 0x270   :  { %5319 = vmatpush1.bf16.msra.mxu1 %v8298_v41  ;;  %v8327_v41 = vld [vmem:[#allocation8 + $0x9ac] ss:$28 sps:$4 sm:$0xff]  }
 0x271   :  { %5458 = vmatmul.mubr.bf16.vlgmr.msra.gmra.mrb[8].mxu0 %v9000_v28  ;;  %5320 = vmatprep.subr.bf16.mxu1 %v8306_v42  ;;  %v8325_v42 = vld [vmem:[#allocation8 + $0x9a8] ss:$28 sps:$4 sm:$0xff]  }
 0x272   :  { %5467 = vmatpush1.bf16.msra.mxu0 %v8253_v43  ;;  %v8333_v43 = vld [vmem:[#allocation8 + $0x9e4] ss:$28 sps:$4 sm:$0xff]  }
 0x273   :  { %5468 = vmatprep.subr.bf16.mxu0 %v8261_v45  ;;  %v8331_v45 = vld [vmem:[#allocation8 + $0x9e0] ss:$28 sps:$4 sm:$0xff]  }
 0x274   :  { %5321 = vmatpush1.bf16.msra.mxu1 %v8304_v47  ;;  %v8339_v47 = vld [vmem:[#allocation8 + $0xa1c] ss:$28 sps:$4 sm:$0xff]  }
 0x275   :  { %5322 = vmatprep.subr.bf16.mxu1 %v8312_v9  ;;  %v8337_v9 = vld [vmem:[#allocation8 + $0xa18] ss:$28 sps:$4 sm:$0xff]  }
 0x276   :  { %5469 = vmatpush1.bf16.msra.mxu0 %v8259_v36  ;;  %v8345_v36 = vld [vmem:[#allocation8 + $0xa54] ss:$28 sps:$4 sm:$0xff]  }
 0x277   :  { %5470 = vmatprep.subr.bf16.mxu0 %v8267_v49  ;;  %v8343_v49 = vld [vmem:[#allocation8 + $0xa50] ss:$28 sps:$4 sm:$0xff]  }
 0x278   :  { %5323 = vmatpush1.bf16.msra.mxu1 %v8310_v18  ;;  %v8351_v18 = vld [vmem:[#allocation8 + $0xa8c] ss:$28 sps:$4 sm:$0xff]  }
 0x279   :  { %5324 = vmatprep.subr.bf16.mxu1 %v8318_v50  ;;  %v528_v50 = vsub.s32 4, %v8957_v52 }
 0x27a   :  { %5471 = vmatpush1.bf16.msra.mxu0 %v8265_v53  ;;  %v532_v53 = vsub.s32 5, %v8957_v52  ;;  %v7196_v52 = vld [vmem:[#allocation11] ss:$0 sm:$0xff] }
 0x27b   :  { %5472 = vmatprep.subr.bf16.mxu0 %v8273_v10  ;;  %v8612_v10 = vld [vmem:[#allocation7] sm:$0x7f] }
 0x27c   :  { %5325 = vmatpush1.bf16.msra.mxu1 %v8316_v58  ;;  %v529_v58 = vrot.slane %v8612_v10, %v528_v50 }
 0x27d   :  { %v7308_v62 = vpop.f32.mrb[20].mxu1  ;;  %5326 = vmatprep.subr.bf16.mxu1 %v8324_v24  ;;  %v533_v24 = vrot.slane %v8612_v10, %v532_v53  ;;  %v8395_v10 = vld [vmem:[#allocation8 + $0x19c] ss:$28 sps:$4 sm:$0xff]  }
 0x27e   :  { %v7309_v2 = vpop.f32.mrb[21].mxu1  ;;  %5473 = vmatpush1.bf16.msra.mxu0 %v8271_v59 }
 0x27f   :  { %v7310_v5 = vadd.f32 %v7309_v2, %v7308_v62  ;;  %v7311_v6 = vpop.f32.mrb[22].mxu1  ;;  %5474 = vmatprep.subr.bf16.mxu0 %v8279_v60 }
 0x280   :  { %v7312_v51 = vpop.f32.mrb[23].mxu1  ;;  %5327 = vmatpush1.bf16.msra.mxu1 %v8322_v61 }
 0x281   :  { %v2920_v11 = vadd.f32 %v7310_v5, %v9008_v25  ;;  %5328 = vmatprep.subr.bf16.mxu1 %v8330_v63  ;;  %v8340_v25 = vld [vmem:[#allocation8 + $0xa48] ss:$28 sps:$4 sm:$0xff]  }
 0x282   :  { %5475 = vmatpush1.bf16.msra.mxu0 %v8277_v4 }
 0x283   :  { %5476 = vmatprep.subr.bf16.mxu0 %v8285_v7 }
 0x284   :  { %5329 = vmatpush1.bf16.msra.mxu1 %v8328_v8  ;;  %v8346_v8 = vld [vmem:[#allocation8 + $0xa80] ss:$28 sps:$4 sm:$0xff]  }
 0x285   :  { %v2959_v55 = vpop.f32.mrb[24].mxu1  ;;  %5330 = vmatprep.subr.bf16.mxu1 %v8336_v12 }
 0x286   :  { %v9012_v20 = vadd.f32 %v2959_v55, %v2920_v11  ;;  %5477 = vmatpush1.bf16.msra.mxu0 %v8283_v14  ;;  %v7458_v54 = vpop.f32.mrb[25].mxu1  ;;  %v8349_v11 = vld [vmem:[#allocation8 + $0xa88] ss:$28 sps:$4 sm:$0xff]   ;;  %v8354_v14 = vld [vmem:[#allocation8 + $0xabc] ss:$28 sps:$4 sm:$0xff]  }
 0x287   :  { %5478 = vmatprep.subr.bf16.mxu0 %v8291_v15  ;;  %v2962_v23 = vpop.f32.mrb[26].mxu1  ;;  %v8357_v15 = vld [vmem:[#allocation8 + $0xac4] ss:$28 sps:$4 sm:$0xff]   ;;  %v8361_v55 = vld [vmem:[#allocation8 + $0x1d8] ss:$28 sps:$4 sm:$0xff]  }
 0x288   :  { %5331 = vmatpush1.bf16.msra.mxu1 %v8334_v17  ;;  %v7459_v26 = vpop.f32.mrb[27].mxu1  ;;  %v8360_v17 = vld [vmem:[#allocation8 + $0x14] ss:$28 sps:$4 sm:$0xff]   ;;  %v8365_v23 = vld [vmem:[#allocation8 + $0x4c] ss:$28 sps:$4 sm:$0xff]  }
 0x289   :  { %5332 = vmatprep.subr.bf16.mxu1 %v8342_v19  ;;  %v2971_v19 = vmax.f32 %v9012_v20, 0.0  ;;  %v8362_v54 = vld [vmem:[#allocation8 + $0x18] ss:$28 sps:$4 sm:$0xff]   ;;  %v8363_v26 = vld [vmem:[#allocation8 + $0x48] ss:$28 sps:$4 sm:$0xff]  }
 0x28a   :  { %5479 = vmatpush1.bf16.msra.mxu0 %v8289_v21  ;;  %v8358_v21 = vld [vmem:[#allocation8 + $0x10] ss:$28 sps:$4 sm:$0xff]   ;;  %v8370_v20 = vld [vmem:[#allocation8 + $0x84] ss:$28 sps:$4 sm:$0xff]  }
 0x28b   :  { %5480 = vmatprep.subr.bf16.mxu0 %v8297_v22  ;;  %v9033_v22 = vpack.c.bf16 %v2971_v19, %v2971_v19  ;;  %v8421_v19 = vld [vmem:[#allocation8 + $0x638] ss:$28 sps:$4 sm:$0xff]  }
 0x28c   :  { %5333 = vmatpush1.bf16.msra.mxu1 %v8340_v25  ;;  %v8366_v25 = vld [vmem:[#allocation8 + $0x210] ss:$28 sps:$4 sm:$0xff]  }
 0x28d   :  { %5343 = vmatprep.subr.bf16.mxu1 %v8348_v27  ;;  %v8367_v27 = vld [vmem:[#allocation8 + $0x50] ss:$28 sps:$4 sm:$0xff]  }
 0x28e   :  { %5481 = vmatpush1.bf16.msra.mxu0 %v8295_v30  ;;  %v8371_v30 = vld [vmem:[#allocation8 + $0x248] ss:$28 sps:$4 sm:$0xff]  }
 0x28f   :  { %5482 = vmatprep.subr.bf16.mxu0 %v8303_v31  ;;  %v8368_v31 = vld [vmem:[#allocation8 + $0x80] ss:$28 sps:$4 sm:$0xff]  }
 0x292   :  { %5483 = vmatpush1.bf16.msra.mxu0 %v8301_v32  ;;  %v8372_v32 = vld [vmem:[#allocation8 + $0x88] ss:$28 sps:$4 sm:$0xff]  }
 0x293   :  { %5484 = vmatprep.subr.bf16.mxu0 %v8309_v33  ;;  %v8375_v33 = vld [vmem:[#allocation8 + $0xbc] ss:$28 sps:$4 sm:$0xff]  }
 0x296   :  { %5485 = vmatpush1.bf16.msra.mxu0 %v8307_v34  ;;  %v8376_v34 = vld [vmem:[#allocation8 + $0x280] ss:$28 sps:$4 sm:$0xff]  }
 0x297   :  { %5486 = vmatprep.subr.bf16.mxu0 %v8315_v35  ;;  %v8373_v35 = vld [vmem:[#allocation8 + $0xb8] ss:$28 sps:$4 sm:$0xff]  }
 0x29a   :  { %5487 = vmatpush1.bf16.msra.mxu0 %v8313_v37  ;;  %v8377_v37 = vld [vmem:[#allocation8 + $0xc0] ss:$28 sps:$4 sm:$0xff]  }
 0x29b   :  { %5488 = vmatprep.subr.bf16.mxu0 %v8321_v39  ;;  %v8380_v39 = vld [vmem:[#allocation8 + $0xf4] ss:$28 sps:$4 sm:$0xff]  }
 0x29e   :  { %5489 = vmatpush1.bf16.msra.mxu0 %v8319_v40  ;;  %v8378_v40 = vld [vmem:[#allocation8 + $0xf0] ss:$28 sps:$4 sm:$0xff]  }
 0x29f   :  { %5490 = vmatprep.subr.bf16.mxu0 %v8327_v41  ;;  %v8382_v41 = vld [vmem:[#allocation8 + $0xf8] ss:$28 sps:$4 sm:$0xff]  }
 0x2a2   :  { %5491 = vmatpush1.bf16.msra.mxu0 %v8325_v42  ;;  %v8385_v42 = vld [vmem:[#allocation8 + $0x12c] ss:$28 sps:$4 sm:$0xff]  }
 0x2a3   :  { %5492 = vmatprep.subr.bf16.mxu0 %v8333_v43  ;;  %v8386_v43 = vld [vmem:[#allocation8 + $0x2f0] ss:$28 sps:$4 sm:$0xff]  }
 0x2a6   :  { %5493 = vmatpush1.bf16.msra.mxu0 %v8331_v45  ;;  %v8383_v45 = vld [vmem:[#allocation8 + $0x128] ss:$28 sps:$4 sm:$0xff]  }
 0x2a7   :  { %5494 = vmatprep.subr.bf16.mxu0 %v8339_v47  ;;  %v8387_v47 = vld [vmem:[#allocation8 + $0x130] ss:$28 sps:$4 sm:$0xff]  }
 0x2aa   :  { %5495 = vmatpush1.bf16.msra.mxu0 %v8337_v9  ;;  %v8390_v9 = vld [vmem:[#allocation8 + $0x164] ss:$28 sps:$4 sm:$0xff]  }
 0x2ab   :  { %5496 = vmatprep.subr.bf16.mxu0 %v8345_v36  ;;  %v8391_v36 = vld [vmem:[#allocation8 + $0x328] ss:$28 sps:$4 sm:$0xff]  }
 0x2ae   :  { %5497 = vmatpush1.bf16.msra.mxu0 %v8343_v49  ;;  %v8388_v49 = vld [vmem:[#allocation8 + $0x160] ss:$28 sps:$4 sm:$0xff]  }
 0x2af   :  { %5507 = vmatprep.subr.bf16.mxu0 %v8351_v18  ;;  %v8392_v18 = vld [vmem:[#allocation8 + $0x168] ss:$28 sps:$4 sm:$0xff]  }
 0x2c4   :  { %v2757_v59 = vpop.f32.mrb[4].mxu0 }
 0x2c5   :  { %v7482_v60 = vadd.f32 %v2757_v59, %v529_v58  ;;  %v2759_v61 = vpop.f32.mrb[5].mxu0  ;;  %v8396_v58 = vld [vmem:[#allocation8 + $0x360] ss:$28 sps:$4 sm:$0xff]  }
 0x2c6   :  { %v7484_v62 = vadd.f32 %v2759_v61, %v533_v24  ;;  %v2761_v63 = vpop.f32.mrb[6].mxu0  ;;  %v8393_v24 = vld [vmem:[#allocation8 + $0x198] ss:$28 sps:$4 sm:$0xff]   ;;  %v8397_v59 = vld [vmem:[#allocation8 + $0x1a0] ss:$28 sps:$4 sm:$0xff]  }
 0x2c7   :  { %v7483_v2 = vadd.f32 %v7482_v60, %v8987_v46  ;;  %v2762_v4 = vpop.f32.mrb[7].mxu0  ;;  %v8352_v46 = vld [vmem:[#allocation8 + $0xab8] ss:$28 sps:$4 sm:$0xff]  }
 0x2c8   :  { %v7485_v5 = vadd.f32 %v7484_v62, %v8989_v48  ;;  %v8355_v48 = vld [vmem:[#allocation8 + $0xac0] ss:$28 sps:$4 sm:$0xff]   ;;  %v8400_v60 = vld [vmem:[#allocation8 + $0x1d4] ss:$28 sps:$4 sm:$0xff]  }
 0x2c9   :  { %v2969_v6 = vmax.f32 %v7483_v2, 0.0  ;;  %v8401_v61 = vld [vmem:[#allocation8 + $0x558] ss:$28 sps:$4 sm:$0xff]   ;;  %v8398_v62 = vld [vmem:[#allocation8 + $0x1d0] ss:$28 sps:$4 sm:$0xff]  }
 0x2ca   :  { %v2970_v7 = vmax.f32 %v7485_v5, 0.0  ;;  %v8402_v63 = vld [vmem:[#allocation8 + $0x398] ss:$28 sps:$4 sm:$0xff]   ;;  %v8405_v2 = vld [vmem:[#allocation8 + $0x20c] ss:$28 sps:$4 sm:$0xff]  }
 0x2cb   :  { %v9024_v12 = vpack.c.bf16 %v2969_v6, %v2969_v6  ;;  %v8406_v4 = vld [vmem:[#allocation8 + $0x590] ss:$28 sps:$4 sm:$0xff]   ;;  %v8403_v5 = vld [vmem:[#allocation8 + $0x208] ss:$28 sps:$4 sm:$0xff]  }
 0x2cc   :  { %v9022_v51 = vpack.c.bf16 %v2970_v7, %v2970_v7  ;;  %v8407_v6 = vld [vmem:[#allocation8 + $0x3d0] ss:$28 sps:$4 sm:$0xff]   ;;  %v8410_v7 = vld [vmem:[#allocation8 + $0x244] ss:$28 sps:$4 sm:$0xff]  }
 0x2ce   :  { %5334 = vmatprep.mubr.bf16.mxu1 %v9022_v51  ;;  %5498 = vmatprep.mubr.bf16.mxu0 %v9022_v51 }
 0x2cf   :  { %5335 = vmatmul.mubr.bf16.vlgmr.msra.gmra.mrb[28].mxu1 %v9024_v12  ;;  %5499 = vmatmul.mubr.bf16.vlgmr.msra.gmra.mrb[8].mxu0 %v9024_v12 }
 0x2d0   :  { %5344 = vmatpush1.bf16.msra.mxu1 %v8346_v8  ;;  %5508 = vmatpush1.bf16.msra.mxu0 %v8349_v11  ;;  %v8411_v8 = vld [vmem:[#allocation8 + $0x5c8] ss:$28 sps:$4 sm:$0xff]   ;;  %v8408_v11 = vld [vmem:[#allocation8 + $0x240] ss:$28 sps:$4 sm:$0xff]  }
 0x2d1   :  { %5345 = vmatprep.subr.bf16.mxu1 %v8354_v14  ;;  %5509 = vmatprep.subr.bf16.mxu0 %v8357_v15  ;;  %v8412_v14 = vld [vmem:[#allocation8 + $0x408] ss:$28 sps:$4 sm:$0xff]   ;;  %v8415_v15 = vld [vmem:[#allocation8 + $0x27c] ss:$28 sps:$4 sm:$0xff]  }
 0x2d2   :  { %5375 = vmatprep.mubr.bf16.mxu1 %v8785_v0  ;;  %5539 = vmatprep.mubr.bf16.mxu0 %v8785_v0 }
 0x2d4   :  { %5346 = vmatpush1.bf16.msra.mxu1 %v8352_v46  ;;  %5510 = vmatpush1.bf16.msra.mxu0 %v8355_v48  ;;  %v8416_v46 = vld [vmem:[#allocation8 + $0x600] ss:$28 sps:$4 sm:$0xff]   ;;  %v8413_v48 = vld [vmem:[#allocation8 + $0x278] ss:$28 sps:$4 sm:$0xff]  }
 0x2d5   :  { %5548 = vmatprep.subr.bf16.mxu1 %v8360_v17  ;;  %7316 = vmatprep.subr.bf16.mxu0 %v8361_v55  ;;  %v8417_v17 = vld [vmem:[#allocation8 + $0x440] ss:$28 sps:$4 sm:$0xff]   ;;  %v8420_v55 = vld [vmem:[#allocation8 + $0x2b4] ss:$28 sps:$4 sm:$0xff]  }
 0x2db   :  { %7192 = vmatmul.mubr.msk.bf16.vlgmr.msra.gmra.mrb[28].mxu1 %vm5216_vm2, %v9033_v22  ;;  %7193 = vmatmul.mubr.msk.bf16.vlgmr.msra.gmra.mrb[8].mxu0 %vm5216_vm2, %v9033_v22 }
 0x2dc   :  { %5549 = vmatpush1.bf16.msra.mxu1 %v8358_v21  ;;  %7317 = vmatpush3.bf16.msra.mxu0 %v8362_v54  ;;  %v8418_v21 = vld [vmem:[#allocation8 + $0x2b0] ss:$28 sps:$4 sm:$0xff]   ;;  %v8422_v54 = vld [vmem:[#allocation8 + $0x478] ss:$28 sps:$4 sm:$0xff]  }
 0x2dd   :  { %5580 = vmatprep.mubr.bf16.mxu1 %v8971_v13  ;;  %5744 = vmatprep.mubr.bf16.mxu0 %v8971_v13  ;;  %v8381_v13 = vld [vmem:[#allocation8 + $0x2b8] ss:$28 sps:$4 sm:$0xff]  }
 0x2de   :  { %5550 = vmatprep.subr.bf16.mxu1 %v8365_v23  ;;  %7318 = vmatprep.subr.bf16.mxu0 %v8366_v25  ;;  %v8425_v23 = vld [vmem:[#allocation8 + $0x2ec] ss:$28 sps:$4 sm:$0xff]  }
 0x2df   :  { %v8426_v25 = vld [vmem:[#allocation8 + $0x670] ss:$28 sps:$4 sm:$0xff]  }
 0x2e0   :  { %5551 = vmatpush1.bf16.msra.mxu1 %v8363_v26  ;;  %7319 = vmatpush3.bf16.msra.mxu0 %v8367_v27  ;;  %v8423_v26 = vld [vmem:[#allocation8 + $0x2e8] ss:$28 sps:$4 sm:$0xff]   ;;  %v8427_v27 = vld [vmem:[#allocation8 + $0x4b0] ss:$28 sps:$4 sm:$0xff]  }
 0x2e1   :  { %5552 = vmatprep.subr.bf16.mxu1 %v8370_v20  ;;  %7320 = vmatprep.subr.bf16.mxu0 %v8371_v30  ;;  %v8430_v20 = vld [vmem:[#allocation8 + $0x324] ss:$28 sps:$4 sm:$0xff]  }
 0x2e2   :  { %v8431_v30 = vld [vmem:[#allocation8 + $0x6a8] ss:$28 sps:$4 sm:$0xff]  }
 0x2e4   :  { %5553 = vmatpush1.bf16.msra.mxu1 %v8368_v31  ;;  %7321 = vmatpush3.bf16.msra.mxu0 %v8372_v32  ;;  %v8428_v31 = vld [vmem:[#allocation8 + $0x320] ss:$28 sps:$4 sm:$0xff]   ;;  %v8432_v32 = vld [vmem:[#allocation8 + $0x4e8] ss:$28 sps:$4 sm:$0xff]  }
 0x2e5   :  { %5554 = vmatprep.subr.bf16.mxu1 %v8375_v33  ;;  %7322 = vmatprep.subr.bf16.mxu0 %v8376_v34  ;;  %v8435_v33 = vld [vmem:[#allocation8 + $0x35c] ss:$28 sps:$4 sm:$0xff]  }
 0x2e6   :  { %v8436_v34 = vld [vmem:[#allocation8 + $0x6e0] ss:$28 sps:$4 sm:$0xff]  }
 0x2e8   :  { %5555 = vmatpush1.bf16.msra.mxu1 %v8373_v35  ;;  %7323 = vmatpush3.bf16.msra.mxu0 %v8377_v37  ;;  %v8433_v35 = vld [vmem:[#allocation8 + $0x358] ss:$28 sps:$4 sm:$0xff]   ;;  %v8437_v37 = vld [vmem:[#allocation8 + $0x520] ss:$28 sps:$4 sm:$0xff]  }
 0x2e9   :  { %5556 = vmatprep.subr.bf16.mxu1 %v8380_v39  ;;  %7324 = vmatprep.subr.bf16.mxu0 %v8381_v13  ;;  %v8440_v39 = vld [vmem:[#allocation8 + $0x394] ss:$28 sps:$4 sm:$0xff]  }
 0x2ea   :  { %v8441_v13 = vld [vmem:[#allocation8 + $0x8d8] ss:$28 sps:$4 sm:$0xff]  }
 0x2ec   :  { %5557 = vmatpush1.bf16.msra.mxu1 %v8378_v40  ;;  %7325 = vmatpush3.bf16.msra.mxu0 %v8382_v41  ;;  %v8438_v40 = vld [vmem:[#allocation8 + $0x390] ss:$28 sps:$4 sm:$0xff]   ;;  %v8442_v41 = vld [vmem:[#allocation8 + $0x718] ss:$28 sps:$4 sm:$0xff]  }
 0x2ed   :  { %5558 = vmatprep.subr.bf16.mxu1 %v8385_v42  ;;  %7326 = vmatprep.subr.bf16.mxu0 %v8386_v43  ;;  %v8445_v42 = vld [vmem:[#allocation8 + $0x3cc] ss:$28 sps:$4 sm:$0xff]  }
 0x2ee   :  { %v8446_v43 = vld [vmem:[#allocation8 + $0x910] ss:$28 sps:$4 sm:$0xff]  }
 0x2f0   :  { %5559 = vmatpush1.bf16.msra.mxu1 %v8383_v45  ;;  %7327 = vmatpush3.bf16.msra.mxu0 %v8387_v47  ;;  %v8443_v45 = vld [vmem:[#allocation8 + $0x3c8] ss:$28 sps:$4 sm:$0xff]   ;;  %v8447_v47 = vld [vmem:[#allocation8 + $0x750] ss:$28 sps:$4 sm:$0xff]  }
 0x2f1   :  { %5560 = vmatprep.subr.bf16.mxu1 %v8390_v9  ;;  %7328 = vmatprep.subr.bf16.mxu0 %v8391_v36  ;;  %v8450_v9 = vld [vmem:[#allocation8 + $0x404] ss:$28 sps:$4 sm:$0xff]  }
 0x2f2   :  { %v8451_v36 = vld [vmem:[#allocation8 + $0x948] ss:$28 sps:$4 sm:$0xff]  }
 0x2f4   :  { %5561 = vmatpush1.bf16.msra.mxu1 %v8388_v49  ;;  %7329 = vmatpush3.bf16.msra.mxu0 %v8392_v18  ;;  %v8448_v49 = vld [vmem:[#allocation8 + $0x400] ss:$28 sps:$4 sm:$0xff]   ;;  %v8452_v18 = vld [vmem:[#allocation8 + $0x788] ss:$28 sps:$4 sm:$0xff]  }
 0x2f5   :  { %5562 = vmatprep.subr.bf16.mxu1 %v8395_v10  ;;  %7330 = vmatprep.subr.bf16.mxu0 %v8396_v58  ;;  %v8456_v10 = vld [vmem:[#allocation8 + $0x980] ss:$28 sps:$4 sm:$0xff]   ;;  %v8453_v58 = vld [vmem:[#allocation8 + $0x438] ss:$28 sps:$4 sm:$0xff]  }
 0x2f8   :  { %5563 = vmatpush1.bf16.msra.mxu1 %v8393_v24  ;;  %7331 = vmatpush3.bf16.msra.mxu0 %v8397_v59  ;;  %v8460_v24 = vld [vmem:[#allocation8 + $0x474] ss:$28 sps:$4 sm:$0xff]  }
 0x2f9   :  { %5564 = vmatprep.subr.bf16.mxu1 %v8400_v60  ;;  %7338 = vmatprep.subr.bf16.mxu0 %v8401_v61  ;;  %v8461_v59 = vld [vmem:[#allocation8 + $0x9b8] ss:$28 sps:$4 sm:$0xff]   ;;  %v8458_v60 = vld [vmem:[#allocation8 + $0x470] ss:$28 sps:$4 sm:$0xff]  }
 0x2fa   :  { %v8462_v61 = vld [vmem:[#allocation8 + $0x7f8] ss:$28 sps:$4 sm:$0xff]  }
 0x2fb   :  { %5745 = vmatmul.mubr.bf16.vlgmr.msra.gmra.mrb[12].mxu0 %v8973_v16 }
 0x2fc   :  { %5565 = vmatpush1.bf16.msra.mxu1 %v8398_v62  ;;  %7339 = vmatpush3.bf16.msra.mxu0 %v8402_v63  ;;  %v8465_v62 = vld [vmem:[#allocation8 + $0x4ac] ss:$28 sps:$4 sm:$0xff]  }
 0x2fd   :  { %5784 = vmatprep.mubr.bf16.mxu0 %v8984_v44  ;;  %5566 = vmatprep.subr.bf16.mxu1 %v8405_v2  ;;  %v8466_v63 = vld [vmem:[#allocation8 + $0x9f0] ss:$28 sps:$4 sm:$0xff]   ;;  %v8463_v2 = vld [vmem:[#allocation8 + $0x4a8] ss:$28 sps:$4 sm:$0xff]  }
 0x2fe   :  { %7340 = vmatprep.subr.bf16.mxu0 %v8406_v4  ;;  %v8467_v4 = vld [vmem:[#allocation8 + $0x830] ss:$28 sps:$4 sm:$0xff]  }
 0x300   :  { %5567 = vmatpush1.bf16.msra.mxu1 %v8403_v5  ;;  %7341 = vmatpush3.bf16.msra.mxu0 %v8407_v6  ;;  %v8470_v5 = vld [vmem:[#allocation8 + $0x4e4] ss:$28 sps:$4 sm:$0xff]  }
 0x301   :  { %5568 = vmatprep.subr.bf16.mxu1 %v8410_v7  ;;  %7342 = vmatprep.subr.bf16.mxu0 %v8411_v8  ;;  %v8471_v6 = vld [vmem:[#allocation8 + $0xa28] ss:$28 sps:$4 sm:$0xff]   ;;  %v8468_v7 = vld [vmem:[#allocation8 + $0x4e0] ss:$28 sps:$4 sm:$0xff]  }
 0x302   :  { %v8472_v8 = vld [vmem:[#allocation8 + $0x868] ss:$28 sps:$4 sm:$0xff]  }
 0x304   :  { %5569 = vmatpush1.bf16.msra.mxu1 %v8408_v11  ;;  %7343 = vmatpush3.bf16.msra.mxu0 %v8412_v14  ;;  %v8475_v11 = vld [vmem:[#allocation8 + $0x51c] ss:$28 sps:$4 sm:$0xff]  }
 0x305   :  { %5570 = vmatprep.subr.bf16.mxu1 %v8415_v15  ;;  %7344 = vmatprep.subr.bf16.mxu0 %v8416_v46  ;;  %v8476_v14 = vld [vmem:[#allocation8 + $0xa60] ss:$28 sps:$4 sm:$0xff]   ;;  %v8473_v15 = vld [vmem:[#allocation8 + $0x518] ss:$28 sps:$4 sm:$0xff]  }
 0x306   :  { %v8477_v46 = vld [vmem:[#allocation8 + $0x8a0] ss:$28 sps:$4 sm:$0xff]  }
 0x308   :  { %5571 = vmatpush1.bf16.msra.mxu1 %v8413_v48  ;;  %7345 = vmatpush3.bf16.msra.mxu0 %v8417_v17  ;;  %v8480_v48 = vld [vmem:[#allocation8 + $0x554] ss:$28 sps:$4 sm:$0xff]  }
 0x309   :  { %5572 = vmatprep.subr.bf16.mxu1 %v8420_v55  ;;  %7346 = vmatprep.subr.bf16.mxu0 %v8421_v19  ;;  %v8478_v17 = vld [vmem:[#allocation8 + $0x550] ss:$28 sps:$4 sm:$0xff]   ;;  %v8481_v55 = vld [vmem:[#allocation8 + $0xa98] ss:$28 sps:$4 sm:$0xff]  }
 0x30a   :  { %v8484_v19 = vld [vmem:[#allocation8 + $0x58c] ss:$28 sps:$4 sm:$0xff]  }
 0x30c   :  { %5573 = vmatpush1.bf16.msra.mxu1 %v8418_v21  ;;  %7347 = vmatpush3.bf16.msra.mxu0 %v8422_v54  ;;  %v8482_v21 = vld [vmem:[#allocation8 + $0x588] ss:$28 sps:$4 sm:$0xff]   ;;  %v8485_v54 = vld [vmem:[#allocation8 + $0xad0] ss:$28 sps:$4 sm:$0xff]  }
 0x30d   :  { %5574 = vmatprep.subr.bf16.mxu1 %v8425_v23  ;;  %7348 = vmatprep.subr.bf16.mxu0 %v8426_v25  ;;  %v8488_v23 = vld [vmem:[#allocation8 + $0x5c4] ss:$28 sps:$4 sm:$0xff]   ;;  %v8552_v25 = vld [vmem:[%s9258_s5 + $0x40] sm:$0xff]  }
 0x310   :  { %5575 = vmatpush1.bf16.msra.mxu1 %v8423_v26  ;;  %7349 = vmatpush3.bf16.msra.mxu0 %v8427_v27  ;;  %v8486_v26 = vld [vmem:[#allocation8 + $0x5c0] ss:$28 sps:$4 sm:$0xff]  }
 0x311   :  { %5576 = vmatprep.subr.bf16.mxu1 %v8430_v20  ;;  %7350 = vmatprep.subr.bf16.mxu0 %v8431_v30  ;;  %v8491_v27 = vld [vmem:[#allocation8 + $0x5fc] ss:$28 sps:$4 sm:$0xff]   ;;  %v8553_v20 = vld [vmem:[%s9258_s5] sm:$0xff]   ;;  %v8557_v30 = vld [vmem:[%s9258_s5 + $0x48] sm:$0xff]  }
 0x314   :  { %5577 = vmatpush1.bf16.msra.mxu1 %v8428_v31  ;;  %7351 = vmatpush3.bf16.msra.mxu0 %v8432_v32  ;;  %v8489_v31 = vld [vmem:[#allocation8 + $0x5f8] ss:$28 sps:$4 sm:$0xff]  }
 0x315   :  { %5578 = vmatprep.subr.bf16.mxu1 %v8435_v33  ;;  %7352 = vmatprep.subr.bf16.mxu0 %v8436_v34  ;;  %v8494_v32 = vld [vmem:[#allocation8 + $0x634] ss:$28 sps:$4 sm:$0xff]   ;;  %v8559_v34 = vld [vmem:[%s9258_s5 + $0x50] sm:$0xff]  }
 0x316   :  { %v8558_v33 = vld [vmem:[%s9258_s5 + $0x8] sm:$0xff]  }
 0x318   :  { %5579 = vmatpush1.bf16.msra.mxu1 %v8433_v35  ;;  %7353 = vmatpush3.bf16.msra.mxu0 %v8437_v37  ;;  %v8492_v35 = vld [vmem:[#allocation8 + $0x630] ss:$28 sps:$4 sm:$0xff]  }
 0x319   :  { %5589 = vmatprep.subr.bf16.mxu1 %v8440_v39  ;;  %7360 = vmatprep.subr.bf16.mxu0 %v8441_v13  ;;  %v8497_v37 = vld [vmem:[#allocation8 + $0x66c] ss:$28 sps:$4 sm:$0xff]   ;;  %v8563_v39 = vld [vmem:[%s9258_s5 + $0x10] sm:$0xff]   ;;  %v8564_v13 = vld [vmem:[%s9258_s5 + $0x58] sm:$0xff]  }
 0x31b   :  { %5581 = vmatmul.mubr.bf16.vlgmr.msra.gmra.mrb[32].mxu1 %v8973_v16  ;;  %5785 = vmatmul.mubr.bf16.vlgmr.msra.gmra.mrb[16].mxu0 %v9000_v28  ;;  %v8455_v16 = vld [vmem:[#allocation8 + $0x43c] ss:$28 sps:$4 sm:$0xff]  }
 0x31c   :  { %5590 = vmatpush1.bf16.msra.mxu1 %v8438_v40  ;;  %5621 = vmatprep.mubr.bf16.mxu1 %v8984_v44  ;;  %v8457_v44 = vld [vmem:[#allocation8 + $0x7c0] ss:$28 sps:$4 sm:$0xff]   ;;  %v8495_v40 = vld [vmem:[#allocation8 + $0x668] ss:$28 sps:$4 sm:$0xff]  }
 0x31d   :  { %7361 = vmatpush3.bf16.msra.mxu0 %v8442_v41  ;;  %5824 = vmatprep.mubr.bf16.mxu0 %v9022_v51  ;;  %v8500_v41 = vld [vmem:[#allocation8 + $0x6a4] ss:$28 sps:$4 sm:$0xff]  }
 0x31e   :  { %5591 = vmatprep.subr.bf16.mxu1 %v8445_v42  ;;  %7362 = vmatprep.subr.bf16.mxu0 %v8446_v43  ;;  %v8565_v42 = vld [vmem:[%s9258_s5 + $0x18] sm:$0xff]   ;;  %v8568_v43 = vld [vmem:[%s9258_s5 + $0x60] sm:$0xff]  }
 0x320   :  { %5592 = vmatpush1.bf16.msra.mxu1 %v8443_v45  ;;  %v8498_v45 = vld [vmem:[#allocation8 + $0x6a0] ss:$28 sps:$4 sm:$0xff]  }
 0x321   :  { %7363 = vmatpush3.bf16.msra.mxu0 %v8447_v47  ;;  %5593 = vmatprep.subr.bf16.mxu1 %v8450_v9  ;;  %v8503_v47 = vld [vmem:[#allocation8 + $0x6dc] ss:$28 sps:$4 sm:$0xff]   ;;  %v8569_v9 = vld [vmem:[%s9258_s5 + $0x20] sm:$0xff]  }
 0x322   :  { %7364 = vmatprep.subr.bf16.mxu0 %v8451_v36  ;;  %v8572_v36 = vld [vmem:[%s9258_s5 + $0x68] sm:$0xff]  }
 0x324   :  { %5594 = vmatpush1.bf16.msra.mxu1 %v8448_v49  ;;  %v8501_v49 = vld [vmem:[#allocation8 + $0x6d8] ss:$28 sps:$4 sm:$0xff]  }
 0x325   :  { %7365 = vmatpush3.bf16.msra.mxu0 %v8452_v18  ;;  %5595 = vmatprep.subr.bf16.mxu1 %v8455_v16  ;;  %v8506_v18 = vld [vmem:[#allocation8 + $0x714] ss:$28 sps:$4 sm:$0xff]  }
 0x326   :  { %7366 = vmatprep.subr.bf16.mxu0 %v8456_v10  ;;  %v8573_v16 = vld [vmem:[%s9258_s5 + $0x28] sm:$0xff]   ;;  %v8576_v10 = vld [vmem:[%s9258_s5 + $0x70] sm:$0xff]  }
 0x328   :  { %5596 = vmatpush1.bf16.msra.mxu1 %v8453_v58  ;;  %v8504_v58 = vld [vmem:[#allocation8 + $0x710] ss:$28 sps:$4 sm:$0xff]  }
 0x329   :  { %7367 = vmatpush3.bf16.msra.mxu0 %v8457_v44  ;;  %5597 = vmatprep.subr.bf16.mxu1 %v8460_v24  ;;  %v8509_v44 = vld [vmem:[#allocation8 + $0x74c] ss:$28 sps:$4 sm:$0xff]   ;;  %v8577_v24 = vld [vmem:[%s9258_s5 + $0x30] sm:$0xff]  }
 0x32a   :  { %7368 = vmatprep.subr.bf16.mxu0 %v8461_v59  ;;  %v8580_v59 = vld [vmem:[%s9258_s5 + $0x78] sm:$0xff]  }
 0x32c   :  { %5598 = vmatpush1.bf16.msra.mxu1 %v8458_v60  ;;  %v8507_v60 = vld [vmem:[#allocation8 + $0x748] ss:$28 sps:$4 sm:$0xff]  }
 0x32d   :  { %7369 = vmatpush3.bf16.msra.mxu0 %v8462_v61  ;;  %5599 = vmatprep.subr.bf16.mxu1 %v8465_v62  ;;  %v8512_v61 = vld [vmem:[#allocation8 + $0x784] ss:$28 sps:$4 sm:$0xff]  }
 0x32e   :  { %7370 = vmatprep.subr.bf16.mxu0 %v8466_v63  ;;  %v8581_v62 = vld [vmem:[%s9258_s5 + $0x38] sm:$0xff]  }
 0x32f   :  { %v8510_v63 = vld [vmem:[#allocation8 + $0x780] ss:$28 sps:$4 sm:$0xff]  }
 0x330   :  { %5600 = vmatpush1.bf16.msra.mxu1 %v8463_v2  ;;  %v8515_v2 = vld [vmem:[#allocation8 + $0x7bc] ss:$28 sps:$4 sm:$0xff]  }
 0x331   :  { %7371 = vmatpush3.bf16.msra.mxu0 %v8467_v4  ;;  %5601 = vmatprep.subr.bf16.mxu1 %v8470_v5  ;;  %v8513_v4 = vld [vmem:[#allocation8 + $0x7b8] ss:$28 sps:$4 sm:$0xff]   ;;  %v8521_v5 = vld [vmem:[#allocation8 + $0x82c] ss:$28 sps:$4 sm:$0xff]  }
 0x332   :  { %7372 = vmatprep.subr.bf16.mxu0 %v8471_v6  ;;  %v8519_v6 = vld [vmem:[#allocation8 + $0x828] ss:$28 sps:$4 sm:$0xff]  }
 0x334   :  { %5602 = vmatpush1.bf16.msra.mxu1 %v8468_v7  ;;  %v8524_v7 = vld [vmem:[#allocation8 + $0x864] ss:$28 sps:$4 sm:$0xff]  }
 0x335   :  { %7373 = vmatpush3.bf16.msra.mxu0 %v8472_v8  ;;  %5603 = vmatprep.subr.bf16.mxu1 %v8475_v11  ;;  %v8522_v8 = vld [vmem:[#allocation8 + $0x860] ss:$28 sps:$4 sm:$0xff]  }
 0x336   :  { %7374 = vmatprep.subr.bf16.mxu0 %v8476_v14  ;;  %v8527_v11 = vld [vmem:[#allocation8 + $0x89c] ss:$28 sps:$4 sm:$0xff]  }
 0x337   :  { %v8525_v14 = vld [vmem:[#allocation8 + $0x898] ss:$28 sps:$4 sm:$0xff]  }
 0x338   :  { %5604 = vmatpush1.bf16.msra.mxu1 %v8473_v15  ;;  %v8530_v15 = vld [vmem:[#allocation8 + $0x8d4] ss:$28 sps:$4 sm:$0xff]  }
 0x339   :  { %7375 = vmatpush3.bf16.msra.mxu0 %v8477_v46  ;;  %5605 = vmatprep.subr.bf16.mxu1 %v8480_v48  ;;  %v8528_v46 = vld [vmem:[#allocation8 + $0x8d0] ss:$28 sps:$4 sm:$0xff]  }
 0x33a   :  { %7460 = vmatprep.subr.bf16.mxu0 %v8786_v38  ;;  %v8533_v48 = vld [vmem:[#allocation8 + $0x90c] ss:$28 sps:$4 sm:$0xff]  }
 0x33c   :  { %5825 = vmatmul.mubr.bf16.vlgmr.msra.gmra.mrb[20].mxu0 %v9024_v12  ;;  %5606 = vmatpush1.bf16.msra.mxu1 %v8478_v17  ;;  %v8531_v17 = vld [vmem:[#allocation8 + $0x908] ss:$28 sps:$4 sm:$0xff]  }
 0x33d   :  { %7461 = vmatpush3.bf16.msra.mxu0 %v8481_v55  ;;  %5607 = vmatprep.subr.bf16.mxu1 %v8484_v19  ;;  %v8536_v55 = vld [vmem:[#allocation8 + $0x944] ss:$28 sps:$4 sm:$0xff]  }
 0x33e   :  { %7462 = vmatprep.subr.bf16.mxu0 %v8786_v38  ;;  %7464 = vmatprep.mubr.msk.bf16.mxu0 %vm8787_vm1, %v8786_v38  ;;  %v8534_v19 = vld [vmem:[#allocation8 + $0x940] ss:$28 sps:$4 sm:$0xff]  }
 0x340   :  { %5608 = vmatpush1.bf16.msra.mxu1 %v8482_v21  ;;  %v8539_v21 = vld [vmem:[#allocation8 + $0x97c] ss:$28 sps:$4 sm:$0xff]  }
 0x341   :  { %7463 = vmatpush3.bf16.msra.mxu0 %v8485_v54  ;;  %5609 = vmatprep.subr.bf16.mxu1 %v8488_v23  ;;  %v8537_v54 = vld [vmem:[#allocation8 + $0x978] ss:$28 sps:$4 sm:$0xff]  }
 0x342   :  { %7385 = vmatprep.subr.bf16.mxu0 %v8552_v25  ;;  %v8542_v23 = vld [vmem:[#allocation8 + $0x9b4] ss:$28 sps:$4 sm:$0xff]  }
 0x343   :  { %v8540_v25 = vld [vmem:[#allocation8 + $0x9b0] ss:$28 sps:$4 sm:$0xff]  }
 0x344   :  { %7465 = vmatmul.mubr.msk.bf16.vlgmr.msra.gmra.mrb[24].mxu0 %vm5216_vm2, %v9033_v22  ;;  %5610 = vmatpush1.bf16.msra.mxu1 %v8486_v26  ;;  %v8545_v26 = vld [vmem:[#allocation8 + $0x9ec] ss:$28 sps:$4 sm:$0xff]  }
 0x345   :  { %5611 = vmatprep.subr.bf16.mxu1 %v8491_v27  ;;  %7386 = vmatpush3.bf16.msra.mxu0 %v8553_v20  ;;  %v8543_v27 = vld [vmem:[#allocation8 + $0x9e8] ss:$28 sps:$4 sm:$0xff]  }
 0x346   :  { %7387 = vmatprep.subr.bf16.mxu0 %v8557_v30  ;;  %v8548_v20 = vld [vmem:[#allocation8 + $0xa24] ss:$28 sps:$4 sm:$0xff]  }
 0x347   :  { %v8546_v30 = vld [vmem:[#allocation8 + $0xa20] ss:$28 sps:$4 sm:$0xff]  }
 0x348   :  { %5612 = vmatpush1.bf16.msra.mxu1 %v8489_v31  ;;  %v8551_v31 = vld [vmem:[#allocation8 + $0xa5c] ss:$28 sps:$4 sm:$0xff]  }
 0x349   :  { %5613 = vmatprep.subr.bf16.mxu1 %v8494_v32  ;;  %7388 = vmatpush3.bf16.msra.mxu0 %v8558_v33  ;;  %v8549_v32 = vld [vmem:[#allocation8 + $0xa58] ss:$28 sps:$4 sm:$0xff]  }
 0x34a   :  { %7389 = vmatprep.subr.bf16.mxu0 %v8559_v34  ;;  %v8556_v33 = vld [vmem:[#allocation8 + $0xa94] ss:$28 sps:$4 sm:$0xff]  }
 0x34b   :  { %v8554_v34 = vld [vmem:[#allocation8 + $0xa90] ss:$28 sps:$4 sm:$0xff]  }
 0x34c   :  { %5614 = vmatpush1.bf16.msra.mxu1 %v8492_v35  ;;  %v8562_v35 = vld [vmem:[#allocation8 + $0xacc] ss:$28 sps:$4 sm:$0xff]  }
 0x34d   :  { %5615 = vmatprep.subr.bf16.mxu1 %v8497_v37  ;;  %7390 = vmatpush3.bf16.msra.mxu0 %v8563_v39  ;;  %v8560_v37 = vld [vmem:[#allocation8 + $0xac8] ss:$28 sps:$4 sm:$0xff]  }
 0x34e   :  { %7391 = vmatprep.subr.bf16.mxu0 %v8564_v13  ;;  %v8566_v39 = vld [vmem:[%s9258_s5 + $0xc0] sm:$0xff]  }
 0x34f   :  { %v8592_v13 = vld [vmem:[%s9258_s5 + $0x140] sm:$0xff]  }
 0x350   :  { %5616 = vmatpush1.bf16.msra.mxu1 %v8495_v40  ;;  %v8571_v40 = vld [vmem:[%s9258_s5 + $0x88] sm:$0xff]  }
 0x351   :  { %5617 = vmatprep.subr.bf16.mxu1 %v8500_v41  ;;  %7392 = vmatpush3.bf16.msra.mxu0 %v8565_v42  ;;  %v9123_v41 = vld [vmem:[#allocation10] sm:$0x7f]  ;;  %v8574_v42 = vld [vmem:[%s9258_s5 + $0xd0] sm:$0xff]  }
 0x352   :  { %7393 = vmatprep.subr.bf16.mxu0 %v8568_v43  ;;  %v3384_v43 = vrot.slane %v9123_v41, %v512_v29 }
 0x354   :  { %5618 = vmatpush1.bf16.msra.mxu1 %v8498_v45  ;;  %v3388_v45 = vrot.slane %v9123_v41, %v516_v56  ;;  %v8579_v56 = vld [vmem:[%s9258_s5 + $0x98] sm:$0xff]  }
 0x355   :  { %5619 = vmatprep.subr.bf16.mxu1 %v8503_v47  ;;  %7394 = vmatpush3.bf16.msra.mxu0 %v8569_v9  ;;  %v3396_v47 = vrot.slane %v9123_v41, %v524_v57  ;;  %v8578_v9 = vld [vmem:[%s9258_s5 + $0xd8] sm:$0xff]  }
 0x356   :  { %7395 = vmatprep.subr.bf16.mxu0 %v8572_v36 }
 0x358   :  { %5620 = vmatpush1.bf16.msra.mxu1 %v8501_v49 }
 0x359   :  { %5630 = vmatprep.subr.bf16.mxu1 %v8506_v18  ;;  %7396 = vmatpush3.bf16.msra.mxu0 %v8573_v16 }
 0x35a   :  { %7397 = vmatprep.subr.bf16.mxu0 %v8576_v10 }
 0x35b   :  { %5622 = vmatmul.mubr.bf16.vlgmr.msra.gmra.mrb[32].mxu1 %v9000_v28  ;;  %v8518_v28 = vld [vmem:[#allocation8 + $0x7f4] ss:$28 sps:$4 sm:$0xff]  }
 0x35c   :  { %5631 = vmatpush1.bf16.msra.mxu1 %v8504_v58  ;;  %5662 = vmatprep.mubr.bf16.mxu1 %v9022_v51  ;;  %v8516_v51 = vld [vmem:[#allocation8 + $0x7f0] ss:$28 sps:$4 sm:$0xff]  }
 0x35d   :  { %5632 = vmatprep.subr.bf16.mxu1 %v8509_v44  ;;  %7398 = vmatpush3.bf16.msra.mxu0 %v8577_v24 }
 0x35e   :  { %7399 = vmatprep.subr.bf16.mxu0 %v8580_v59 }
 0x360   :  { %5633 = vmatpush1.bf16.msra.mxu1 %v8507_v60 }
 0x361   :  { %5634 = vmatprep.subr.bf16.mxu1 %v8512_v61  ;;  %7400 = vmatpush3.bf16.msra.mxu0 %v8581_v62  ;;  %v8582_v61 = vld [vmem:[%s9258_s5 + $0xe0] sm:$0xff]  }
 0x362   :  { %7429 = vmatprep.subr.bf16.mxu0 %v8592_v13  ;;  %v3408_v13 = vrot.slane %v9123_v41, %v536_v1  ;;  %v8606_v1 = vld [vmem:[%s9258_s5 + $0x178] sm:$0xff]  }
 0x364   :  { %5635 = vmatpush1.bf16.msra.mxu1 %v8510_v63 }
 0x365   :  { %5636 = vmatprep.subr.bf16.mxu1 %v8515_v2 }
 0x368   :  { %5637 = vmatpush1.bf16.msra.mxu1 %v8513_v4 }
 0x369   :  { %5638 = vmatprep.subr.bf16.mxu1 %v8518_v28  ;;  %v8583_v28 = vld [vmem:[%s9258_s5 + $0xa0] sm:$0xff]  }
 0x36c   :  { %5639 = vmatpush1.bf16.msra.mxu1 %v8516_v51  ;;  %v8593_v51 = vld [vmem:[%s9258_s5 + $0x100] sm:$0xff]  }
 0x36d   :  { %5640 = vmatprep.subr.bf16.mxu1 %v8521_v5 }
 0x370   :  { %5641 = vmatpush1.bf16.msra.mxu1 %v8519_v6  ;;  %v8584_v6 = vld [vmem:[%s9258_s5 + $0xe8] sm:$0xff]  }
 0x371   :  { %5642 = vmatprep.subr.bf16.mxu1 %v8524_v7  ;;  %v8594_v7 = vld [vmem:[%s9258_s5 + $0x148] sm:$0xff]  }
 0x374   :  { %5643 = vmatpush1.bf16.msra.mxu1 %v8522_v8  ;;  %v8585_v8 = vld [vmem:[%s9258_s5 + $0xa8] sm:$0xff]  }
 0x375   :  { %5644 = vmatprep.subr.bf16.mxu1 %v8527_v11  ;;  %v8595_v11 = vld [vmem:[%s9258_s5 + $0x108] sm:$0xff]  }
 0x378   :  { %5645 = vmatpush1.bf16.msra.mxu1 %v8525_v14  ;;  %v3392_v14 = vrot.slane %v9123_v41, %v520_v3  ;;  %v8597_v3 = vld [vmem:[%s9258_s5 + $0x110] sm:$0xff]  }
 0x379   :  { %5646 = vmatprep.subr.bf16.mxu1 %v8530_v15  ;;  %v8586_v15 = vld [vmem:[%s9258_s5 + $0xf0] sm:$0xff]  }
 0x37c   :  { %5647 = vmatpush1.bf16.msra.mxu1 %v8528_v46  ;;  %v8596_v46 = vld [vmem:[%s9258_s5 + $0x150] sm:$0xff]  }
 0x37d   :  { %5648 = vmatprep.subr.bf16.mxu1 %v8533_v48  ;;  %v8587_v48 = vld [vmem:[%s9258_s5 + $0xb0] sm:$0xff]  }
 0x380   :  { %5649 = vmatpush1.bf16.msra.mxu1 %v8531_v17 }
 0x381   :  { %5650 = vmatprep.subr.bf16.mxu1 %v8536_v55  ;;  %v8588_v55 = vld [vmem:[%s9258_s5 + $0xf8] sm:$0xff]  }
 0x384   :  { %5651 = vmatpush1.bf16.msra.mxu1 %v8534_v19  ;;  %v8598_v19 = vld [vmem:[%s9258_s5 + $0x158] sm:$0xff]  }
 0x385   :  { %5652 = vmatprep.subr.bf16.mxu1 %v8539_v21  ;;  %v8589_v21 = vld [vmem:[%s9258_s5 + $0xb8] sm:$0xff]  }
 0x388   :  { %5653 = vmatpush1.bf16.msra.mxu1 %v8537_v54  ;;  %v8599_v54 = vld [vmem:[%s9258_s5 + $0x118] sm:$0xff]  }
 0x389   :  { %5654 = vmatprep.subr.bf16.mxu1 %v8542_v23 }
 0x38c   :  { %5655 = vmatpush1.bf16.msra.mxu1 %v8540_v25  ;;  %v8600_v25 = vld [vmem:[%s9258_s5 + $0x160] sm:$0xff]  }
 0x38d   :  { %5656 = vmatprep.subr.bf16.mxu1 %v8545_v26  ;;  %v8590_v26 = vld [vmem:[%s9258_s5 + $0x180] sm:$0xff]  }
 0x390   :  { %5657 = vmatpush1.bf16.msra.mxu1 %v8543_v27 }
 0x391   :  { %5658 = vmatprep.subr.bf16.mxu1 %v8548_v20  ;;  %v8601_v20 = vld [vmem:[%s9258_s5 + $0x120] sm:$0xff]  }
 0x394   :  { %5659 = vmatpush1.bf16.msra.mxu1 %v8546_v30  ;;  %v8602_v30 = vld [vmem:[%s9258_s5 + $0x168] sm:$0xff]  }
 0x395   :  { %5660 = vmatprep.subr.bf16.mxu1 %v8551_v31  ;;  %v8591_v31 = vld [vmem:[%s9258_s5 + $0x188] sm:$0xff]  }
 0x398   :  { %5661 = vmatpush1.bf16.msra.mxu1 %v8549_v32  ;;  %v8603_v32 = vld [vmem:[%s9258_s5 + $0x128] sm:$0xff]  }
 0x399   :  { %5671 = vmatprep.subr.bf16.mxu1 %v8556_v33 }
 0x39b   :  { %5663 = vmatmul.mubr.bf16.vlgmr.msra.gmra.mrb[32].mxu1 %v9024_v12  ;;  %v8567_v12 = vld [vmem:[%s9258_s5 + $0x80] sm:$0xff]  }
 0x39c   :  { %5672 = vmatpush1.bf16.msra.mxu1 %v8554_v34  ;;  %5703 = vmatprep.mubr.bf16.mxu1 %v8785_v0  ;;  %v8570_v0 = vld [vmem:[%s9258_s5 + $0xc8] sm:$0xff]  }
 0x39d   :  { %5673 = vmatprep.subr.bf16.mxu1 %v8562_v35 }
 0x3a0   :  { %5674 = vmatpush1.bf16.msra.mxu1 %v8560_v37 }
 0x3a1   :  { %7407 = vmatprep.subr.bf16.mxu1 %v8566_v39 }
 0x3a7   :  { %7194 = vmatmul.mubr.msk.bf16.vlgmr.msra.gmra.mrb[32].mxu1 %vm5216_vm2, %v9033_v22  ;;  %v8575_v22 = vld [vmem:[%s9258_s5 + $0x90] sm:$0xff]  }
 0x3a8   :  { %7408 = vmatpush3.bf16.msra.mxu1 %v8567_v12 }
 0x3a9   :  { %7409 = vmatprep.subr.bf16.mxu1 %v8570_v0 }
 0x3ac   :  { %7410 = vmatpush3.bf16.msra.mxu1 %v8571_v40 }
 0x3ad   :  { %7411 = vmatprep.subr.bf16.mxu1 %v8574_v42 }
 0x3ae   :  { %v5377_v36 = vpop.f32.mrb[28].mxu1  ;;  %v5541_v29 = vpop.f32.mrb[8].mxu0 }
 0x3af   :  { %v7486_v49 = vadd.f32 %v5377_v36, %v3384_v43  ;;  %v5379_v18 = vpop.f32.mrb[29].mxu1  ;;  %v5543_v16 = vpop.f32.mrb[9].mxu0  ;;  %v7488_v17 = vadd.f32 %v5541_v29, %v3392_v14 }
 0x3b0   :  { %7412 = vmatpush3.bf16.msra.mxu1 %v8575_v22  ;;  %v7487_v10 = vadd.f32 %v5379_v18, %v3388_v45  ;;  %v7489_v58 = vadd.f32 %v5543_v16, %v3396_v47  ;;  %v5381_v44 = vpop.f32.mrb[30].mxu1  ;;  %v5545_v24 = vpop.f32.mrb[10].mxu0  ;;  %v8604_v45 = vld [vmem:[%s9258_s5 + $0x170] sm:$0xff]  }
 0x3b1   :  { %v5872_v57 = vmax.f32 %v7486_v49, 0.0  ;;  %v5382_v59 = vpop.f32.mrb[31].mxu1  ;;  %v5546_v60 = vpop.f32.mrb[11].mxu0  ;;  %7413 = vmatprep.subr.bf16.mxu1 %v8578_v9  ;;  %v5874_v23 = vmax.f32 %v7488_v17, 0.0  ;;  %v8605_v47 = vld [vmem:[%s9258_s5 + $0x130] sm:$0xff]   ;;  %v8607_v9 = vld [vmem:[%s9258_s5 + $0x138] sm:$0xff]  }
 0x3b2   :  { %v5873_v62 = vmax.f32 %v7487_v10, 0.0  ;;  %v5875_v63 = vmax.f32 %v7489_v58, 0.0  ;;  %s8788_s5 = smov [#allocation13]  }
 0x3b3   :  { %v5879_v5 = vpack.c.bf16 %v5872_v57, %v5872_v57  ;;  %v5881_v27 = vpack.c.bf16 %v5874_v23, %v5874_v23  ;;  %s6483_s14 = sshll.u32 %s8788_s5, 4  ;;  %s6484_s14 = int_to_ptr.vmem [resolvable:$true] %s6483_s14 }
 0x3b4   :  { %v5880_v2 = vpack.c.bf16 %v5873_v62, %v5873_v62  ;;  %v5882_v4 = vpack.c.bf16 %v5875_v63, %v5875_v63  ;;  %7414 = vmatpush3.bf16.msra.mxu1 %v8579_v56  ;;  %v3404_v62 = vrot.slane %v9123_v41, %v532_v53  ;;  %s8745_s2 = scalar_lea.vmem %s6484_s14, 128  ;;  %p8750_p7 = scmp.lt.s32.totalorder %s6484_s14, %s6484_s14 }
 0x3b5   :  { %7415 = vmatprep.subr.bf16.mxu1 %v8582_v61  ;;  %v3400_v61 = vrot.slane %v9123_v41, %v528_v50  ;;  %p8746_p6 = scmp.ne.s32.totalorder %s6484_s14, %s8745_s2  ;;  %p8751_p8 = scmp.lt.s32.totalorder %s8745_s2, %s8745_s2 }
 0x3b6   :  { %6328 = vmatprep.mubr.bf16.mxu0 %v5880_v2  ;;  %6368 = vmatprep.mubr.bf16.mxu1 %v5882_v4 }
 0x3b7   :  { %6329 = vmatmul.mubr.bf16.vlgmr.msra.gmra.mrb[28].mxu0 %v5879_v5  ;;  %p8752_p9 = por %p8751_p8, %p8750_p7 }
 0x3b8   :  { %7416 = vmatpush3.bf16.msra.mxu1 %v8583_v28  ;;  %7430 = vmatpush3.bf16.msra.mxu0 %v8593_v51 }
 0x3b9   :  { %7417 = vmatprep.subr.bf16.mxu1 %v8584_v6  ;;  %7431 = vmatprep.subr.bf16.mxu0 %v8594_v7  ;;  %p8753_p10 = pnand %p8752_p9, %p8746_p6 }
 0x3bc   :  { %7418 = vmatpush3.bf16.msra.mxu1 %v8585_v8  ;;  %7432 = vmatpush3.bf16.msra.mxu0 %v8595_v11 }
 0x3bd   :  { %7419 = vmatprep.subr.bf16.mxu1 %v8586_v15  ;;  %7433 = vmatprep.subr.bf16.mxu0 %v8596_v46 }
 0x3c0   :  { %7420 = vmatpush3.bf16.msra.mxu1 %v8587_v48  ;;  %7434 = vmatpush3.bf16.msra.mxu0 %v8597_v3 }
 0x3c1   :  { %7421 = vmatprep.subr.bf16.mxu1 %v8588_v55  ;;  %7435 = vmatprep.subr.bf16.mxu0 %v8598_v19 }
 0x3c4   :  { %7422 = vmatpush3.bf16.msra.mxu1 %v8589_v21  ;;  %7436 = vmatpush3.bf16.msra.mxu0 %v8599_v54 }
 0x3c5   :  { %7468 = vmatprep.subr.bf16.mxu1 %v8786_v38  ;;  %7437 = vmatprep.subr.bf16.mxu0 %v8600_v25 }
 0x3c7   :  { %6369 = vmatmul.mubr.bf16.vlgmr.msra.gmra.mrb[36].mxu1 %v5881_v27 }
 0x3c8   :  { %7469 = vmatpush3.bf16.msra.mxu1 %v8590_v26  ;;  %7472 = vmatprep.mubr.msk.bf16.mxu1 %vm8787_vm1, %v8786_v38 }
 0x3c9   :  { %7470 = vmatprep.subr.bf16.mxu1 %v8786_v38  ;;  %7438 = vmatpush3.bf16.msra.mxu0 %v8601_v20 }
 0x3ca   :  { %7439 = vmatprep.subr.bf16.mxu0 %v8602_v30 }
 0x3cc   :  { %7471 = vmatpush3.bf16.msra.mxu1 %v8591_v31 }
 0x3cd   :  { %7440 = vmatpush3.bf16.msra.mxu0 %v8603_v32 }
 0x3ce   :  { %v7332_v33 = vpop.f32.mrb[12].mxu0  ;;  %7441 = vmatprep.subr.bf16.mxu0 %v8604_v45 }
 0x3cf   :  { %v7333_v34 = vpop.f32.mrb[13].mxu0 }
 0x3d0   :  { %v7334_v35 = vadd.f32 %v7333_v34, %v7332_v33  ;;  %v7335_v37 = vpop.f32.mrb[14].mxu0 }
 0x3d1   :  { %v7336_v39 = vpop.f32.mrb[15].mxu0  ;;  %7442 = vmatpush3.bf16.msra.mxu0 %v8605_v47 }
 0x3d2   :  { %v5747_v38 = vadd.f32 %v7334_v35, %v3408_v13  ;;  %7443 = vmatprep.subr.bf16.mxu0 %v8606_v1 }
 0x3d5   :  { %7444 = vmatpush3.bf16.msra.mxu0 %v8607_v9 }
 0x3ee   :  { %v7354_v12 = vpop.f32.mrb[16].mxu0 }
 0x3ef   :  { %v7355_v0 = vpop.f32.mrb[17].mxu0 }
 0x3f0   :  { %v7356_v40 = vadd.f32 %v7355_v0, %v7354_v12  ;;  %v7357_v42 = vpop.f32.mrb[18].mxu0 }
 0x3f1   :  { %v7358_v43 = vpop.f32.mrb[19].mxu0 }
 0x3f2   :  { %v5787_v22 = vadd.f32 %v7356_v40, %v5747_v38 }
 0x40f   :  { %v7376_v36 = vpop.f32.mrb[20].mxu0 }
 0x410   :  { %v7377_v29 = vpop.f32.mrb[21].mxu0 }
 0x411   :  { %v7378_v49 = vadd.f32 %v7377_v29, %v7376_v36  ;;  %v7379_v18 = vpop.f32.mrb[22].mxu0 }
 0x412   :  { %v7380_v16 = vpop.f32.mrb[23].mxu0 }
 0x413   :  { %v5827_v10 = vadd.f32 %v7378_v49, %v5787_v22 }
 0x417   :  { %v5866_v58 = vpop.f32.mrb[24].mxu0 }
 0x418   :  { %v5867_v44 = vadd.f32 %v5866_v58, %v5827_v10  ;;  %v7466_v24 = vpop.f32.mrb[25].mxu0 }
 0x419   :  { %v5869_v56 = vpop.f32.mrb[26].mxu0 }
 0x41a   :  { %v5878_v57 = vmax.f32 %v5867_v44, 0.0  ;;  %v7467_v59 = vpop.f32.mrb[27].mxu0 }
 0x41c   :  { %v5885_v60 = vpack.c.bf16 %v5878_v57, %v5878_v57 }
 0x41e   :  { %7473 = vmatmul.mubr.msk.bf16.vlgmr.msra.gmra.mrb[40].mxu1 %vm5216_vm2, %v5885_v60 }
 0x47a   :  { %v5705_v63 = vpop.f32.mrb[32].mxu1 }
 0x47b   :  { %v7490_v2 = vadd.f32 %v5705_v63, %v3400_v61  ;;  %v5707_v4 = vpop.f32.mrb[33].mxu1 }
 0x47c   :  { %v7491_v28 = vadd.f32 %v5707_v4, %v3404_v62  ;;  %v5709_v51 = vpop.f32.mrb[34].mxu1 }
 0x47d   :  { %v5876_v5 = vmax.f32 %v7490_v2, 0.0  ;;  %v5710_v6 = vpop.f32.mrb[35].mxu1 }
 0x47e   :  { %v5877_v7 = vmax.f32 %v7491_v28, 0.0 }
 0x47f   :  { %v5883_v11 = vpack.c.bf16 %v5876_v5, %v5876_v5 }
 0x480   :  { %v5884_v8 = vpack.c.bf16 %v5877_v7, %v5877_v7 }
 0x482   :  { %6408 = vmatprep.mubr.bf16.mxu0 %v5884_v8 }
 0x483   :  { %6409 = vmatmul.mubr.bf16.vlgmr.msra.gmra.mrb[32].mxu0 %v5883_v11 }
 0x48a   :  { %v7401_v14 = vpop.f32.mrb[28].mxu0 }
 0x48b   :  { %v7402_v15 = vpop.f32.mrb[29].mxu0 }
 0x48c   :  { %v7403_v46 = vadd.f32 %v7402_v15, %v7401_v14  ;;  %v7404_v50 = vpop.f32.mrb[30].mxu0 }
 0x48d   :  { %v7405_v48 = vpop.f32.mrb[31].mxu0 }
 0x48e   :  { %v6331_v41 = vadd.f32 %v7403_v46, %v7196_v52 }
 0x49a   :  { %v7423_v3 = vpop.f32.mrb[36].mxu1 }
 0x49b   :  { %v7424_v53 = vpop.f32.mrb[37].mxu1 }
 0x49c   :  { %v7425_v17 = vadd.f32 %v7424_v53, %v7423_v3  ;;  %v7426_v55 = vpop.f32.mrb[38].mxu1 }
 0x49d   :  { %v7427_v19 = vpop.f32.mrb[39].mxu1 }
 0x49e   :  { %v6371_v21 = vadd.f32 %v7425_v17, %v6331_v41 }
 0x4f1   :  { %v6450_v54 = vpop.f32.mrb[40].mxu1 }
 0x4f2   :  { %v7474_v23 = vpop.f32.mrb[41].mxu1 }
 0x4f3   :  { %v6453_v25 = vpop.f32.mrb[42].mxu1 }
 0x4f4   :  { %v7475_v26 = vpop.f32.mrb[43].mxu1 }
 0x556   :  { %v7445_v27 = vpop.f32.mrb[32].mxu0 }
 0x557   :  { %v7446_v20 = vpop.f32.mrb[33].mxu0 }
 0x558   :  { %v7447_v30 = vadd.f32 %v7446_v20, %v7445_v27  ;;  %v7448_v31 = vpop.f32.mrb[34].mxu0 }
 0x559   :  { %v7449_v32 = vpop.f32.mrb[35].mxu0 }
 0x55a   :  { %v6411_v33 = vadd.f32 %v7447_v30, %v6371_v21 }
 0x55c   :  { %v6451_v34 = vadd.f32 %v6450_v54, %v6411_v33 }
 0x55e   :  { %v6457_v35 = vsel %vm6456_vm3, %v6451_v34, -inf }
 0x55f   :  { %v6458_v37 = vrot.slane %v6457_v35, 4 }
 0x561   :  { %v6459_v39 = vmax.f32 %v6457_v35, %v6458_v37 }
 0x563   :  { %v6460_v13 = vrot.slane %v6459_v39, 2 }
 0x565   :  { %v6461_v12 = vmax.f32 %v6459_v39, %v6460_v13 }
 0x567   :  { %v6462_v0 = vrot.slane %v6461_v12, 1 }
 0x569   :  { %v6463_v38 = vmax.f32 %v6461_v12, %v6462_v0 }
 0x56b   :  { %v6464_v40 = vsub.f32 %v6451_v34, %v6463_v38 }
 0x56d   :  { %v6465_v42 = vmul.f32 1.442695, %v6464_v40 }
 0x56f   :  { %8608 = vpow2.f32 %v6465_v42 }
 0x579   :  { %v8609_v43 = vpop.eup %8608 }
 0x57a   :  { %v6467_v22 = vsel %vm6456_vm3, %v8609_v43, 0.0 }
 0x57b   :  { %v6468_v45 = vrot.slane %v6467_v22, 4 }
 0x57d   :  { %v6469_v47 = vadd.f32 %v6468_v45, %v6467_v22 }
 0x57f   :  { %v6470_v1 = vrot.slane %v6469_v47, 2 }
 0x581   :  { %v6471_v9 = vadd.f32 %v6470_v1, %v6469_v47 }
 0x583   :  { %v6472_v36 = vrot.slane %v6471_v9, 1 }
 0x585   :  { %v6473_v29 = vadd.f32 %v6472_v36, %v6471_v9 }
 0x587   :  { %8610 = vrcp.f32 %v6473_v29 }
 0x591   :  { %v8611_v49 = vpop.eup %8610 }
 0x592   :  { %v6475_v18 = vmul.f32 %v8611_v49, %v8609_v43 }
 0x594   :  { %6476 = vst.msk [vmem:[#allocation13] sm:$0xff] %vm6456_vm3, %v6475_v18 }
 0x595   :  { %8756 = shalt.err (!%p8753_p10)
}
 0x596   :  { %s8757_s12 = scalar_lea.hbm %s9260_s7, 128 }
 0x597   :  { %p8758_p11 = scmp.ne.s32.totalorder %s9260_s7, %s8757_s12  ;;  %p8761_p12 = scmp.lt.u32.totalorder %s8757_s12, %s9260_s7 }
 0x599   :  { %p8763_p13 = pnand %p8761_p12, %p8758_p11 }
 0x59b   :  { %8766 = shalt.err (!%p8763_p13)
}
 0x59c   :  { %6486 = dma.vmem_to_hbm [thread:$0]  %s6484_s14, 128, %s9260_s7, [#allocation4]  }
 0x59d   :  { %8775 = dma.done.wait [#allocation4], 128  }
 0x59e   :  { %8776 = vsyncadd [#allocation4], 4294967168 }
 0x59f   :  { %6490 = vsyncpa [#allocation3], 1 }
 0x5a0   :  { %6491 = vsyncpa [#allocation6], 1 }
 0x5a1   :  { %6492 = vsyncpa [#allocation9], 1 }
 0x5a2   :  { %6493 = vsyncpa [#allocation12], 1 }
 0x5a3   :  { %6494 = vsyncpa [#allocation4], 1 }

</bundles_post_ra>
